<compile_context>
chip_gen: v5e
topology: v5e:2x2
jax: 0.10.0
libtpu: 0.0.40
codegen_flags: <defaults>
</compile_context>

<pallas_src>
import math

import jax
import jax.numpy as jnp
from jax.experimental import pallas as pl
from jax.experimental.pallas import tpu as pltpu  # noqa: F401  (TPU backend)

# ---- small ViT-style config ----
BATCH = 2
SEQ = 8
HIDDEN = 32
NUM_HEADS = 4
HEAD_DIM = HIDDEN // NUM_HEADS
MLP_DIM = 64
NUM_LAYERS = 2
LN_EPS = 1e-6
N_TOK = BATCH * SEQ
# attention_dropout_rate / dropout_rate are inference no-ops; vis=False -> weights=None


def _erf(x):
    # Abramowitz & Stegun 7.1.26 (max abs err ~1.5e-7); uses only exp/mul/add,
    # all of which lower cleanly in Mosaic.  Matches PyTorch's exact-erf gelu
    # to well within float32 tolerance (kept instead of tanh-gelu so the 1e-4
    # tolerance against the exact reference holds).
    a1, a2, a3, a4, a5 = (0.254829592, -0.284496736, 1.421413741,
                          -1.453152027, 1.061405429)
    p = 0.3275911
    sgn = jnp.where(x >= 0.0, 1.0, -1.0)
    ax = jnp.abs(x)
    t = 1.0 / (1.0 + p * ax)
    poly = ((((a5 * t + a4) * t + a3) * t + a2) * t + a1) * t
    return sgn * (1.0 - poly * jnp.exp(-ax * ax))


def _gelu_exact(x):
    # torch.nn.functional.gelu default: 0.5 * x * (1 + erf(x / sqrt(2)))
    return 0.5 * x * (1.0 + _erf(x * (1.0 / math.sqrt(2.0))))


def _layernorm(x, g, b):
    # torch.nn.LayerNorm: biased variance, eps inside sqrt, affine.
    mu = jnp.mean(x, axis=-1, keepdims=True)
    var = jnp.mean((x - mu) ** 2, axis=-1, keepdims=True)
    return (x - mu) * jax.lax.rsqrt(var + LN_EPS) * g + b


# ------------------------- fused Pallas kernel -------------------------

def encoder_kernel(x_ref, ln1g_ref, ln1b_ref,
                   wqkv_ref, bqkv_ref,
                   wo_ref, bo_ref, ln2g_ref, ln2b_ref,
                   w1_ref, b1_ref, w2_ref, b2_ref,
                   encg_ref, encb_ref, o_ref):
    """Whole Encoder (all ViTBlocks + final LayerNorm), single invocation.

    x_ref / o_ref: (B*S, H) flattened residual stream, resident in VMEM for the
    whole kernel.  Weight refs carry a leading layer axis; indexing with the
    static Python layer index is free.
    """
    scale = 1.0 / math.sqrt(HEAD_DIM)
    x = x_ref[...]                                            # (N, H)

    for l in range(NUM_LAYERS):                               # static layer loop
        # ---- attention sub-block ----
        res = x
        xn = _layernorm(x, ln1g_ref[l], ln1b_ref[l])
        # Fused QKV projection: one (N,H) @ (H,3H) matmul instead of three.
        qkv = jnp.dot(xn, wqkv_ref[l],
                      preferred_element_type=jnp.float32) + bqkv_ref[l]
        q = qkv[:, 0 * HIDDEN:1 * HIDDEN]
        k = qkv[:, 1 * HIDDEN:2 * HIDDEN]
        v = qkv[:, 2 * HIDDEN:3 * HIDDEN]

        attn = None
        for hh in range(NUM_HEADS):                           # static head loop,
            lo = hh * HEAD_DIM                                # batched over B inside
            qh = q[:, lo:lo + HEAD_DIM].reshape(BATCH, SEQ, HEAD_DIM)
            kh = k[:, lo:lo + HEAD_DIM].reshape(BATCH, SEQ, HEAD_DIM)
            vh = v[:, lo:lo + HEAD_DIM].reshape(BATCH, SEQ, HEAD_DIM)
            s = jnp.einsum('bqd,bkd->bqk', qh, kh,
                           preferred_element_type=jnp.float32) * scale
            s = s - jnp.max(s, axis=-1, keepdims=True)        # stable softmax (dim=-1)
            e = jnp.exp(s)
            p = e / jnp.sum(e, axis=-1, keepdims=True)
            ctx = jnp.einsum('bqk,bkd->bqd', p, vh,
                             preferred_element_type=jnp.float32)   # (B, S, D)
            # Per-head slice of Wo (pre-split in the wrapper) and accumulate:
            # sum_h ctx_h @ Wo[h*D:(h+1)*D, :] == concat(ctx_h) @ Wo, so no
            # lane-axis concatenate is needed.
            contrib = jnp.dot(ctx.reshape(N_TOK, HEAD_DIM), wo_ref[l, hh],
                              preferred_element_type=jnp.float32)
            attn = contrib if attn is None else attn + contrib
        x = attn + bo_ref[l] + res

        # ---- MLP sub-block ----
        res = x
        xn = _layernorm(x, ln2g_ref[l], ln2b_ref[l])
        y = jnp.dot(xn, w1_ref[l], preferred_element_type=jnp.float32) + b1_ref[l]
        y = _gelu_exact(y)
        y = jnp.dot(y, w2_ref[l], preferred_element_type=jnp.float32) + b2_ref[l]
        x = y + res

    # ---- final encoder LayerNorm ----
    o_ref[...] = _layernorm(x, encg_ref[...], encb_ref[...])


# ------------------------- wrapper -------------------------

def encoder_forward(x, params):
    """Matches Encoder.forward: returns (encoded, attn_weights)."""
    B, S, H = x.shape
    attn_weights = []                    # vis=False -> stays empty, like PyTorch
    x2 = x.reshape(B * S, H)             # flatten batch for the fused kernel
    out2 = pl.pallas_call(
        encoder_kernel,
        out_shape=jax.ShapeDtypeStruct((B * S, H), jnp.float32),
        # no grid / specs: whole arrays live in VMEM, single invocation
    )(x2,
      params['ln1_g'], params['ln1_b'],
      params['wqkv'], params['bqkv'],
      params['wo'], params['bo'],
      params['ln2_g'], params['ln2_b'],
      params['w1'], params['b1'], params['w2'], params['b2'],
      params['enc_g'], params['enc_b'])
    encoded = out2.reshape(B, S, H)
    return encoded, attn_weights


# ------------------------- parameter init (deterministic, synthetic) -------------------------

def init_params(key):
    kit = iter(jax.random.split(key, NUM_LAYERS * 12 + 2))

    def dense(fan_in, fan_out):
        w = jax.random.normal(next(kit), (fan_in, fan_out), jnp.float32)
        w = w * (1.0 / math.sqrt(fan_in))
        b = jax.random.normal(next(kit), (1, fan_out), jnp.float32) * 1e-3
        return w, b

    names = ('ln1_g', 'ln1_b', 'wqkv', 'bqkv',
             'wo', 'bo', 'ln2_g', 'ln2_b', 'w1', 'b1', 'w2', 'b2')
    stacks = {n: [] for n in names}
    for _ in range(NUM_LAYERS):
        wq, bq = dense(HIDDEN, HIDDEN)
        wk, bk = dense(HIDDEN, HIDDEN)
        wv, bv = dense(HIDDEN, HIDDEN)
        wo, bo = dense(HIDDEN, HIDDEN)
        w1, b1 = dense(HIDDEN, MLP_DIM)
        w2, b2 = dense(MLP_DIM, HIDDEN)
        stacks['ln1_g'].append(jnp.ones((1, HIDDEN), jnp.float32))
        stacks['ln1_b'].append(jnp.zeros((1, HIDDEN), jnp.float32))
        # fused QKV projection weight/bias: (H, 3H) / (1, 3H)
        stacks['wqkv'].append(jnp.concatenate([wq, wk, wv], axis=1))
        stacks['bqkv'].append(jnp.concatenate([bq, bk, bv], axis=1))
        # pre-split Wo by head: (H, H) -> (NH, D, H); row block h is exactly the
        # slice multiplied by head-h context, so per-head accumulation == ctx @ Wo
        stacks['wo'].append(wo.reshape(NUM_HEADS, HEAD_DIM, HIDDEN))
        stacks['bo'].append(bo)
        stacks['ln2_g'].append(jnp.ones((1, HIDDEN), jnp.float32))
        stacks['ln2_b'].append(jnp.zeros((1, HIDDEN), jnp.float32))
        stacks['w1'].append(w1); stacks['b1'].append(b1)
        stacks['w2'].append(w2); stacks['b2'].append(b2)

    params = {n: jnp.stack(v, axis=0) for n, v in stacks.items()}
    params['enc_g'] = jnp.ones((1, HIDDEN), jnp.float32)
    params['enc_b'] = jnp.zeros((1, HIDDEN), jnp.float32)
    return params


# ------------------------- pure-JAX reference (for correctness check) -------------------------

def ref_encoder(x, params):
    def ln(v, g, b):
        mu = v.mean(-1, keepdims=True)
        var = ((v - mu) ** 2).mean(-1, keepdims=True)
        return (v - mu) / jnp.sqrt(var + LN_EPS) * g + b

    B, S, H = x.shape
    for l in range(NUM_LAYERS):
        h = x
        xn = ln(x, params['ln1_g'][l], params['ln1_b'][l])
        qkv = xn @ params['wqkv'][l] + params['bqkv'][l]
        q, k, v = qkv[..., :H], qkv[..., H:2 * H], qkv[..., 2 * H:]

        def split(t):
            return t.reshape(B, S, NUM_HEADS, HEAD_DIM).transpose(0, 2, 1, 3)

        qh, kh, vh = split(q), split(k), split(v)
        s = jnp.einsum('bhqd,bhkd->bhqk', qh, kh) / math.sqrt(HEAD_DIM)
        probs = jax.nn.softmax(s, axis=-1)
        ctx = jnp.einsum('bhqk,bhkd->bhqd', probs, vh)
        ctx = ctx.transpose(0, 2, 1, 3).reshape(B, S, H)
        wo_full = params['wo'][l].reshape(H, H)
        x = ctx @ wo_full + params['bo'][l] + h

        h = x
        xn = ln(x, params['ln2_g'][l], params['ln2_b'][l])
        y = jax.nn.gelu(xn @ params['w1'][l] + params['b1'][l], approximate=False)
        x = y @ params['w2'][l] + params['b2'][l] + h
    return ln(x, params['enc_g'], params['enc_b'])


# ------------------------- main -------------------------

if __name__ == "__main__":
    key = jax.random.PRNGKey(0)
    k_x, k_p = jax.random.split(key)
    x = jax.random.normal(k_x, (BATCH, SEQ, HIDDEN), jnp.float32)
    params = init_params(k_p)

    encoded, attn_weights = encoder_forward(x, params)
    encoded = jax.block_until_ready(encoded)

    ref = ref_encoder(x, params)
    assert encoded.shape == (BATCH, SEQ, HIDDEN)
    assert attn_weights == []            # vis=False
    max_err = float(jnp.max(jnp.abs(encoded - ref)))
    assert max_err < 1e-4, f"max abs error {max_err}"

    print("KERNEL_OK")
</pallas_src>

<mosaic_0001>
module attributes {stable_mosaic.version = 11 : i64} {
  func.func @encoder_kernel(%arg0: memref<16x32xf32, #tpu.memory_space<vmem>>, %arg1: memref<2x1x32xf32, #tpu.memory_space<vmem>>, %arg2: memref<2x1x32xf32, #tpu.memory_space<vmem>>, %arg3: memref<2x32x96xf32, #tpu.memory_space<vmem>>, %arg4: memref<2x1x96xf32, #tpu.memory_space<vmem>>, %arg5: memref<2x4x8x32xf32, #tpu.memory_space<vmem>>, %arg6: memref<2x1x32xf32, #tpu.memory_space<vmem>>, %arg7: memref<2x1x32xf32, #tpu.memory_space<vmem>>, %arg8: memref<2x1x32xf32, #tpu.memory_space<vmem>>, %arg9: memref<2x32x64xf32, #tpu.memory_space<vmem>>, %arg10: memref<2x1x64xf32, #tpu.memory_space<vmem>>, %arg11: memref<2x64x32xf32, #tpu.memory_space<vmem>>, %arg12: memref<2x1x32xf32, #tpu.memory_space<vmem>>, %arg13: memref<1x32xf32, #tpu.memory_space<vmem>>, %arg14: memref<1x32xf32, #tpu.memory_space<vmem>>, %arg15: memref<16x32xf32, #tpu.memory_space<vmem>>) attributes {dimension_semantics = [], scalar_prefetch = 0 : i64, scratch_operands = 0 : i64, tpu.core_type = #tpu.core_type<tc>} {
    %c0 = arith.constant 0 : index
    %c0_0 = arith.constant 0 : index
    %0 = vector.load %arg0[%c0, %c0_0] : memref<16x32xf32, #tpu.memory_space<vmem>>, vector<16x32xf32>
    %c0_1 = arith.constant 0 : index
    %c0_2 = arith.constant 0 : index
    %c0_3 = arith.constant 0 : index
    %1 = vector.load %arg1[%c0_1, %c0_2, %c0_3] : memref<2x1x32xf32, #tpu.memory_space<vmem>>, vector<1x1x32xf32>
    %2 = vector.shape_cast %1 : vector<1x1x32xf32> to vector<1x32xf32>
    %c0_4 = arith.constant 0 : index
    %c0_5 = arith.constant 0 : index
    %c0_6 = arith.constant 0 : index
    %3 = vector.load %arg2[%c0_4, %c0_5, %c0_6] : memref<2x1x32xf32, #tpu.memory_space<vmem>>, vector<1x1x32xf32>
    %4 = vector.shape_cast %3 : vector<1x1x32xf32> to vector<1x32xf32>
    %cst = arith.constant dense<0.000000e+00> : vector<16xf32>
    %5 = vector.multi_reduction <add>, %0, %cst [1] : vector<16x32xf32> to vector<16xf32>
    %6 = vector.shape_cast %5 : vector<16xf32> to vector<16x1xf32>
    %cst_7 = arith.constant 3.200000e+01 : f32
    %7 = vector.broadcast %cst_7 : f32 to vector<16x1xf32>
    %8 = arith.divf %6, %7 : vector<16x1xf32>
    %9 = vector.broadcast %8 : vector<16x1xf32> to vector<16x32xf32>
    %10 = arith.subf %0, %9 : vector<16x32xf32>
    %11 = arith.mulf %10, %10 : vector<16x32xf32>
    %cst_8 = arith.constant dense<0.000000e+00> : vector<16xf32>
    %12 = vector.multi_reduction <add>, %11, %cst_8 [1] : vector<16x32xf32> to vector<16xf32>
    %13 = vector.shape_cast %12 : vector<16xf32> to vector<16x1xf32>
    %cst_9 = arith.constant 3.200000e+01 : f32
    %14 = vector.broadcast %cst_9 : f32 to vector<16x1xf32>
    %15 = arith.divf %13, %14 : vector<16x1xf32>
    %16 = vector.broadcast %8 : vector<16x1xf32> to vector<16x32xf32>
    %17 = arith.subf %0, %16 : vector<16x32xf32>
    %cst_10 = arith.constant 9.99999997E-7 : f32
    %18 = vector.broadcast %cst_10 : f32 to vector<16x1xf32>
    %19 = arith.addf %15, %18 : vector<16x1xf32>
    %20 = math.rsqrt %19 : vector<16x1xf32>
    %21 = vector.broadcast %20 : vector<16x1xf32> to vector<16x32xf32>
    %22 = arith.mulf %17, %21 : vector<16x32xf32>
    %23 = vector.broadcast %2 : vector<1x32xf32> to vector<16x32xf32>
    %24 = arith.mulf %22, %23 : vector<16x32xf32>
    %25 = vector.broadcast %4 : vector<1x32xf32> to vector<16x32xf32>
    %26 = arith.addf %24, %25 : vector<16x32xf32>
    %c0_11 = arith.constant 0 : index
    %c0_12 = arith.constant 0 : index
    %c0_13 = arith.constant 0 : index
    %27 = vector.load %arg3[%c0_11, %c0_12, %c0_13] : memref<2x32x96xf32, #tpu.memory_space<vmem>>, vector<1x32x96xf32>
    %28 = vector.shape_cast %27 : vector<1x32x96xf32> to vector<32x96xf32>
    %cst_14 = arith.constant dense<0.000000e+00> : vector<16x96xf32>
    %29 = tpu.matmul %26, %28, %cst_14 {dimension_numbers = #tpu.dot_dimension_numbers<[1], [0], [0], [1], [0, 0, 1, 1], [], []>} : vector<16x32xf32>, vector<32x96xf32>, vector<16x96xf32> -> vector<16x96xf32>
    %c0_15 = arith.constant 0 : index
    %c0_16 = arith.constant 0 : index
    %c0_17 = arith.constant 0 : index
    %30 = vector.load %arg4[%c0_15, %c0_16, %c0_17] : memref<2x1x96xf32, #tpu.memory_space<vmem>>, vector<1x1x96xf32>
    %31 = vector.shape_cast %30 : vector<1x1x96xf32> to vector<1x96xf32>
    %32 = vector.broadcast %31 : vector<1x96xf32> to vector<16x96xf32>
    %33 = arith.addf %29, %32 : vector<16x96xf32>
    %34 = vector.extract_strided_slice %33 {offsets = [0, 0], sizes = [16, 32], strides = [1, 1]} : vector<16x96xf32> to vector<16x32xf32>
    %35 = vector.extract_strided_slice %33 {offsets = [0, 32], sizes = [16, 32], strides = [1, 1]} : vector<16x96xf32> to vector<16x32xf32>
    %36 = vector.extract_strided_slice %33 {offsets = [0, 64], sizes = [16, 32], strides = [1, 1]} : vector<16x96xf32> to vector<16x32xf32>
    %37 = vector.extract_strided_slice %34 {offsets = [0, 0], sizes = [16, 8], strides = [1, 1]} : vector<16x32xf32> to vector<16x8xf32>
    %38 = vector.shape_cast %37 : vector<16x8xf32> to vector<2x8x8xf32>
    %39 = vector.extract_strided_slice %35 {offsets = [0, 0], sizes = [16, 8], strides = [1, 1]} : vector<16x32xf32> to vector<16x8xf32>
    %40 = vector.shape_cast %39 : vector<16x8xf32> to vector<2x8x8xf32>
    %41 = vector.extract_strided_slice %36 {offsets = [0, 0], sizes = [16, 8], strides = [1, 1]} : vector<16x32xf32> to vector<16x8xf32>
    %42 = vector.shape_cast %41 : vector<16x8xf32> to vector<2x8x8xf32>
    "tpu.trace_start"() <{level = 10 : i32, message = "bqd,bkd->bqk"}> : () -> ()
    %cst_18 = arith.constant dense<0.000000e+00> : vector<2x8x8xf32>
    %43 = tpu.matmul %38, %40, %cst_18 {dimension_numbers = #tpu.dot_dimension_numbers<[2], [2], [1], [1], [0, 0, 0, 1, 1, 1], [0], [0]>} : vector<2x8x8xf32>, vector<2x8x8xf32>, vector<2x8x8xf32> -> vector<2x8x8xf32>
    "tpu.trace_stop"() : () -> ()
    %cst_19 = arith.constant 0.353553385 : f32
    %44 = vector.broadcast %cst_19 : f32 to vector<2x8x8xf32>
    %45 = arith.mulf %43, %44 : vector<2x8x8xf32>
    %cst_20 = arith.constant dense<0xFF800000> : vector<2x8xf32>
    %46 = vector.multi_reduction <maximumf>, %45, %cst_20 [2] : vector<2x8x8xf32> to vector<2x8xf32>
    %47 = vector.shape_cast %46 : vector<2x8xf32> to vector<2x8x1xf32>
    %48 = vector.broadcast %47 : vector<2x8x1xf32> to vector<2x8x8xf32>
    %49 = arith.subf %45, %48 : vector<2x8x8xf32>
    %50 = math.exp %49 : vector<2x8x8xf32>
    %cst_21 = arith.constant dense<0.000000e+00> : vector<2x8xf32>
    %51 = vector.multi_reduction <add>, %50, %cst_21 [2] : vector<2x8x8xf32> to vector<2x8xf32>
    %52 = vector.shape_cast %51 : vector<2x8xf32> to vector<2x8x1xf32>
    %53 = vector.broadcast %52 : vector<2x8x1xf32> to vector<2x8x8xf32>
    %54 = arith.divf %50, %53 : vector<2x8x8xf32>
    "tpu.trace_start"() <{level = 10 : i32, message = "bqk,bkd->bqd"}> : () -> ()
    %cst_22 = arith.constant dense<0.000000e+00> : vector<2x8x8xf32>
    %55 = tpu.matmul %54, %42, %cst_22 {dimension_numbers = #tpu.dot_dimension_numbers<[2], [1], [1], [2], [0, 0, 0, 1, 1, 2], [0], [0]>} : vector<2x8x8xf32>, vector<2x8x8xf32>, vector<2x8x8xf32> -> vector<2x8x8xf32>
    "tpu.trace_stop"() : () -> ()
    %56 = vector.shape_cast %55 : vector<2x8x8xf32> to vector<16x8xf32>
    %c0_23 = arith.constant 0 : index
    %c0_24 = arith.constant 0 : index
    %c0_25 = arith.constant 0 : index
    %c0_26 = arith.constant 0 : index
    %57 = vector.load %arg5[%c0_23, %c0_24, %c0_25, %c0_26] : memref<2x4x8x32xf32, #tpu.memory_space<vmem>>, vector<1x1x8x32xf32>
    %58 = vector.shape_cast %57 : vector<1x1x8x32xf32> to vector<8x32xf32>
    %cst_27 = arith.constant dense<0.000000e+00> : vector<16x32xf32>
    %59 = tpu.matmul %56, %58, %cst_27 {dimension_numbers = #tpu.dot_dimension_numbers<[1], [0], [0], [1], [0, 0, 1, 1], [], []>} : vector<16x8xf32>, vector<8x32xf32>, vector<16x32xf32> -> vector<16x32xf32>
    %60 = vector.extract_strided_slice %34 {offsets = [0, 8], sizes = [16, 8], strides = [1, 1]} : vector<16x32xf32> to vector<16x8xf32>
    %61 = vector.shape_cast %60 : vector<16x8xf32> to vector<2x8x8xf32>
    %62 = vector.extract_strided_slice %35 {offsets = [0, 8], sizes = [16, 8], strides = [1, 1]} : vector<16x32xf32> to vector<16x8xf32>
    %63 = vector.shape_cast %62 : vector<16x8xf32> to vector<2x8x8xf32>
    %64 = vector.extract_strided_slice %36 {offsets = [0, 8], sizes = [16, 8], strides = [1, 1]} : vector<16x32xf32> to vector<16x8xf32>
    %65 = vector.shape_cast %64 : vector<16x8xf32> to vector<2x8x8xf32>
    "tpu.trace_start"() <{level = 10 : i32, message = "bqd,bkd->bqk"}> : () -> ()
    %cst_28 = arith.constant dense<0.000000e+00> : vector<2x8x8xf32>
    %66 = tpu.matmul %61, %63, %cst_28 {dimension_numbers = #tpu.dot_dimension_numbers<[2], [2], [1], [1], [0, 0, 0, 1, 1, 1], [0], [0]>} : vector<2x8x8xf32>, vector<2x8x8xf32>, vector<2x8x8xf32> -> vector<2x8x8xf32>
    "tpu.trace_stop"() : () -> ()
    %cst_29 = arith.constant 0.353553385 : f32
    %67 = vector.broadcast %cst_29 : f32 to vector<2x8x8xf32>
    %68 = arith.mulf %66, %67 : vector<2x8x8xf32>
    %cst_30 = arith.constant dense<0xFF800000> : vector<2x8xf32>
    %69 = vector.multi_reduction <maximumf>, %68, %cst_30 [2] : vector<2x8x8xf32> to vector<2x8xf32>
    %70 = vector.shape_cast %69 : vector<2x8xf32> to vector<2x8x1xf32>
    %71 = vector.broadcast %70 : vector<2x8x1xf32> to vector<2x8x8xf32>
    %72 = arith.subf %68, %71 : vector<2x8x8xf32>
    %73 = math.exp %72 : vector<2x8x8xf32>
    %cst_31 = arith.constant dense<0.000000e+00> : vector<2x8xf32>
    %74 = vector.multi_reduction <add>, %73, %cst_31 [2] : vector<2x8x8xf32> to vector<2x8xf32>
    %75 = vector.shape_cast %74 : vector<2x8xf32> to vector<2x8x1xf32>
    %76 = vector.broadcast %75 : vector<2x8x1xf32> to vector<2x8x8xf32>
    %77 = arith.divf %73, %76 : vector<2x8x8xf32>
    "tpu.trace_start"() <{level = 10 : i32, message = "bqk,bkd->bqd"}> : () -> ()
    %cst_32 = arith.constant dense<0.000000e+00> : vector<2x8x8xf32>
    %78 = tpu.matmul %77, %65, %cst_32 {dimension_numbers = #tpu.dot_dimension_numbers<[2], [1], [1], [2], [0, 0, 0, 1, 1, 2], [0], [0]>} : vector<2x8x8xf32>, vector<2x8x8xf32>, vector<2x8x8xf32> -> vector<2x8x8xf32>
    "tpu.trace_stop"() : () -> ()
    %79 = vector.shape_cast %78 : vector<2x8x8xf32> to vector<16x8xf32>
    %c0_33 = arith.constant 0 : index
    %c1 = arith.constant 1 : index
    %c0_34 = arith.constant 0 : index
    %c0_35 = arith.constant 0 : index
    %80 = vector.load %arg5[%c0_33, %c1, %c0_34, %c0_35] : memref<2x4x8x32xf32, #tpu.memory_space<vmem>>, vector<1x1x8x32xf32>
    %81 = vector.shape_cast %80 : vector<1x1x8x32xf32> to vector<8x32xf32>
    %cst_36 = arith.constant dense<0.000000e+00> : vector<16x32xf32>
    %82 = tpu.matmul %79, %81, %cst_36 {dimension_numbers = #tpu.dot_dimension_numbers<[1], [0], [0], [1], [0, 0, 1, 1], [], []>} : vector<16x8xf32>, vector<8x32xf32>, vector<16x32xf32> -> vector<16x32xf32>
    %83 = arith.addf %59, %82 : vector<16x32xf32>
    %84 = vector.extract_strided_slice %34 {offsets = [0, 16], sizes = [16, 8], strides = [1, 1]} : vector<16x32xf32> to vector<16x8xf32>
    %85 = vector.shape_cast %84 : vector<16x8xf32> to vector<2x8x8xf32>
    %86 = vector.extract_strided_slice %35 {offsets = [0, 16], sizes = [16, 8], strides = [1, 1]} : vector<16x32xf32> to vector<16x8xf32>
    %87 = vector.shape_cast %86 : vector<16x8xf32> to vector<2x8x8xf32>
    %88 = vector.extract_strided_slice %36 {offsets = [0, 16], sizes = [16, 8], strides = [1, 1]} : vector<16x32xf32> to vector<16x8xf32>
    %89 = vector.shape_cast %88 : vector<16x8xf32> to vector<2x8x8xf32>
    "tpu.trace_start"() <{level = 10 : i32, message = "bqd,bkd->bqk"}> : () -> ()
    %cst_37 = arith.constant dense<0.000000e+00> : vector<2x8x8xf32>
    %90 = tpu.matmul %85, %87, %cst_37 {dimension_numbers = #tpu.dot_dimension_numbers<[2], [2], [1], [1], [0, 0, 0, 1, 1, 1], [0], [0]>} : vector<2x8x8xf32>, vector<2x8x8xf32>, vector<2x8x8xf32> -> vector<2x8x8xf32>
    "tpu.trace_stop"() : () -> ()
    %cst_38 = arith.constant 0.353553385 : f32
    %91 = vector.broadcast %cst_38 : f32 to vector<2x8x8xf32>
    %92 = arith.mulf %90, %91 : vector<2x8x8xf32>
    %cst_39 = arith.constant dense<0xFF800000> : vector<2x8xf32>
    %93 = vector.multi_reduction <maximumf>, %92, %cst_39 [2] : vector<2x8x8xf32> to vector<2x8xf32>
    %94 = vector.shape_cast %93 : vector<2x8xf32> to vector<2x8x1xf32>
    %95 = vector.broadcast %94 : vector<2x8x1xf32> to vector<2x8x8xf32>
    %96 = arith.subf %92, %95 : vector<2x8x8xf32>
    %97 = math.exp %96 : vector<2x8x8xf32>
    %cst_40 = arith.constant dense<0.000000e+00> : vector<2x8xf32>
    %98 = vector.multi_reduction <add>, %97, %cst_40 [2] : vector<2x8x8xf32> to vector<2x8xf32>
    %99 = vector.shape_cast %98 : vector<2x8xf32> to vector<2x8x1xf32>
    %100 = vector.broadcast %99 : vector<2x8x1xf32> to vector<2x8x8xf32>
    %101 = arith.divf %97, %100 : vector<2x8x8xf32>
    "tpu.trace_start"() <{level = 10 : i32, message = "bqk,bkd->bqd"}> : () -> ()
    %cst_41 = arith.constant dense<0.000000e+00> : vector<2x8x8xf32>
    %102 = tpu.matmul %101, %89, %cst_41 {dimension_numbers = #tpu.dot_dimension_numbers<[2], [1], [1], [2], [0, 0, 0, 1, 1, 2], [0], [0]>} : vector<2x8x8xf32>, vector<2x8x8xf32>, vector<2x8x8xf32> -> vector<2x8x8xf32>
    "tpu.trace_stop"() : () -> ()
    %103 = vector.shape_cast %102 : vector<2x8x8xf32> to vector<16x8xf32>
    %c0_42 = arith.constant 0 : index
    %c2 = arith.constant 2 : index
    %c0_43 = arith.constant 0 : index
    %c0_44 = arith.constant 0 : index
    %104 = vector.load %arg5[%c0_42, %c2, %c0_43, %c0_44] : memref<2x4x8x32xf32, #tpu.memory_space<vmem>>, vector<1x1x8x32xf32>
    %105 = vector.shape_cast %104 : vector<1x1x8x32xf32> to vector<8x32xf32>
    %cst_45 = arith.constant dense<0.000000e+00> : vector<16x32xf32>
    %106 = tpu.matmul %103, %105, %cst_45 {dimension_numbers = #tpu.dot_dimension_numbers<[1], [0], [0], [1], [0, 0, 1, 1], [], []>} : vector<16x8xf32>, vector<8x32xf32>, vector<16x32xf32> -> vector<16x32xf32>
    %107 = arith.addf %83, %106 : vector<16x32xf32>
    %108 = vector.extract_strided_slice %34 {offsets = [0, 24], sizes = [16, 8], strides = [1, 1]} : vector<16x32xf32> to vector<16x8xf32>
    %109 = vector.shape_cast %108 : vector<16x8xf32> to vector<2x8x8xf32>
    %110 = vector.extract_strided_slice %35 {offsets = [0, 24], sizes = [16, 8], strides = [1, 1]} : vector<16x32xf32> to vector<16x8xf32>
    %111 = vector.shape_cast %110 : vector<16x8xf32> to vector<2x8x8xf32>
    %112 = vector.extract_strided_slice %36 {offsets = [0, 24], sizes = [16, 8], strides = [1, 1]} : vector<16x32xf32> to vector<16x8xf32>
    %113 = vector.shape_cast %112 : vector<16x8xf32> to vector<2x8x8xf32>
    "tpu.trace_start"() <{level = 10 : i32, message = "bqd,bkd->bqk"}> : () -> ()
    %cst_46 = arith.constant dense<0.000000e+00> : vector<2x8x8xf32>
    %114 = tpu.matmul %109, %111, %cst_46 {dimension_numbers = #tpu.dot_dimension_numbers<[2], [2], [1], [1], [0, 0, 0, 1, 1, 1], [0], [0]>} : vector<2x8x8xf32>, vector<2x8x8xf32>, vector<2x8x8xf32> -> vector<2x8x8xf32>
    "tpu.trace_stop"() : () -> ()
    %cst_47 = arith.constant 0.353553385 : f32
    %115 = vector.broadcast %cst_47 : f32 to vector<2x8x8xf32>
    %116 = arith.mulf %114, %115 : vector<2x8x8xf32>
    %cst_48 = arith.constant dense<0xFF800000> : vector<2x8xf32>
    %117 = vector.multi_reduction <maximumf>, %116, %cst_48 [2] : vector<2x8x8xf32> to vector<2x8xf32>
    %118 = vector.shape_cast %117 : vector<2x8xf32> to vector<2x8x1xf32>
    %119 = vector.broadcast %118 : vector<2x8x1xf32> to vector<2x8x8xf32>
    %120 = arith.subf %116, %119 : vector<2x8x8xf32>
    %121 = math.exp %120 : vector<2x8x8xf32>
    %cst_49 = arith.constant dense<0.000000e+00> : vector<2x8xf32>
    %122 = vector.multi_reduction <add>, %121, %cst_49 [2] : vector<2x8x8xf32> to vector<2x8xf32>
    %123 = vector.shape_cast %122 : vector<2x8xf32> to vector<2x8x1xf32>
    %124 = vector.broadcast %123 : vector<2x8x1xf32> to vector<2x8x8xf32>
    %125 = arith.divf %121, %124 : vector<2x8x8xf32>
    "tpu.trace_start"() <{level = 10 : i32, message = "bqk,bkd->bqd"}> : () -> ()
    %cst_50 = arith.constant dense<0.000000e+00> : vector<2x8x8xf32>
    %126 = tpu.matmul %125, %113, %cst_50 {dimension_numbers = #tpu.dot_dimension_numbers<[2], [1], [1], [2], [0, 0, 0, 1, 1, 2], [0], [0]>} : vector<2x8x8xf32>, vector<2x8x8xf32>, vector<2x8x8xf32> -> vector<2x8x8xf32>
    "tpu.trace_stop"() : () -> ()
    %127 = vector.shape_cast %126 : vector<2x8x8xf32> to vector<16x8xf32>
    %c0_51 = arith.constant 0 : index
    %c3 = arith.constant 3 : index
    %c0_52 = arith.constant 0 : index
    %c0_53 = arith.constant 0 : index
    %128 = vector.load %arg5[%c0_51, %c3, %c0_52, %c0_53] : memref<2x4x8x32xf32, #tpu.memory_space<vmem>>, vector<1x1x8x32xf32>
    %129 = vector.shape_cast %128 : vector<1x1x8x32xf32> to vector<8x32xf32>
    %cst_54 = arith.constant dense<0.000000e+00> : vector<16x32xf32>
    %130 = tpu.matmul %127, %129, %cst_54 {dimension_numbers = #tpu.dot_dimension_numbers<[1], [0], [0], [1], [0, 0, 1, 1], [], []>} : vector<16x8xf32>, vector<8x32xf32>, vector<16x32xf32> -> vector<16x32xf32>
    %131 = arith.addf %107, %130 : vector<16x32xf32>
    %c0_55 = arith.constant 0 : index
    %c0_56 = arith.constant 0 : index
    %c0_57 = arith.constant 0 : index
    %132 = vector.load %arg6[%c0_55, %c0_56, %c0_57] : memref<2x1x32xf32, #tpu.memory_space<vmem>>, vector<1x1x32xf32>
    %133 = vector.shape_cast %132 : vector<1x1x32xf32> to vector<1x32xf32>
    %134 = vector.broadcast %133 : vector<1x32xf32> to vector<16x32xf32>
    %135 = arith.addf %131, %134 : vector<16x32xf32>
    %136 = arith.addf %135, %0 : vector<16x32xf32>
    %c0_58 = arith.constant 0 : index
    %c0_59 = arith.constant 0 : index
    %c0_60 = arith.constant 0 : index
    %137 = vector.load %arg7[%c0_58, %c0_59, %c0_60] : memref<2x1x32xf32, #tpu.memory_space<vmem>>, vector<1x1x32xf32>
    %138 = vector.shape_cast %137 : vector<1x1x32xf32> to vector<1x32xf32>
    %c0_61 = arith.constant 0 : index
    %c0_62 = arith.constant 0 : index
    %c0_63 = arith.constant 0 : index
    %139 = vector.load %arg8[%c0_61, %c0_62, %c0_63] : memref<2x1x32xf32, #tpu.memory_space<vmem>>, vector<1x1x32xf32>
    %140 = vector.shape_cast %139 : vector<1x1x32xf32> to vector<1x32xf32>
    %cst_64 = arith.constant dense<0.000000e+00> : vector<16xf32>
    %141 = vector.multi_reduction <add>, %136, %cst_64 [1] : vector<16x32xf32> to vector<16xf32>
    %142 = vector.shape_cast %141 : vector<16xf32> to vector<16x1xf32>
    %cst_65 = arith.constant 3.200000e+01 : f32
    %143 = vector.broadcast %cst_65 : f32 to vector<16x1xf32>
    %144 = arith.divf %142, %143 : vector<16x1xf32>
    %145 = vector.broadcast %144 : vector<16x1xf32> to vector<16x32xf32>
    %146 = arith.subf %136, %145 : vector<16x32xf32>
    %147 = arith.mulf %146, %146 : vector<16x32xf32>
    %cst_66 = arith.constant dense<0.000000e+00> : vector<16xf32>
    %148 = vector.multi_reduction <add>, %147, %cst_66 [1] : vector<16x32xf32> to vector<16xf32>
    %149 = vector.shape_cast %148 : vector<16xf32> to vector<16x1xf32>
    %cst_67 = arith.constant 3.200000e+01 : f32
    %150 = vector.broadcast %cst_67 : f32 to vector<16x1xf32>
    %151 = arith.divf %149, %150 : vector<16x1xf32>
    %152 = vector.broadcast %144 : vector<16x1xf32> to vector<16x32xf32>
    %153 = arith.subf %136, %152 : vector<16x32xf32>
    %cst_68 = arith.constant 9.99999997E-7 : f32
    %154 = vector.broadcast %cst_68 : f32 to vector<16x1xf32>
    %155 = arith.addf %151, %154 : vector<16x1xf32>
    %156 = math.rsqrt %155 : vector<16x1xf32>
    %157 = vector.broadcast %156 : vector<16x1xf32> to vector<16x32xf32>
    %158 = arith.mulf %153, %157 : vector<16x32xf32>
    %159 = vector.broadcast %138 : vector<1x32xf32> to vector<16x32xf32>
    %160 = arith.mulf %158, %159 : vector<16x32xf32>
    %161 = vector.broadcast %140 : vector<1x32xf32> to vector<16x32xf32>
    %162 = arith.addf %160, %161 : vector<16x32xf32>
    %c0_69 = arith.constant 0 : index
    %c0_70 = arith.constant 0 : index
    %c0_71 = arith.constant 0 : index
    %163 = vector.load %arg9[%c0_69, %c0_70, %c0_71] : memref<2x32x64xf32, #tpu.memory_space<vmem>>, vector<1x32x64xf32>
    %164 = vector.shape_cast %163 : vector<1x32x64xf32> to vector<32x64xf32>
    %cst_72 = arith.constant dense<0.000000e+00> : vector<16x64xf32>
    %165 = tpu.matmul %162, %164, %cst_72 {dimension_numbers = #tpu.dot_dimension_numbers<[1], [0], [0], [1], [0, 0, 1, 1], [], []>} : vector<16x32xf32>, vector<32x64xf32>, vector<16x64xf32> -> vector<16x64xf32>
    %c0_73 = arith.constant 0 : index
    %c0_74 = arith.constant 0 : index
    %c0_75 = arith.constant 0 : index
    %166 = vector.load %arg10[%c0_73, %c0_74, %c0_75] : memref<2x1x64xf32, #tpu.memory_space<vmem>>, vector<1x1x64xf32>
    %167 = vector.shape_cast %166 : vector<1x1x64xf32> to vector<1x64xf32>
    %168 = vector.broadcast %167 : vector<1x64xf32> to vector<16x64xf32>
    %169 = arith.addf %165, %168 : vector<16x64xf32>
    %cst_76 = arith.constant 5.000000e-01 : f32
    %170 = vector.broadcast %cst_76 : f32 to vector<16x64xf32>
    %171 = arith.mulf %170, %169 : vector<16x64xf32>
    %cst_77 = arith.constant 0.707106769 : f32
    %172 = vector.broadcast %cst_77 : f32 to vector<16x64xf32>
    %173 = arith.mulf %169, %172 : vector<16x64xf32>
    %cst_78 = arith.constant 0.000000e+00 : f32
    %174 = vector.broadcast %cst_78 : f32 to vector<16x64xf32>
    %175 = arith.cmpf oge, %173, %174 : vector<16x64xf32>
    %cst_79 = arith.constant 1.000000e+00 : f32
    %cst_80 = arith.constant -1.000000e+00 : f32
    %176 = vector.broadcast %cst_79 : f32 to vector<16x64xf32>
    %177 = vector.broadcast %cst_80 : f32 to vector<16x64xf32>
    %178 = arith.select %175, %176, %177 : vector<16x64xi1>, vector<16x64xf32>
    %179 = math.absf %173 : vector<16x64xf32>
    %cst_81 = arith.constant 0.327591091 : f32
    %180 = vector.broadcast %cst_81 : f32 to vector<16x64xf32>
    %181 = arith.mulf %180, %179 : vector<16x64xf32>
    %cst_82 = arith.constant 1.000000e+00 : f32
    %182 = vector.broadcast %cst_82 : f32 to vector<16x64xf32>
    %183 = arith.addf %182, %181 : vector<16x64xf32>
    %cst_83 = arith.constant 1.000000e+00 : f32
    %184 = vector.broadcast %cst_83 : f32 to vector<16x64xf32>
    %185 = arith.divf %184, %183 : vector<16x64xf32>
    %cst_84 = arith.constant 1.06140542 : f32
    %186 = vector.broadcast %cst_84 : f32 to vector<16x64xf32>
    %187 = arith.mulf %186, %185 : vector<16x64xf32>
    %cst_85 = arith.constant -1.45315206 : f32
    %188 = vector.broadcast %cst_85 : f32 to vector<16x64xf32>
    %189 = arith.addf %187, %188 : vector<16x64xf32>
    %190 = arith.mulf %189, %185 : vector<16x64xf32>
    %cst_86 = arith.constant 1.42141378 : f32
    %191 = vector.broadcast %cst_86 : f32 to vector<16x64xf32>
    %192 = arith.addf %190, %191 : vector<16x64xf32>
    %193 = arith.mulf %192, %185 : vector<16x64xf32>
    %cst_87 = arith.constant -0.284496725 : f32
    %194 = vector.broadcast %cst_87 : f32 to vector<16x64xf32>
    %195 = arith.addf %193, %194 : vector<16x64xf32>
    %196 = arith.mulf %195, %185 : vector<16x64xf32>
    %cst_88 = arith.constant 0.254829586 : f32
    %197 = vector.broadcast %cst_88 : f32 to vector<16x64xf32>
    %198 = arith.addf %196, %197 : vector<16x64xf32>
    %199 = arith.mulf %198, %185 : vector<16x64xf32>
    %cst_89 = arith.constant 0.000000e+00 : f32
    %200 = vector.broadcast %cst_89 : f32 to vector<16x64xf32>
    %201 = arith.subf %200, %179 : vector<16x64xf32>
    %202 = arith.mulf %201, %179 : vector<16x64xf32>
    %203 = math.exp %202 : vector<16x64xf32>
    %204 = arith.mulf %199, %203 : vector<16x64xf32>
    %cst_90 = arith.constant 1.000000e+00 : f32
    %205 = vector.broadcast %cst_90 : f32 to vector<16x64xf32>
    %206 = arith.subf %205, %204 : vector<16x64xf32>
    %207 = arith.mulf %178, %206 : vector<16x64xf32>
    %cst_91 = arith.constant 1.000000e+00 : f32
    %208 = vector.broadcast %cst_91 : f32 to vector<16x64xf32>
    %209 = arith.addf %208, %207 : vector<16x64xf32>
    %210 = arith.mulf %171, %209 : vector<16x64xf32>
    %c0_92 = arith.constant 0 : index
    %c0_93 = arith.constant 0 : index
    %c0_94 = arith.constant 0 : index
    %211 = vector.load %arg11[%c0_92, %c0_93, %c0_94] : memref<2x64x32xf32, #tpu.memory_space<vmem>>, vector<1x64x32xf32>
    %212 = vector.shape_cast %211 : vector<1x64x32xf32> to vector<64x32xf32>
    %cst_95 = arith.constant dense<0.000000e+00> : vector<16x32xf32>
    %213 = tpu.matmul %210, %212, %cst_95 {dimension_numbers = #tpu.dot_dimension_numbers<[1], [0], [0], [1], [0, 0, 1, 1], [], []>} : vector<16x64xf32>, vector<64x32xf32>, vector<16x32xf32> -> vector<16x32xf32>
    %c0_96 = arith.constant 0 : index
    %c0_97 = arith.constant 0 : index
    %c0_98 = arith.constant 0 : index
    %214 = vector.load %arg12[%c0_96, %c0_97, %c0_98] : memref<2x1x32xf32, #tpu.memory_space<vmem>>, vector<1x1x32xf32>
    %215 = vector.shape_cast %214 : vector<1x1x32xf32> to vector<1x32xf32>
    %216 = vector.broadcast %215 : vector<1x32xf32> to vector<16x32xf32>
    %217 = arith.addf %213, %216 : vector<16x32xf32>
    %218 = arith.addf %217, %136 : vector<16x32xf32>
    %c1_99 = arith.constant 1 : index
    %c0_100 = arith.constant 0 : index
    %c0_101 = arith.constant 0 : index
    %219 = vector.load %arg1[%c1_99, %c0_100, %c0_101] : memref<2x1x32xf32, #tpu.memory_space<vmem>>, vector<1x1x32xf32>
    %220 = vector.shape_cast %219 : vector<1x1x32xf32> to vector<1x32xf32>
    %c1_102 = arith.constant 1 : index
    %c0_103 = arith.constant 0 : index
    %c0_104 = arith.constant 0 : index
    %221 = vector.load %arg2[%c1_102, %c0_103, %c0_104] : memref<2x1x32xf32, #tpu.memory_space<vmem>>, vector<1x1x32xf32>
    %222 = vector.shape_cast %221 : vector<1x1x32xf32> to vector<1x32xf32>
    %cst_105 = arith.constant dense<0.000000e+00> : vector<16xf32>
    %223 = vector.multi_reduction <add>, %218, %cst_105 [1] : vector<16x32xf32> to vector<16xf32>
    %224 = vector.shape_cast %223 : vector<16xf32> to vector<16x1xf32>
    %cst_106 = arith.constant 3.200000e+01 : f32
    %225 = vector.broadcast %cst_106 : f32 to vector<16x1xf32>
    %226 = arith.divf %224, %225 : vector<16x1xf32>
    %227 = vector.broadcast %226 : vector<16x1xf32> to vector<16x32xf32>
    %228 = arith.subf %218, %227 : vector<16x32xf32>
    %229 = arith.mulf %228, %228 : vector<16x32xf32>
    %cst_107 = arith.constant dense<0.000000e+00> : vector<16xf32>
    %230 = vector.multi_reduction <add>, %229, %cst_107 [1] : vector<16x32xf32> to vector<16xf32>
    %231 = vector.shape_cast %230 : vector<16xf32> to vector<16x1xf32>
    %cst_108 = arith.constant 3.200000e+01 : f32
    %232 = vector.broadcast %cst_108 : f32 to vector<16x1xf32>
    %233 = arith.divf %231, %232 : vector<16x1xf32>
    %234 = vector.broadcast %226 : vector<16x1xf32> to vector<16x32xf32>
    %235 = arith.subf %218, %234 : vector<16x32xf32>
    %cst_109 = arith.constant 9.99999997E-7 : f32
    %236 = vector.broadcast %cst_109 : f32 to vector<16x1xf32>
    %237 = arith.addf %233, %236 : vector<16x1xf32>
    %238 = math.rsqrt %237 : vector<16x1xf32>
    %239 = vector.broadcast %238 : vector<16x1xf32> to vector<16x32xf32>
    %240 = arith.mulf %235, %239 : vector<16x32xf32>
    %241 = vector.broadcast %220 : vector<1x32xf32> to vector<16x32xf32>
    %242 = arith.mulf %240, %241 : vector<16x32xf32>
    %243 = vector.broadcast %222 : vector<1x32xf32> to vector<16x32xf32>
    %244 = arith.addf %242, %243 : vector<16x32xf32>
    %c1_110 = arith.constant 1 : index
    %c0_111 = arith.constant 0 : index
    %c0_112 = arith.constant 0 : index
    %245 = vector.load %arg3[%c1_110, %c0_111, %c0_112] : memref<2x32x96xf32, #tpu.memory_space<vmem>>, vector<1x32x96xf32>
    %246 = vector.shape_cast %245 : vector<1x32x96xf32> to vector<32x96xf32>
    %cst_113 = arith.constant dense<0.000000e+00> : vector<16x96xf32>
    %247 = tpu.matmul %244, %246, %cst_113 {dimension_numbers = #tpu.dot_dimension_numbers<[1], [0], [0], [1], [0, 0, 1, 1], [], []>} : vector<16x32xf32>, vector<32x96xf32>, vector<16x96xf32> -> vector<16x96xf32>
    %c1_114 = arith.constant 1 : index
    %c0_115 = arith.constant 0 : index
    %c0_116 = arith.constant 0 : index
    %248 = vector.load %arg4[%c1_114, %c0_115, %c0_116] : memref<2x1x96xf32, #tpu.memory_space<vmem>>, vector<1x1x96xf32>
    %249 = vector.shape_cast %248 : vector<1x1x96xf32> to vector<1x96xf32>
    %250 = vector.broadcast %249 : vector<1x96xf32> to vector<16x96xf32>
    %251 = arith.addf %247, %250 : vector<16x96xf32>
    %252 = vector.extract_strided_slice %251 {offsets = [0, 0], sizes = [16, 32], strides = [1, 1]} : vector<16x96xf32> to vector<16x32xf32>
    %253 = vector.extract_strided_slice %251 {offsets = [0, 32], sizes = [16, 32], strides = [1, 1]} : vector<16x96xf32> to vector<16x32xf32>
    %254 = vector.extract_strided_slice %251 {offsets = [0, 64], sizes = [16, 32], strides = [1, 1]} : vector<16x96xf32> to vector<16x32xf32>
    %255 = vector.extract_strided_slice %252 {offsets = [0, 0], sizes = [16, 8], strides = [1, 1]} : vector<16x32xf32> to vector<16x8xf32>
    %256 = vector.shape_cast %255 : vector<16x8xf32> to vector<2x8x8xf32>
    %257 = vector.extract_strided_slice %253 {offsets = [0, 0], sizes = [16, 8], strides = [1, 1]} : vector<16x32xf32> to vector<16x8xf32>
    %258 = vector.shape_cast %257 : vector<16x8xf32> to vector<2x8x8xf32>
    %259 = vector.extract_strided_slice %254 {offsets = [0, 0], sizes = [16, 8], strides = [1, 1]} : vector<16x32xf32> to vector<16x8xf32>
    %260 = vector.shape_cast %259 : vector<16x8xf32> to vector<2x8x8xf32>
    "tpu.trace_start"() <{level = 10 : i32, message = "bqd,bkd->bqk"}> : () -> ()
    %cst_117 = arith.constant dense<0.000000e+00> : vector<2x8x8xf32>
    %261 = tpu.matmul %256, %258, %cst_117 {dimension_numbers = #tpu.dot_dimension_numbers<[2], [2], [1], [1], [0, 0, 0, 1, 1, 1], [0], [0]>} : vector<2x8x8xf32>, vector<2x8x8xf32>, vector<2x8x8xf32> -> vector<2x8x8xf32>
    "tpu.trace_stop"() : () -> ()
    %cst_118 = arith.constant 0.353553385 : f32
    %262 = vector.broadcast %cst_118 : f32 to vector<2x8x8xf32>
    %263 = arith.mulf %261, %262 : vector<2x8x8xf32>
    %cst_119 = arith.constant dense<0xFF800000> : vector<2x8xf32>
    %264 = vector.multi_reduction <maximumf>, %263, %cst_119 [2] : vector<2x8x8xf32> to vector<2x8xf32>
    %265 = vector.shape_cast %264 : vector<2x8xf32> to vector<2x8x1xf32>
    %266 = vector.broadcast %265 : vector<2x8x1xf32> to vector<2x8x8xf32>
    %267 = arith.subf %263, %266 : vector<2x8x8xf32>
    %268 = math.exp %267 : vector<2x8x8xf32>
    %cst_120 = arith.constant dense<0.000000e+00> : vector<2x8xf32>
    %269 = vector.multi_reduction <add>, %268, %cst_120 [2] : vector<2x8x8xf32> to vector<2x8xf32>
    %270 = vector.shape_cast %269 : vector<2x8xf32> to vector<2x8x1xf32>
    %271 = vector.broadcast %270 : vector<2x8x1xf32> to vector<2x8x8xf32>
    %272 = arith.divf %268, %271 : vector<2x8x8xf32>
    "tpu.trace_start"() <{level = 10 : i32, message = "bqk,bkd->bqd"}> : () -> ()
    %cst_121 = arith.constant dense<0.000000e+00> : vector<2x8x8xf32>
    %273 = tpu.matmul %272, %260, %cst_121 {dimension_numbers = #tpu.dot_dimension_numbers<[2], [1], [1], [2], [0, 0, 0, 1, 1, 2], [0], [0]>} : vector<2x8x8xf32>, vector<2x8x8xf32>, vector<2x8x8xf32> -> vector<2x8x8xf32>
    "tpu.trace_stop"() : () -> ()
    %274 = vector.shape_cast %273 : vector<2x8x8xf32> to vector<16x8xf32>
    %c1_122 = arith.constant 1 : index
    %c0_123 = arith.constant 0 : index
    %c0_124 = arith.constant 0 : index
    %c0_125 = arith.constant 0 : index
    %275 = vector.load %arg5[%c1_122, %c0_123, %c0_124, %c0_125] : memref<2x4x8x32xf32, #tpu.memory_space<vmem>>, vector<1x1x8x32xf32>
    %276 = vector.shape_cast %275 : vector<1x1x8x32xf32> to vector<8x32xf32>
    %cst_126 = arith.constant dense<0.000000e+00> : vector<16x32xf32>
    %277 = tpu.matmul %274, %276, %cst_126 {dimension_numbers = #tpu.dot_dimension_numbers<[1], [0], [0], [1], [0, 0, 1, 1], [], []>} : vector<16x8xf32>, vector<8x32xf32>, vector<16x32xf32> -> vector<16x32xf32>
    %278 = vector.extract_strided_slice %252 {offsets = [0, 8], sizes = [16, 8], strides = [1, 1]} : vector<16x32xf32> to vector<16x8xf32>
    %279 = vector.shape_cast %278 : vector<16x8xf32> to vector<2x8x8xf32>
    %280 = vector.extract_strided_slice %253 {offsets = [0, 8], sizes = [16, 8], strides = [1, 1]} : vector<16x32xf32> to vector<16x8xf32>
    %281 = vector.shape_cast %280 : vector<16x8xf32> to vector<2x8x8xf32>
    %282 = vector.extract_strided_slice %254 {offsets = [0, 8], sizes = [16, 8], strides = [1, 1]} : vector<16x32xf32> to vector<16x8xf32>
    %283 = vector.shape_cast %282 : vector<16x8xf32> to vector<2x8x8xf32>
    "tpu.trace_start"() <{level = 10 : i32, message = "bqd,bkd->bqk"}> : () -> ()
    %cst_127 = arith.constant dense<0.000000e+00> : vector<2x8x8xf32>
    %284 = tpu.matmul %279, %281, %cst_127 {dimension_numbers = #tpu.dot_dimension_numbers<[2], [2], [1], [1], [0, 0, 0, 1, 1, 1], [0], [0]>} : vector<2x8x8xf32>, vector<2x8x8xf32>, vector<2x8x8xf32> -> vector<2x8x8xf32>
    "tpu.trace_stop"() : () -> ()
    %cst_128 = arith.constant 0.353553385 : f32
    %285 = vector.broadcast %cst_128 : f32 to vector<2x8x8xf32>
    %286 = arith.mulf %284, %285 : vector<2x8x8xf32>
    %cst_129 = arith.constant dense<0xFF800000> : vector<2x8xf32>
    %287 = vector.multi_reduction <maximumf>, %286, %cst_129 [2] : vector<2x8x8xf32> to vector<2x8xf32>
    %288 = vector.shape_cast %287 : vector<2x8xf32> to vector<2x8x1xf32>
    %289 = vector.broadcast %288 : vector<2x8x1xf32> to vector<2x8x8xf32>
    %290 = arith.subf %286, %289 : vector<2x8x8xf32>
    %291 = math.exp %290 : vector<2x8x8xf32>
    %cst_130 = arith.constant dense<0.000000e+00> : vector<2x8xf32>
    %292 = vector.multi_reduction <add>, %291, %cst_130 [2] : vector<2x8x8xf32> to vector<2x8xf32>
    %293 = vector.shape_cast %292 : vector<2x8xf32> to vector<2x8x1xf32>
    %294 = vector.broadcast %293 : vector<2x8x1xf32> to vector<2x8x8xf32>
    %295 = arith.divf %291, %294 : vector<2x8x8xf32>
    "tpu.trace_start"() <{level = 10 : i32, message = "bqk,bkd->bqd"}> : () -> ()
    %cst_131 = arith.constant dense<0.000000e+00> : vector<2x8x8xf32>
    %296 = tpu.matmul %295, %283, %cst_131 {dimension_numbers = #tpu.dot_dimension_numbers<[2], [1], [1], [2], [0, 0, 0, 1, 1, 2], [0], [0]>} : vector<2x8x8xf32>, vector<2x8x8xf32>, vector<2x8x8xf32> -> vector<2x8x8xf32>
    "tpu.trace_stop"() : () -> ()
    %297 = vector.shape_cast %296 : vector<2x8x8xf32> to vector<16x8xf32>
    %c1_132 = arith.constant 1 : index
    %c1_133 = arith.constant 1 : index
    %c0_134 = arith.constant 0 : index
    %c0_135 = arith.constant 0 : index
    %298 = vector.load %arg5[%c1_132, %c1_133, %c0_134, %c0_135] : memref<2x4x8x32xf32, #tpu.memory_space<vmem>>, vector<1x1x8x32xf32>
    %299 = vector.shape_cast %298 : vector<1x1x8x32xf32> to vector<8x32xf32>
    %cst_136 = arith.constant dense<0.000000e+00> : vector<16x32xf32>
    %300 = tpu.matmul %297, %299, %cst_136 {dimension_numbers = #tpu.dot_dimension_numbers<[1], [0], [0], [1], [0, 0, 1, 1], [], []>} : vector<16x8xf32>, vector<8x32xf32>, vector<16x32xf32> -> vector<16x32xf32>
    %301 = arith.addf %277, %300 : vector<16x32xf32>
    %302 = vector.extract_strided_slice %252 {offsets = [0, 16], sizes = [16, 8], strides = [1, 1]} : vector<16x32xf32> to vector<16x8xf32>
    %303 = vector.shape_cast %302 : vector<16x8xf32> to vector<2x8x8xf32>
    %304 = vector.extract_strided_slice %253 {offsets = [0, 16], sizes = [16, 8], strides = [1, 1]} : vector<16x32xf32> to vector<16x8xf32>
    %305 = vector.shape_cast %304 : vector<16x8xf32> to vector<2x8x8xf32>
    %306 = vector.extract_strided_slice %254 {offsets = [0, 16], sizes = [16, 8], strides = [1, 1]} : vector<16x32xf32> to vector<16x8xf32>
    %307 = vector.shape_cast %306 : vector<16x8xf32> to vector<2x8x8xf32>
    "tpu.trace_start"() <{level = 10 : i32, message = "bqd,bkd->bqk"}> : () -> ()
    %cst_137 = arith.constant dense<0.000000e+00> : vector<2x8x8xf32>
    %308 = tpu.matmul %303, %305, %cst_137 {dimension_numbers = #tpu.dot_dimension_numbers<[2], [2], [1], [1], [0, 0, 0, 1, 1, 1], [0], [0]>} : vector<2x8x8xf32>, vector<2x8x8xf32>, vector<2x8x8xf32> -> vector<2x8x8xf32>
    "tpu.trace_stop"() : () -> ()
    %cst_138 = arith.constant 0.353553385 : f32
    %309 = vector.broadcast %cst_138 : f32 to vector<2x8x8xf32>
    %310 = arith.mulf %308, %309 : vector<2x8x8xf32>
    %cst_139 = arith.constant dense<0xFF800000> : vector<2x8xf32>
    %311 = vector.multi_reduction <maximumf>, %310, %cst_139 [2] : vector<2x8x8xf32> to vector<2x8xf32>
    %312 = vector.shape_cast %311 : vector<2x8xf32> to vector<2x8x1xf32>
    %313 = vector.broadcast %312 : vector<2x8x1xf32> to vector<2x8x8xf32>
    %314 = arith.subf %310, %313 : vector<2x8x8xf32>
    %315 = math.exp %314 : vector<2x8x8xf32>
    %cst_140 = arith.constant dense<0.000000e+00> : vector<2x8xf32>
    %316 = vector.multi_reduction <add>, %315, %cst_140 [2] : vector<2x8x8xf32> to vector<2x8xf32>
    %317 = vector.shape_cast %316 : vector<2x8xf32> to vector<2x8x1xf32>
    %318 = vector.broadcast %317 : vector<2x8x1xf32> to vector<2x8x8xf32>
    %319 = arith.divf %315, %318 : vector<2x8x8xf32>
    "tpu.trace_start"() <{level = 10 : i32, message = "bqk,bkd->bqd"}> : () -> ()
    %cst_141 = arith.constant dense<0.000000e+00> : vector<2x8x8xf32>
    %320 = tpu.matmul %319, %307, %cst_141 {dimension_numbers = #tpu.dot_dimension_numbers<[2], [1], [1], [2], [0, 0, 0, 1, 1, 2], [0], [0]>} : vector<2x8x8xf32>, vector<2x8x8xf32>, vector<2x8x8xf32> -> vector<2x8x8xf32>
    "tpu.trace_stop"() : () -> ()
    %321 = vector.shape_cast %320 : vector<2x8x8xf32> to vector<16x8xf32>
    %c1_142 = arith.constant 1 : index
    %c2_143 = arith.constant 2 : index
    %c0_144 = arith.constant 0 : index
    %c0_145 = arith.constant 0 : index
    %322 = vector.load %arg5[%c1_142, %c2_143, %c0_144, %c0_145] : memref<2x4x8x32xf32, #tpu.memory_space<vmem>>, vector<1x1x8x32xf32>
    %323 = vector.shape_cast %322 : vector<1x1x8x32xf32> to vector<8x32xf32>
    %cst_146 = arith.constant dense<0.000000e+00> : vector<16x32xf32>
    %324 = tpu.matmul %321, %323, %cst_146 {dimension_numbers = #tpu.dot_dimension_numbers<[1], [0], [0], [1], [0, 0, 1, 1], [], []>} : vector<16x8xf32>, vector<8x32xf32>, vector<16x32xf32> -> vector<16x32xf32>
    %325 = arith.addf %301, %324 : vector<16x32xf32>
    %326 = vector.extract_strided_slice %252 {offsets = [0, 24], sizes = [16, 8], strides = [1, 1]} : vector<16x32xf32> to vector<16x8xf32>
    %327 = vector.shape_cast %326 : vector<16x8xf32> to vector<2x8x8xf32>
    %328 = vector.extract_strided_slice %253 {offsets = [0, 24], sizes = [16, 8], strides = [1, 1]} : vector<16x32xf32> to vector<16x8xf32>
    %329 = vector.shape_cast %328 : vector<16x8xf32> to vector<2x8x8xf32>
    %330 = vector.extract_strided_slice %254 {offsets = [0, 24], sizes = [16, 8], strides = [1, 1]} : vector<16x32xf32> to vector<16x8xf32>
    %331 = vector.shape_cast %330 : vector<16x8xf32> to vector<2x8x8xf32>
    "tpu.trace_start"() <{level = 10 : i32, message = "bqd,bkd->bqk"}> : () -> ()
    %cst_147 = arith.constant dense<0.000000e+00> : vector<2x8x8xf32>
    %332 = tpu.matmul %327, %329, %cst_147 {dimension_numbers = #tpu.dot_dimension_numbers<[2], [2], [1], [1], [0, 0, 0, 1, 1, 1], [0], [0]>} : vector<2x8x8xf32>, vector<2x8x8xf32>, vector<2x8x8xf32> -> vector<2x8x8xf32>
    "tpu.trace_stop"() : () -> ()
    %cst_148 = arith.constant 0.353553385 : f32
    %333 = vector.broadcast %cst_148 : f32 to vector<2x8x8xf32>
    %334 = arith.mulf %332, %333 : vector<2x8x8xf32>
    %cst_149 = arith.constant dense<0xFF800000> : vector<2x8xf32>
    %335 = vector.multi_reduction <maximumf>, %334, %cst_149 [2] : vector<2x8x8xf32> to vector<2x8xf32>
    %336 = vector.shape_cast %335 : vector<2x8xf32> to vector<2x8x1xf32>
    %337 = vector.broadcast %336 : vector<2x8x1xf32> to vector<2x8x8xf32>
    %338 = arith.subf %334, %337 : vector<2x8x8xf32>
    %339 = math.exp %338 : vector<2x8x8xf32>
    %cst_150 = arith.constant dense<0.000000e+00> : vector<2x8xf32>
    %340 = vector.multi_reduction <add>, %339, %cst_150 [2] : vector<2x8x8xf32> to vector<2x8xf32>
    %341 = vector.shape_cast %340 : vector<2x8xf32> to vector<2x8x1xf32>
    %342 = vector.broadcast %341 : vector<2x8x1xf32> to vector<2x8x8xf32>
    %343 = arith.divf %339, %342 : vector<2x8x8xf32>
    "tpu.trace_start"() <{level = 10 : i32, message = "bqk,bkd->bqd"}> : () -> ()
    %cst_151 = arith.constant dense<0.000000e+00> : vector<2x8x8xf32>
    %344 = tpu.matmul %343, %331, %cst_151 {dimension_numbers = #tpu.dot_dimension_numbers<[2], [1], [1], [2], [0, 0, 0, 1, 1, 2], [0], [0]>} : vector<2x8x8xf32>, vector<2x8x8xf32>, vector<2x8x8xf32> -> vector<2x8x8xf32>
    "tpu.trace_stop"() : () -> ()
    %345 = vector.shape_cast %344 : vector<2x8x8xf32> to vector<16x8xf32>
    %c1_152 = arith.constant 1 : index
    %c3_153 = arith.constant 3 : index
    %c0_154 = arith.constant 0 : index
    %c0_155 = arith.constant 0 : index
    %346 = vector.load %arg5[%c1_152, %c3_153, %c0_154, %c0_155] : memref<2x4x8x32xf32, #tpu.memory_space<vmem>>, vector<1x1x8x32xf32>
    %347 = vector.shape_cast %346 : vector<1x1x8x32xf32> to vector<8x32xf32>
    %cst_156 = arith.constant dense<0.000000e+00> : vector<16x32xf32>
    %348 = tpu.matmul %345, %347, %cst_156 {dimension_numbers = #tpu.dot_dimension_numbers<[1], [0], [0], [1], [0, 0, 1, 1], [], []>} : vector<16x8xf32>, vector<8x32xf32>, vector<16x32xf32> -> vector<16x32xf32>
    %349 = arith.addf %325, %348 : vector<16x32xf32>
    %c1_157 = arith.constant 1 : index
    %c0_158 = arith.constant 0 : index
    %c0_159 = arith.constant 0 : index
    %350 = vector.load %arg6[%c1_157, %c0_158, %c0_159] : memref<2x1x32xf32, #tpu.memory_space<vmem>>, vector<1x1x32xf32>
    %351 = vector.shape_cast %350 : vector<1x1x32xf32> to vector<1x32xf32>
    %352 = vector.broadcast %351 : vector<1x32xf32> to vector<16x32xf32>
    %353 = arith.addf %349, %352 : vector<16x32xf32>
    %354 = arith.addf %353, %218 : vector<16x32xf32>
    %c1_160 = arith.constant 1 : index
    %c0_161 = arith.constant 0 : index
    %c0_162 = arith.constant 0 : index
    %355 = vector.load %arg7[%c1_160, %c0_161, %c0_162] : memref<2x1x32xf32, #tpu.memory_space<vmem>>, vector<1x1x32xf32>
    %356 = vector.shape_cast %355 : vector<1x1x32xf32> to vector<1x32xf32>
    %c1_163 = arith.constant 1 : index
    %c0_164 = arith.constant 0 : index
    %c0_165 = arith.constant 0 : index
    %357 = vector.load %arg8[%c1_163, %c0_164, %c0_165] : memref<2x1x32xf32, #tpu.memory_space<vmem>>, vector<1x1x32xf32>
    %358 = vector.shape_cast %357 : vector<1x1x32xf32> to vector<1x32xf32>
    %cst_166 = arith.constant dense<0.000000e+00> : vector<16xf32>
    %359 = vector.multi_reduction <add>, %354, %cst_166 [1] : vector<16x32xf32> to vector<16xf32>
    %360 = vector.shape_cast %359 : vector<16xf32> to vector<16x1xf32>
    %cst_167 = arith.constant 3.200000e+01 : f32
    %361 = vector.broadcast %cst_167 : f32 to vector<16x1xf32>
    %362 = arith.divf %360, %361 : vector<16x1xf32>
    %363 = vector.broadcast %362 : vector<16x1xf32> to vector<16x32xf32>
    %364 = arith.subf %354, %363 : vector<16x32xf32>
    %365 = arith.mulf %364, %364 : vector<16x32xf32>
    %cst_168 = arith.constant dense<0.000000e+00> : vector<16xf32>
    %366 = vector.multi_reduction <add>, %365, %cst_168 [1] : vector<16x32xf32> to vector<16xf32>
    %367 = vector.shape_cast %366 : vector<16xf32> to vector<16x1xf32>
    %cst_169 = arith.constant 3.200000e+01 : f32
    %368 = vector.broadcast %cst_169 : f32 to vector<16x1xf32>
    %369 = arith.divf %367, %368 : vector<16x1xf32>
    %370 = vector.broadcast %362 : vector<16x1xf32> to vector<16x32xf32>
    %371 = arith.subf %354, %370 : vector<16x32xf32>
    %cst_170 = arith.constant 9.99999997E-7 : f32
    %372 = vector.broadcast %cst_170 : f32 to vector<16x1xf32>
    %373 = arith.addf %369, %372 : vector<16x1xf32>
    %374 = math.rsqrt %373 : vector<16x1xf32>
    %375 = vector.broadcast %374 : vector<16x1xf32> to vector<16x32xf32>
    %376 = arith.mulf %371, %375 : vector<16x32xf32>
    %377 = vector.broadcast %356 : vector<1x32xf32> to vector<16x32xf32>
    %378 = arith.mulf %376, %377 : vector<16x32xf32>
    %379 = vector.broadcast %358 : vector<1x32xf32> to vector<16x32xf32>
    %380 = arith.addf %378, %379 : vector<16x32xf32>
    %c1_171 = arith.constant 1 : index
    %c0_172 = arith.constant 0 : index
    %c0_173 = arith.constant 0 : index
    %381 = vector.load %arg9[%c1_171, %c0_172, %c0_173] : memref<2x32x64xf32, #tpu.memory_space<vmem>>, vector<1x32x64xf32>
    %382 = vector.shape_cast %381 : vector<1x32x64xf32> to vector<32x64xf32>
    %cst_174 = arith.constant dense<0.000000e+00> : vector<16x64xf32>
    %383 = tpu.matmul %380, %382, %cst_174 {dimension_numbers = #tpu.dot_dimension_numbers<[1], [0], [0], [1], [0, 0, 1, 1], [], []>} : vector<16x32xf32>, vector<32x64xf32>, vector<16x64xf32> -> vector<16x64xf32>
    %c1_175 = arith.constant 1 : index
    %c0_176 = arith.constant 0 : index
    %c0_177 = arith.constant 0 : index
    %384 = vector.load %arg10[%c1_175, %c0_176, %c0_177] : memref<2x1x64xf32, #tpu.memory_space<vmem>>, vector<1x1x64xf32>
    %385 = vector.shape_cast %384 : vector<1x1x64xf32> to vector<1x64xf32>
    %386 = vector.broadcast %385 : vector<1x64xf32> to vector<16x64xf32>
    %387 = arith.addf %383, %386 : vector<16x64xf32>
    %cst_178 = arith.constant 5.000000e-01 : f32
    %388 = vector.broadcast %cst_178 : f32 to vector<16x64xf32>
    %389 = arith.mulf %388, %387 : vector<16x64xf32>
    %cst_179 = arith.constant 0.707106769 : f32
    %390 = vector.broadcast %cst_179 : f32 to vector<16x64xf32>
    %391 = arith.mulf %387, %390 : vector<16x64xf32>
    %cst_180 = arith.constant 0.000000e+00 : f32
    %392 = vector.broadcast %cst_180 : f32 to vector<16x64xf32>
    %393 = arith.cmpf oge, %391, %392 : vector<16x64xf32>
    %cst_181 = arith.constant 1.000000e+00 : f32
    %cst_182 = arith.constant -1.000000e+00 : f32
    %394 = vector.broadcast %cst_181 : f32 to vector<16x64xf32>
    %395 = vector.broadcast %cst_182 : f32 to vector<16x64xf32>
    %396 = arith.select %393, %394, %395 : vector<16x64xi1>, vector<16x64xf32>
    %397 = math.absf %391 : vector<16x64xf32>
    %cst_183 = arith.constant 0.327591091 : f32
    %398 = vector.broadcast %cst_183 : f32 to vector<16x64xf32>
    %399 = arith.mulf %398, %397 : vector<16x64xf32>
    %cst_184 = arith.constant 1.000000e+00 : f32
    %400 = vector.broadcast %cst_184 : f32 to vector<16x64xf32>
    %401 = arith.addf %400, %399 : vector<16x64xf32>
    %cst_185 = arith.constant 1.000000e+00 : f32
    %402 = vector.broadcast %cst_185 : f32 to vector<16x64xf32>
    %403 = arith.divf %402, %401 : vector<16x64xf32>
    %cst_186 = arith.constant 1.06140542 : f32
    %404 = vector.broadcast %cst_186 : f32 to vector<16x64xf32>
    %405 = arith.mulf %404, %403 : vector<16x64xf32>
    %cst_187 = arith.constant -1.45315206 : f32
    %406 = vector.broadcast %cst_187 : f32 to vector<16x64xf32>
    %407 = arith.addf %405, %406 : vector<16x64xf32>
    %408 = arith.mulf %407, %403 : vector<16x64xf32>
    %cst_188 = arith.constant 1.42141378 : f32
    %409 = vector.broadcast %cst_188 : f32 to vector<16x64xf32>
    %410 = arith.addf %408, %409 : vector<16x64xf32>
    %411 = arith.mulf %410, %403 : vector<16x64xf32>
    %cst_189 = arith.constant -0.284496725 : f32
    %412 = vector.broadcast %cst_189 : f32 to vector<16x64xf32>
    %413 = arith.addf %411, %412 : vector<16x64xf32>
    %414 = arith.mulf %413, %403 : vector<16x64xf32>
    %cst_190 = arith.constant 0.254829586 : f32
    %415 = vector.broadcast %cst_190 : f32 to vector<16x64xf32>
    %416 = arith.addf %414, %415 : vector<16x64xf32>
    %417 = arith.mulf %416, %403 : vector<16x64xf32>
    %cst_191 = arith.constant 0.000000e+00 : f32
    %418 = vector.broadcast %cst_191 : f32 to vector<16x64xf32>
    %419 = arith.subf %418, %397 : vector<16x64xf32>
    %420 = arith.mulf %419, %397 : vector<16x64xf32>
    %421 = math.exp %420 : vector<16x64xf32>
    %422 = arith.mulf %417, %421 : vector<16x64xf32>
    %cst_192 = arith.constant 1.000000e+00 : f32
    %423 = vector.broadcast %cst_192 : f32 to vector<16x64xf32>
    %424 = arith.subf %423, %422 : vector<16x64xf32>
    %425 = arith.mulf %396, %424 : vector<16x64xf32>
    %cst_193 = arith.constant 1.000000e+00 : f32
    %426 = vector.broadcast %cst_193 : f32 to vector<16x64xf32>
    %427 = arith.addf %426, %425 : vector<16x64xf32>
    %428 = arith.mulf %389, %427 : vector<16x64xf32>
    %c1_194 = arith.constant 1 : index
    %c0_195 = arith.constant 0 : index
    %c0_196 = arith.constant 0 : index
    %429 = vector.load %arg11[%c1_194, %c0_195, %c0_196] : memref<2x64x32xf32, #tpu.memory_space<vmem>>, vector<1x64x32xf32>
    %430 = vector.shape_cast %429 : vector<1x64x32xf32> to vector<64x32xf32>
    %cst_197 = arith.constant dense<0.000000e+00> : vector<16x32xf32>
    %431 = tpu.matmul %428, %430, %cst_197 {dimension_numbers = #tpu.dot_dimension_numbers<[1], [0], [0], [1], [0, 0, 1, 1], [], []>} : vector<16x64xf32>, vector<64x32xf32>, vector<16x32xf32> -> vector<16x32xf32>
    %c1_198 = arith.constant 1 : index
    %c0_199 = arith.constant 0 : index
    %c0_200 = arith.constant 0 : index
    %432 = vector.load %arg12[%c1_198, %c0_199, %c0_200] : memref<2x1x32xf32, #tpu.memory_space<vmem>>, vector<1x1x32xf32>
    %433 = vector.shape_cast %432 : vector<1x1x32xf32> to vector<1x32xf32>
    %434 = vector.broadcast %433 : vector<1x32xf32> to vector<16x32xf32>
    %435 = arith.addf %431, %434 : vector<16x32xf32>
    %436 = arith.addf %435, %354 : vector<16x32xf32>
    %c0_201 = arith.constant 0 : index
    %c0_202 = arith.constant 0 : index
    %437 = vector.load %arg13[%c0_201, %c0_202] : memref<1x32xf32, #tpu.memory_space<vmem>>, vector<1x32xf32>
    %c0_203 = arith.constant 0 : index
    %c0_204 = arith.constant 0 : index
    %438 = vector.load %arg14[%c0_203, %c0_204] : memref<1x32xf32, #tpu.memory_space<vmem>>, vector<1x32xf32>
    %cst_205 = arith.constant dense<0.000000e+00> : vector<16xf32>
    %439 = vector.multi_reduction <add>, %436, %cst_205 [1] : vector<16x32xf32> to vector<16xf32>
    %440 = vector.shape_cast %439 : vector<16xf32> to vector<16x1xf32>
    %cst_206 = arith.constant 3.200000e+01 : f32
    %441 = vector.broadcast %cst_206 : f32 to vector<16x1xf32>
    %442 = arith.divf %440, %441 : vector<16x1xf32>
    %443 = vector.broadcast %442 : vector<16x1xf32> to vector<16x32xf32>
    %444 = arith.subf %436, %443 : vector<16x32xf32>
    %445 = arith.mulf %444, %444 : vector<16x32xf32>
    %cst_207 = arith.constant dense<0.000000e+00> : vector<16xf32>
    %446 = vector.multi_reduction <add>, %445, %cst_207 [1] : vector<16x32xf32> to vector<16xf32>
    %447 = vector.shape_cast %446 : vector<16xf32> to vector<16x1xf32>
    %cst_208 = arith.constant 3.200000e+01 : f32
    %448 = vector.broadcast %cst_208 : f32 to vector<16x1xf32>
    %449 = arith.divf %447, %448 : vector<16x1xf32>
    %450 = vector.broadcast %442 : vector<16x1xf32> to vector<16x32xf32>
    %451 = arith.subf %436, %450 : vector<16x32xf32>
    %cst_209 = arith.constant 9.99999997E-7 : f32
    %452 = vector.broadcast %cst_209 : f32 to vector<16x1xf32>
    %453 = arith.addf %449, %452 : vector<16x1xf32>
    %454 = math.rsqrt %453 : vector<16x1xf32>
    %455 = vector.broadcast %454 : vector<16x1xf32> to vector<16x32xf32>
    %456 = arith.mulf %451, %455 : vector<16x32xf32>
    %457 = vector.broadcast %437 : vector<1x32xf32> to vector<16x32xf32>
    %458 = arith.mulf %456, %457 : vector<16x32xf32>
    %459 = vector.broadcast %438 : vector<1x32xf32> to vector<16x32xf32>
    %460 = arith.addf %458, %459 : vector<16x32xf32>
    %c0_210 = arith.constant 0 : index
    %c0_211 = arith.constant 0 : index
    %461 = vector.load %arg15[%c0_210, %c0_211] : memref<16x32xf32, #tpu.memory_space<vmem>>, vector<16x32xf32>
    tpu.vector_store %arg15[%c0_210, %c0_211], %460 {strides = array<i32>} : memref<16x32xf32, #tpu.memory_space<vmem>>, vector<16x32xf32>,
    return
  }
}

</mosaic_0001>

<bundles_post_ra>
// kernel: tpu_custom_call.1
= control target key start
LH: loop header
LB: loop body
LE: loop exit
PB: predicated region body
PF: predicated region fallthrough
CT: control target
= control target key end

     0   :  { %20 = vsyncpa [#allocation3], 0  ;;  %s3423_s0 = inlined_call_operand.hbm [shape: f32[16,32], index: 0, kind: input, shape index: {}]   ;;  %s3424_s1 = inlined_call_operand.hbm [shape: f32[2,1,32], index: 1, kind: input, shape index: {}]   ;;  %s3425_s2 = inlined_call_operand.hbm [shape: f32[2,1,32], index: 2, kind: input, shape index: {}]   ;;  %s3426_s3 = inlined_call_operand.vmem [shape: f32[2,32,96], index: 3, kind: input, shape index: {}]   ;;  %s3427_s4 = inlined_call_operand.vmem [shape: f32[2,1,96], index: 4, kind: input, shape index: {}]   ;;  %s3428_s5 = inlined_call_operand.vmem [shape: f32[2,4,8,32], index: 5, kind: input, shape index: {}]   ;;  %s3429_s6 = inlined_call_operand.vmem [shape: f32[2,1,32], index: 6, kind: input, shape index: {}]   ;;  %s3430_s7 = inlined_call_operand.hbm [shape: f32[2,1,32], index: 7, kind: input, shape index: {}]   ;;  %s3431_s8 = inlined_call_operand.hbm [shape: f32[2,1,32], index: 8, kind: input, shape index: {}]   ;;  %s3432_s9 = inlined_call_operand.vmem [shape: f32[2,32,64], index: 9, kind: input, shape index: {}]   ;;  %s3433_s10 = inlined_call_operand.vmem [shape: f32[2,1,64], index: 10, kind: input, shape index: {}]   ;;  %s3434_s11 = inlined_call_operand.vmem [shape: f32[2,64,32], index: 11, kind: input, shape index: {}]   ;;  %s3435_s12 = inlined_call_operand.vmem [shape: f32[2,1,32], index: 12, kind: input, shape index: {}]   ;;  %s3436_s13 = inlined_call_operand.vmem [shape: f32[1,32], index: 13, kind: input, shape index: {}]   ;;  %s3437_s14 = inlined_call_operand.vmem [shape: f32[1,32], index: 14, kind: input, shape index: {}]   ;;  %s3438_s15 = inlined_call_operand.hbm [shape: f32[16,32], index: 15, kind: output, shape index: {}]  }
   0x1   :  { %21 = vsyncpa [#allocation6], 0 }
   0x2   :  { %22 = vsyncpa [#allocation9], 0  ;;  %s41_s20 = sshll.u32 %s3424_s1, 4  ;;  %s42_s20 = int_to_ptr.hbm [resolvable:$true] %s41_s20 }
   0x3   :  { %23 = vsyncpa [#allocation4], 0  ;;  %s2778_s21 = smov [#allocation5]   ;;  %s75_s25 = sshll.u32 %s3430_s7, 4  ;;  %s76_s25 = int_to_ptr.hbm [resolvable:$true] %s75_s25 }
   0x4   :  { %s43_s22 = sshll.u32 %s2778_s21, 4  ;;  %s2779_s26 = smov 16   ;;  %s44_s22 = int_to_ptr.vmem [resolvable:$true] %s43_s22 }
   0x5   :  { %s2780_s27 = smov 1   ;;  %s2781_s28 = smov [#allocation8]  }
   0x6   :  { %49 = dma.hbm_to_vmem [thread:$0]  %s42_s20, 32, %s44_s22, [#allocation6], %s2779_s26, %s2779_s26, %s2780_s27  }
   0x7   :  { %s77_s29 = sshll.u32 %s2781_s28, 4  ;;  %s28_s16 = sshll.u32 %s3423_s0, 4  ;;  %s78_s29 = int_to_ptr.vmem [resolvable:$true] %s77_s29  ;;  %s29_s16 = int_to_ptr.hbm [resolvable:$true] %s28_s16 }
   0x8   :  { %83 = dma.hbm_to_vmem [thread:$0]  %s76_s25, 32, %s78_s29, [#allocation9], %s2779_s26, %s2779_s26, %s2780_s27  }
   0x9   :  { %s2782_s7 = smov [#allocation2]   ;;  %s54_s20 = sshll.u32 %s3425_s2, 4  ;;  %s55_s20 = int_to_ptr.hbm [resolvable:$true] %s54_s20 }
   0xa   :  { %s30_s17 = sshll.u32 %s2782_s7, 4  ;;  %s3439_s21 = smov 128   ;;  %s31_s17 = int_to_ptr.vmem [resolvable:$true] %s30_s17 }
   0xb   :  { %s2784_s22 = smov 8   ;;  %s2785_s0 = smov [#allocation7]  }
   0xc   :  { %36 = dma.hbm_to_vmem [thread:$0]  %s29_s16, 256, %s31_s17, [#allocation3], %s3439_s21, %s3439_s21, %s2784_s22  }
   0xd   :  { %s56_s23 = sshll.u32 %s2785_s0, 4  ;;  %s88_s25 = sshll.u32 %s3431_s8, 4  ;;  %s57_s23 = int_to_ptr.vmem [resolvable:$true] %s56_s23  ;;  %s89_s25 = int_to_ptr.hbm [resolvable:$true] %s88_s25 }
   0xe   :  { %62 = dma.hbm_to_vmem [thread:$0]  %s55_s20, 32, %s57_s23, [#allocation6], %s2779_s26, %s2779_s26, %s2780_s27  }
   0xf   :  { %s2786_s2 = smov [#allocation10]  }
  0x10   :  { %s90_s29 = sshll.u32 %s2786_s2, 4  ;;  %s91_s29 = int_to_ptr.vmem [resolvable:$true] %s90_s29 }
  0x11   :  { %96 = dma.hbm_to_vmem [thread:$0]  %s89_s25, 32, %s91_s29, [#allocation9], %s2779_s26, %s2779_s26, %s2780_s27  }
  0x12   :  { %2770 = dma.done.wait [#allocation3], 256  }
  0x13   :  { %2771 = vsyncadd [#allocation3], 4294967040 }
  0x14   :  { %2772 = dma.done.wait [#allocation6], 64  }
  0x15   :  { %2773 = vsyncadd [#allocation6], 4294967232 }
  0x16   :  { %2774 = dma.done.wait [#allocation9], 64  }
  0x17   :  { %2775 = vsyncadd [#allocation9], 4294967232  ;;  %vm133_vm0 = vcmask 261120   ;;  %v2911_v0 = vld [vmem:[#allocation2] sm:$0xff]  ;;  %v2787_v2 = vmov 32.0   ;;  %v2915_v3 = vld [vmem:[#allocation2 + $0x8] sm:$0xff] }
  0x18   :  { %v134_v1 = vsel %vm133_vm0, %v2911_v0, 0.0  ;;  %2524 = vrcp.f32 %v2787_v2  ;;  %v137_v4 = vsel %vm133_vm0, %v2915_v3, 0.0  ;;  %v198_v16 = vld [vmem:[%s3426_s3 + $0x18] sm:$0xff]  ;;  %v197_v17 = vld [vmem:[%s3426_s3 + $0x10] sm:$0xff]  ;;  %v196_v18 = vld [vmem:[%s3426_s3 + $0x8] sm:$0xff]  ;;  %s2788_s20 = smov 96  }
  0x19   :  { %135 = vadd.xlane.f32.xlu0 %v134_v1  ;;  %138 = vadd.xlane.f32.xlu1 %v137_v4  ;;  %v195_v19 = vld [vmem:[%s3426_s3] sm:$0xff]  ;;  %v2506_v34 = vld [vmem:[#allocation5] ss:$0 sm:$0xff]  ;;  %v2507_v37 = vld [vmem:[#allocation7] ss:$0 sm:$0xff]  ;;  %s2789_s0 = smov 88  }
  0x1a   :  { %221 = vmatpush.msra.mxu0 %v198_v16  ;;  %v2508_v47 = vld [vmem:[%s3427_s4] ss:$0 sm:$0xff]  ;;  %vm235_vm8 = vcmask 64512   ;;  %s2790_s23 = smov 120   ;;  %s2791_s24 = smov 64  }
  0x1b   :  { %s2792_s2 = smov 56   ;;  %s2793_s29 = smov 112  }
  0x1c   :  { %222 = vmatpush.msra.mxu0 %v197_v17  ;;  %s2794_s8 = smov 80   ;;  %s2795_s26 = smov 72  }
  0x1d   :  { %s2796_s27 = smov 104   ;;  %s2797_s30 = smov 48  }
  0x1e   :  { %v2525_v5 = vpop.eup %2524  ;;  %223 = vmatpush.msra.mxu0 %v196_v18  ;;  %s2798_s7 = smov 40  }
  0x1f   :  { %v141_v6 = vmul.f32 32.0, %v2525_v5  ;;  %vm145_vm1 = vweird.f32 %v2525_v5 }
  0x20   :  { %224 = vmatpush.msra.mxu0 %v195_v19 }
  0x21   :  { %v142_v7 = vsub.f32 1.0, %v141_v6 }
  0x23   :  { %v143_v8 = vmul.f32 %v2525_v5, %v142_v7 }
  0x25   :  { %v144_v9 = vadd.f32 %v2525_v5, %v143_v8 }
  0x27   :  { %v2919_v10 = vsel %vm145_vm1, %v2525_v5, %v144_v9 }
  0x8c   :  { %v136_v11 = vpop.xlane.xlu0 %135  ;;  %v139_v20 = vpop.xlane.xlu1 %138 }
  0x8d   :  { %v147_v12 = vmul.f32 %v2919_v10, %v136_v11  ;;  %v148_v21 = vmul.f32 %v2919_v10, %v139_v20 }
  0x8f   :  { %v149_v13 = vsub.f32 %v2911_v0, %v147_v12  ;;  %v150_v23 = vsub.f32 %v2915_v3, %v148_v21 }
  0x91   :  { %v151_v14 = vmul.f32 %v149_v13, %v149_v13  ;;  %v152_v25 = vmul.f32 %v150_v23, %v150_v23 }
  0x93   :  { %v153_v15 = vsel %vm133_vm0, %v151_v14, 0.0  ;;  %v156_v27 = vsel %vm133_vm0, %v152_v25, 0.0 }
  0x94   :  { %154 = vadd.xlane.f32.xlu0 %v153_v15  ;;  %157 = vadd.xlane.f32.xlu2 %v156_v27  ;;  %v389_v27 = vld [vmem:[%s3428_s5] sm:$0xff] }
  0x95   :  { %600 = vmatpush.msrb.mxu0 %v389_v27 }
 0x107   :  { %v155_v22 = vpop.xlane.xlu0 %154  ;;  %v158_v40 = vpop.xlane.xlu2 %157 }
 0x108   :  { %v159_v24 = vmul.f32 %v155_v22, %v2919_v10  ;;  %v160_v41 = vmul.f32 %v158_v40, %v2919_v10 }
 0x10a   :  { %v161_v26 = vadd.f32 1e-06, %v159_v24  ;;  %v162_v42 = vadd.f32 1e-06, %v160_v41 }
 0x10c   :  { %2526 = vrsqrt.f32 %v161_v26  ;;  %vm169_vm3 = vweird.f32 %v161_v26  ;;  %vm179_vm5 = vweird.f32 %v162_v42 }
 0x10d   :  { %2528 = vrsqrt.f32 %v162_v42 }
 0x112   :  { %v2527_v28 = vpop.eup %2526 }
 0x113   :  { %v164_v29 = vmul.f32 %v2527_v28, %v161_v26  ;;  %vm170_vm2 = vweird.f32 %v2527_v28  ;;  %v2529_v43 = vpop.eup %2528 }
 0x114   :  { %vm171_vm4 = vmor %vm169_vm3, %vm170_vm2  ;;  %v174_v44 = vmul.f32 %v2529_v43, %v162_v42  ;;  %vm180_vm6 = vweird.f32 %v2529_v43 }
 0x115   :  { %v165_v30 = vmul.f32 %v2527_v28, %v164_v29  ;;  %vm181_vm7 = vmor %vm179_vm5, %vm180_vm6 }
 0x116   :  { %v175_v45 = vmul.f32 %v2529_v43, %v174_v44 }
 0x117   :  { %v166_v31 = vmul.f32 0.5, %v165_v30 }
 0x118   :  { %v176_v46 = vmul.f32 0.5, %v175_v45 }
 0x119   :  { %v167_v32 = vsub.f32 1.5, %v166_v31 }
 0x11a   :  { %v177_v48 = vsub.f32 1.5, %v176_v46 }
 0x11b   :  { %v168_v33 = vmul.f32 %v2527_v28, %v167_v32 }
 0x11c   :  { %v178_v49 = vmul.f32 %v2529_v43, %v177_v48 }
 0x11d   :  { %v172_v35 = vsel %vm171_vm4, %v2527_v28, %v168_v33 }
 0x11e   :  { %v183_v36 = vmul.f32 %v172_v35, %v149_v13  ;;  %v182_v52 = vsel %vm181_vm7, %v2529_v43, %v178_v49 }
 0x11f   :  { %v184_v53 = vmul.f32 %v182_v52, %v150_v23 }
 0x120   :  { %v188_v38 = vmul.f32 %v2506_v34, %v183_v36 }
 0x121   :  { %v189_v54 = vmul.f32 %v2506_v34, %v184_v53 }
 0x122   :  { %v193_v39 = vadd.f32 %v2507_v37, %v188_v38 }
 0x123   :  { %v194_v55 = vadd.f32 %v2507_v37, %v189_v54 }
 0x124   :  { %2380 = vmatmul.msk.f32.vlgmr.msra.gmra.mxu0 %vm133_vm0, %v193_v39 }
 0x12c   :  { %2381 = vmatmul.msk.f32.gmra.mxu0 %vm133_vm0, %v194_v55 }
 0x1a1   :  { %v226_v50 = vpop.f32.mrf.mxu0 }
 0x1a2   :  { %v2945_v51 = vadd.f32 %v2508_v47, %v226_v50 }
 0x1a4   :  { %233 = vrot.lane.b32.xlu1 %v2945_v51, %s2788_s20 }
 0x1a9   :  { %v229_v57 = vpop.f32.mrf.mxu0 }
 0x1aa   :  { %v2955_v58 = vadd.f32 %v2508_v47, %v229_v57 }
 0x1ac   :  { %392 = vrot.lane.b32.xlu1 %v2945_v51, %s2789_s0 }
 0x1b4   :  { %420 = vrot.lane.b32.xlu1 %v2955_v58, %s2789_s0 }
 0x216   :  { %v234_v56 = vpop.permute.xlu1 %233 }
 0x217   :  { %2382 = vmatpush.xpose.msk.msra.mxu1 %vm235_vm8, %v234_v56 }
 0x21a   :  { %2383 = vmatmul.msk.f32.vlgmr.msra.gmra.mxu1 %vm235_vm8, %v2945_v51 }
 0x21e   :  { %v393_v63 = vpop.permute.xlu1 %392 }
 0x226   :  { %v421_v5 = vpop.permute.xlu1 %420 }
 0x297   :  { %v257_v59 = vpop.f32.mrf.mxu1 }
 0x298   :  { %v287_v60 = vmul.f32 0.35355338, %v257_v59 }
 0x29a   :  { %v289_v61 = vsel %vm235_vm8, %v287_v60, -inf }
 0x29b   :  { %290 = vmax.xlane.f32.xlu2 %v289_v61 }
 0x2b3   :  { %261 = vrot.lane.b32.xlu2 %v2955_v58, %s2788_s20 }
 0x2bb   :  { %390 = vrot.lane.b32.xlu2 %v2945_v51, %s2790_s23 }
 0x30e   :  { %v291_v62 = vpop.xlane.xlu2 %290 }
 0x30f   :  { %v295_v1 = vsub.f32 %v287_v60, %v291_v62 }
 0x311   :  { %v297_v2 = vmul.f32 1.442695, %v295_v1 }
 0x313   :  { %2530 = vpow2.f32 %v297_v2 }
 0x316   :  { %v262_v4 = vpop.permute.xlu2 %261 }
 0x317   :  { %2384 = vmatpush.xpose.msk.msra.mxu2 %vm235_vm8, %v262_v4 }
 0x319   :  { %v2531_v6 = vpop.eup %2530 }
 0x31a   :  { %2385 = vmatmul.msk.f32.vlgmr.msra.gmra.mxu2 %vm235_vm8, %v2955_v58  ;;  %v301_v7 = vsel %vm235_vm8, %v2531_v6, 0.0 }
 0x31b   :  { %2390 = vmatpush.xpose.msk.msrb.mxu2 %vm235_vm8, %v421_v5  ;;  %302 = vadd.xlane.f32.xlu0 %v301_v7 }
 0x31e   :  { %v391_v26 = vpop.permute.xlu2 %390 }
 0x32f   :  { %337 = vrot.lane.b32.xlu0 %v2945_v51, %s2791_s24 }
 0x337   :  { %418 = vrot.lane.b32.xlu0 %v2955_v58, %s2790_s23 }
 0x38e   :  { %v303_v8 = vpop.xlane.xlu0 %302 }
 0x38f   :  { %2532 = vrcp.f32 %v303_v8  ;;  %v318_v13 = vand.u32 2147483648, %v303_v8  ;;  %v316_v15 = vand.u32 2147483647, %v303_v8  ;;  %vm312_vm10 = vweird.f32 %v303_v8 }
 0x391   :  { %v319_v17 = vor.u32 1.1754944e-38, %v318_v13  ;;  %vm317_vm12 = vcmp.eq.f32.partialorder %v316_v15, 8.507059e+37 }
 0x395   :  { %v2533_v9 = vpop.eup %2532 }
 0x396   :  { %v308_v11 = vmul.f32 %v2533_v9, %v303_v8  ;;  %vm313_vm9 = vweird.f32 %v2533_v9 }
 0x397   :  { %vm314_vm11 = vmor %vm312_vm10, %vm313_vm9 }
 0x398   :  { %v309_v12 = vsub.f32 1.0, %v308_v11 }
 0x39a   :  { %v310_v14 = vmul.f32 %v2533_v9, %v309_v12 }
 0x39c   :  { %v311_v16 = vadd.f32 %v2533_v9, %v310_v14 }
 0x39d   :  { %v284_v18 = vpop.f32.mrf.mxu2 }
 0x39e   :  { %v288_v19 = vmul.f32 0.35355338, %v284_v18  ;;  %v315_v20 = vsel %vm314_vm11, %v2533_v9, %v311_v16 }
 0x39f   :  { %v320_v21 = vsel %vm317_vm12, %v319_v17, %v315_v20 }
 0x3a0   :  { %v292_v22 = vsel %vm235_vm8, %v288_v19, -inf  ;;  %v321_v23 = vmul.f32 %v2531_v6, %v320_v21 }
 0x3a1   :  { %v338_v24 = vpop.permute.xlu0 %337  ;;  %293 = vmax.xlane.f32.xlu2 %v292_v22 }
 0x3a2   :  { %358 = vmatpush.msrb.mxu1 %v338_v24 }
 0x3a3   :  { %2386 = vmatmul.msk.f32.vlgmr.msrb.gmra.mxu1 %vm235_vm8, %v321_v23 }
 0x3a4   :  { %2388 = vmatpush.xpose.msk.msra.mxu1 %vm235_vm8, %v393_v63 }
 0x3a9   :  { %v419_v25 = vpop.permute.xlu0 %418 }
 0x3aa   :  { %2391 = vmatmul.msk.f32.vlgmr.msrb.gmra.mxu2 %vm235_vm8, %v419_v25 }
 0x3ab   :  { %2389 = vmatmul.msk.f32.vlgmr.msra.gmra.mxu1 %vm235_vm8, %v391_v26 }
 0x414   :  { %v294_v28 = vpop.xlane.xlu2 %293 }
 0x415   :  { %v296_v29 = vsub.f32 %v288_v19, %v294_v28 }
 0x417   :  { %v299_v30 = vmul.f32 1.442695, %v296_v29 }
 0x419   :  { %2534 = vpow2.f32 %v299_v30 }
 0x41f   :  { %v2535_v31 = vpop.eup %2534 }
 0x420   :  { %v360_v32 = vpop.f32.mrf.mxu1  ;;  %v304_v33 = vsel %vm235_vm8, %v2535_v31, 0.0 }
 0x421   :  { %2397 = vmatmul.msk.f32.vlgmr.msrb.gmra.mxu0 %vm235_vm8, %v360_v32  ;;  %305 = vadd.xlane.f32.xlu0 %v304_v33 }
 0x428   :  { %v415_v34 = vpop.f32.mrf.mxu1 }
 0x429   :  { %v446_v35 = vmul.f32 0.35355338, %v415_v34 }
 0x42b   :  { %v448_v36 = vsel %vm235_vm8, %v446_v35, -inf }
 0x42c   :  { %449 = vmax.xlane.f32.xlu1 %v448_v36 }
 0x42d   :  { %v443_v37 = vpop.f32.mrf.mxu2 }
 0x42e   :  { %v447_v38 = vmul.f32 0.35355338, %v443_v37 }
 0x430   :  { %v451_v39 = vsel %vm235_vm8, %v447_v38, -inf }
 0x435   :  { %496 = vrot.lane.b32.xlu0 %v2945_v51, %s2792_s2 }
 0x43d   :  { %608 = vrot.lane.b32.xlu0 %v2945_v51, %s2793_s29 }
 0x445   :  { %522 = vrot.lane.b32.xlu0 %v2955_v58, %s2792_s2  ;;  %363 = vrot.lane.b32.xlu1 %v2955_v58, %s2791_s24 }
 0x44d   :  { %638 = vrot.lane.b32.xlu0 %v2955_v58, %s2794_s8 }
 0x455   :  { %636 = vrot.lane.b32.xlu0 %v2955_v58, %s2793_s29 }
 0x45d   :  { %801 = vrot.lane.b32.xlu0 %v2945_v51, %s2795_s26 }
 0x465   :  { %799 = vrot.lane.b32.xlu0 %v2945_v51, %s2796_s27 }
 0x46f   :  { %452 = vmax.xlane.f32.xlu1 %v451_v39 }
 0x494   :  { %v306_v40 = vpop.xlane.xlu0 %305 }
 0x495   :  { %2536 = vrcp.f32 %v306_v40  ;;  %v333_v53 = vand.u32 2147483648, %v306_v40  ;;  %vm327_vm14 = vweird.f32 %v306_v40  ;;  %v331_v55 = vand.u32 2147483647, %v306_v40 }
 0x497   :  { %v334_v57 = vor.u32 1.1754944e-38, %v333_v53  ;;  %vm332_vm1 = vcmp.eq.f32.partialorder %v331_v55, 8.507059e+37 }
 0x49b   :  { %v2537_v41 = vpop.eup %2536 }
 0x49c   :  { %v323_v44 = vmul.f32 %v2537_v41, %v306_v40  ;;  %vm328_vm13 = vweird.f32 %v2537_v41 }
 0x49d   :  { %vm329_vm15 = vmor %vm327_vm14, %vm328_vm13 }
 0x49e   :  { %v324_v46 = vsub.f32 1.0, %v323_v44  ;;  %v3022_v39 = vpop.f32.mrf.mxu0 }
 0x49f   :  { %v450_v42 = vpop.xlane.xlu1 %449 }
 0x4a0   :  { %v454_v43 = vsub.f32 %v446_v35, %v450_v42  ;;  %v325_v48 = vmul.f32 %v2537_v41, %v324_v46 }
 0x4a2   :  { %v456_v45 = vmul.f32 1.442695, %v454_v43  ;;  %v326_v52 = vadd.f32 %v2537_v41, %v325_v48 }
 0x4a4   :  { %2538 = vpow2.f32 %v456_v45  ;;  %v330_v56 = vsel %vm329_vm15, %v2537_v41, %v326_v52 }
 0x4a5   :  { %v335_v59 = vsel %vm332_vm1, %v334_v57, %v330_v56 }
 0x4a6   :  { %v336_v62 = vmul.f32 %v2535_v31, %v335_v59 }
 0x4a7   :  { %v497_v47 = vpop.permute.xlu0 %496 }
 0x4aa   :  { %v2539_v49 = vpop.eup %2538 }
 0x4ab   :  { %v460_v50 = vsel %vm235_vm8, %v2539_v49, 0.0 }
 0x4ac   :  { %461 = vadd.xlane.f32.xlu2 %v460_v50 }
 0x4af   :  { %v609_v54 = vpop.permute.xlu0 %608 }
 0x4b7   :  { %v523_v60 = vpop.permute.xlu0 %522  ;;  %v364_v61 = vpop.permute.xlu1 %363 }
 0x4b8   :  { %384 = vmatpush.msra.mxu3 %v364_v61  ;;  %543 = vmatpush.msrb.mxu1 %v523_v60 }
 0x4b9   :  { %2387 = vmatmul.msk.f32.vlgmr.msra.gmra.mxu3 %vm235_vm8, %v336_v62 }
 0x4ba   :  { %517 = vmatpush.msrb.mxu3 %v497_v47 }
 0x4bf   :  { %v639_v63 = vpop.permute.xlu0 %638 }
 0x4c0   :  { %2401 = vmatpush.xpose.msk.msra.mxu1 %vm235_vm8, %v639_v63 }
 0x4c4   :  { %610 = vrot.lane.b32.xlu2 %v2945_v51, %s2794_s8 }
 0x4c7   :  { %v637_v1 = vpop.permute.xlu0 %636 }
 0x4cf   :  { %v802_v2 = vpop.permute.xlu0 %801 }
 0x4d0   :  { %2408 = vmatpush.xpose.msk.msra.mxu0 %vm235_vm8, %v802_v2 }
 0x4d7   :  { %v800_v24 = vpop.permute.xlu0 %799 }
 0x4e2   :  { %v453_v4 = vpop.xlane.xlu1 %452 }
 0x4e3   :  { %v455_v5 = vsub.f32 %v447_v38, %v453_v4  ;;  %v2394_v38 = vld [vmem:[%s3428_s5 + $0x8] sm:$0xff] }
 0x4e4   :  { %571 = vmatpush.msra.mxu2 %v2394_v38 }
 0x4e5   :  { %v458_v6 = vmul.f32 1.442695, %v455_v5 }
 0x4e7   :  { %2540 = vpow2.f32 %v458_v6 }
 0x4ed   :  { %v2541_v7 = vpop.eup %2540 }
 0x4ee   :  { %v463_v8 = vsel %vm235_vm8, %v2541_v7, 0.0 }
 0x4ef   :  { %464 = vadd.xlane.f32.xlu2 %v463_v8 }
 0x507   :  { %714 = vrot.lane.b32.xlu2 %v2945_v51, %s2797_s30 }
 0x50f   :  { %827 = vrot.lane.b32.xlu2 %v2955_v58, %s2796_s27 }
 0x51f   :  { %v462_v9 = vpop.xlane.xlu2 %461 }
 0x520   :  { %2542 = vrcp.f32 %v462_v9  ;;  %v477_v15 = vand.u32 2147483648, %v462_v9  ;;  %v475_v17 = vand.u32 2147483647, %v462_v9  ;;  %vm471_vm3 = vweird.f32 %v462_v9 }
 0x522   :  { %v478_v19 = vor.u32 1.1754944e-38, %v477_v15  ;;  %vm476_vm5 = vcmp.eq.f32.partialorder %v475_v17, 8.507059e+37 }
 0x526   :  { %v2543_v11 = vpop.eup %2542 }
 0x527   :  { %v467_v12 = vmul.f32 %v2543_v11, %v462_v9  ;;  %v611_v13 = vpop.permute.xlu2 %610  ;;  %vm472_vm2 = vweird.f32 %v2543_v11 }
 0x528   :  { %2399 = vmatpush.xpose.msk.msra.mxu3 %vm235_vm8, %v611_v13  ;;  %vm473_vm4 = vmor %vm471_vm3, %vm472_vm2 }
 0x529   :  { %v468_v14 = vsub.f32 1.0, %v467_v12 }
 0x52b   :  { %v469_v16 = vmul.f32 %v2543_v11, %v468_v14 }
 0x52d   :  { %v470_v18 = vadd.f32 %v2543_v11, %v469_v16 }
 0x52f   :  { %v474_v20 = vsel %vm473_vm4, %v2543_v11, %v470_v18 }
 0x530   :  { %v479_v21 = vsel %vm476_vm5, %v478_v19, %v474_v20 }
 0x531   :  { %v480_v22 = vmul.f32 %v2539_v49, %v479_v21 }
 0x533   :  { %2392 = vmatmul.msk.f32.vlgmr.msrb.gmra.mxu3 %vm235_vm8, %v480_v22 }
 0x53b   :  { %2400 = vmatmul.msk.f32.vlgmr.msra.gmra.mxu3 %vm235_vm8, %v609_v54 }
 0x53c   :  { %v386_v23 = vpop.f32.mrf.mxu3 }
 0x53d   :  { %2398 = vmatmul.msk.f32.gmra.mxu0 %vm235_vm8, %v386_v23 }
 0x545   :  { %2409 = vmatmul.msk.f32.vlgmr.msra.gmra.mxu0 %vm235_vm8, %v800_v24 }
 0x562   :  { %v465_v25 = vpop.xlane.xlu2 %464 }
 0x563   :  { %2544 = vrcp.f32 %v465_v25  ;;  %v492_v30 = vand.u32 2147483648, %v465_v25  ;;  %v490_v32 = vand.u32 2147483647, %v465_v25  ;;  %vm486_vm7 = vweird.f32 %v465_v25 }
 0x565   :  { %v493_v34 = vor.u32 1.1754944e-38, %v492_v30  ;;  %vm491_vm10 = vcmp.eq.f32.partialorder %v490_v32, 8.507059e+37 }
 0x569   :  { %v2545_v26 = vpop.eup %2544 }
 0x56a   :  { %v482_v27 = vmul.f32 %v2545_v26, %v465_v25  ;;  %v715_v28 = vpop.permute.xlu2 %714  ;;  %vm487_vm6 = vweird.f32 %v2545_v26 }
 0x56b   :  { %735 = vmatpush.msrb.mxu3 %v715_v28  ;;  %vm488_vm9 = vmor %vm486_vm7, %vm487_vm6 }
 0x56c   :  { %v483_v29 = vsub.f32 1.0, %v482_v27 }
 0x56e   :  { %v484_v31 = vmul.f32 %v2545_v26, %v483_v29 }
 0x570   :  { %v485_v33 = vadd.f32 %v2545_v26, %v484_v31 }
 0x572   :  { %v489_v35 = vsel %vm488_vm9, %v2545_v26, %v485_v33  ;;  %v828_v60 = vpop.permute.xlu2 %827 }
 0x573   :  { %v494_v36 = vsel %vm491_vm10, %v493_v34, %v489_v35 }
 0x574   :  { %v495_v37 = vmul.f32 %v2541_v7, %v494_v36 }
 0x576   :  { %2393 = vmatmul.msk.f32.vlgmr.msrb.gmra.mxu1 %vm235_vm8, %v495_v37 }
 0x57e   :  { %2402 = vmatmul.msk.f32.vlgmr.msra.gmra.mxu1 %vm235_vm8, %v637_v1 }
 0x5b6   :  { %v519_v40 = vpop.f32.mrf.mxu3 }
 0x5b7   :  { %2395 = vmatmul.msk.f32.vlgmr.msra.gmra.mxu2 %vm235_vm8, %v519_v40 }
 0x5ba   :  { %v3025_v41 = vpop.f32.mrf.mxu0 }
 0x5be   :  { %v633_v42 = vpop.f32.mrf.mxu3 }
 0x5bf   :  { %v664_v43 = vmul.f32 0.35355338, %v633_v42 }
 0x5c1   :  { %v666_v44 = vsel %vm235_vm8, %v664_v43, -inf }
 0x5c2   :  { %v824_v45 = vpop.f32.mrf.mxu0  ;;  %667 = vmax.xlane.f32.xlu1 %v666_v44 }
 0x5c3   :  { %v855_v46 = vmul.f32 0.35355338, %v824_v45 }
 0x5c5   :  { %v857_v47 = vsel %vm235_vm8, %v855_v46, -inf }
 0x5c6   :  { %858 = vmax.xlane.f32.xlu2 %v857_v47 }
 0x5db   :  { %829 = vrot.lane.b32.xlu1 %v2955_v58, %s2795_s26 }
 0x5f3   :  { %v545_v48 = vpop.f32.mrf.mxu1 }
 0x5f4   :  { %2396 = vmatmul.msk.f32.gmra.mxu2 %vm235_vm8, %v545_v48 }
 0x5fb   :  { %v661_v49 = vpop.f32.mrf.mxu1 }
 0x5fc   :  { %v665_v50 = vmul.f32 0.35355338, %v661_v49  ;;  %v2405_v49 = vld [vmem:[%s3428_s5 + $0x10] sm:$0xff] }
 0x5fd   :  { %789 = vmatpush.msrb.mxu2 %v2405_v49 }
 0x5fe   :  { %v669_v52 = vsel %vm235_vm8, %v665_v50, -inf }
 0x605   :  { %670 = vmax.xlane.f32.xlu1 %v669_v52 }
 0x61e   :  { %905 = vrot.lane.b32.xlu1 %v2945_v51, %s2798_s7 }
 0x635   :  { %v668_v53 = vpop.xlane.xlu1 %667 }
 0x636   :  { %v672_v54 = vsub.f32 %v664_v43, %v668_v53 }
 0x638   :  { %v674_v55 = vmul.f32 1.442695, %v672_v54 }
 0x639   :  { %v859_v61 = vpop.xlane.xlu2 %858 }
 0x63a   :  { %2546 = vpow2.f32 %v674_v55  ;;  %v863_v1 = vsub.f32 %v855_v46, %v859_v61  ;;  %v2414_v55 = vld [vmem:[%s3428_s5 + $0x18] sm:$0xff] }
 0x63c   :  { %v865_v4 = vmul.f32 1.442695, %v863_v1  ;;  %v573_v1 = vpop.f32.mrf.mxu2 }
 0x640   :  { %v2547_v56 = vpop.eup %2546 }
 0x641   :  { %v678_v57 = vsel %vm235_vm8, %v2547_v56, 0.0 }
 0x642   :  { %679 = vadd.xlane.f32.xlu0 %v678_v57 }
 0x64d   :  { %v830_v59 = vpop.permute.xlu1 %829 }
 0x64e   :  { %2410 = vmatpush.xpose.msk.msra.mxu3 %vm235_vm8, %v830_v59 }
 0x678   :  { %v671_v62 = vpop.xlane.xlu1 %670 }
 0x679   :  { %v673_v63 = vsub.f32 %v665_v50, %v671_v62 }
 0x67b   :  { %v676_v2 = vmul.f32 1.442695, %v673_v63 }
 0x67d   :  { %2548 = vpow2.f32 %v676_v2  ;;  %v3058_v2 = vpop.f32.mrf.mxu2 }
 0x67e   :  { %2550 = vpow2.f32 %v865_v4 }
 0x683   :  { %v2549_v51 = vpop.eup %2548 }
 0x684   :  { %v681_v5 = vsel %vm235_vm8, %v2549_v51, 0.0  ;;  %v2551_v6 = vpop.eup %2550 }
 0x685   :  { %682 = vadd.xlane.f32.xlu0 %v681_v5  ;;  %v869_v7 = vsel %vm235_vm8, %v2551_v6, 0.0 }
 0x68d   :  { %870 = vadd.xlane.f32.xlu0 %v869_v7 }
 0x690   :  { %v906_v44 = vpop.permute.xlu1 %905 }
 0x6a1   :  { %740 = vrot.lane.b32.xlu0 %v2955_v58, %s2797_s30 }
 0x6b5   :  { %v680_v8 = vpop.xlane.xlu0 %679 }
 0x6b6   :  { %2552 = vrcp.f32 %v680_v8  ;;  %v695_v13 = vand.u32 2147483648, %v680_v8  ;;  %v693_v15 = vand.u32 2147483647, %v680_v8  ;;  %vm689_vm12 = vweird.f32 %v680_v8 }
 0x6b8   :  { %v696_v17 = vor.u32 1.1754944e-38, %v695_v13  ;;  %vm694_vm14 = vcmp.eq.f32.partialorder %v693_v15, 8.507059e+37 }
 0x6bc   :  { %v2553_v9 = vpop.eup %2552 }
 0x6bd   :  { %v685_v11 = vmul.f32 %v2553_v9, %v680_v8  ;;  %vm690_vm11 = vweird.f32 %v2553_v9 }
 0x6be   :  { %vm691_vm13 = vmor %vm689_vm12, %vm690_vm11 }
 0x6bf   :  { %v686_v12 = vsub.f32 1.0, %v685_v11 }
 0x6c1   :  { %v687_v14 = vmul.f32 %v2553_v9, %v686_v12 }
 0x6c3   :  { %v688_v16 = vadd.f32 %v2553_v9, %v687_v14 }
 0x6c5   :  { %v692_v18 = vsel %vm691_vm13, %v2553_v9, %v688_v16 }
 0x6c6   :  { %v697_v19 = vsel %vm694_vm14, %v696_v17, %v692_v18 }
 0x6c7   :  { %v698_v20 = vmul.f32 %v2547_v56, %v697_v19 }
 0x6c9   :  { %2403 = vmatmul.msk.f32.vlgmr.msrb.gmra.mxu3 %vm235_vm8, %v698_v20 }
 0x6ca   :  { %980 = vmatpush.msrb.mxu3 %v2414_v55 }
 0x6d1   :  { %2411 = vmatmul.msk.f32.vlgmr.msra.gmra.mxu3 %vm235_vm8, %v828_v60 }
 0x6f8   :  { %v683_v21 = vpop.xlane.xlu0 %682 }
 0x6f9   :  { %2554 = vrcp.f32 %v683_v21  ;;  %v710_v30 = vand.u32 2147483648, %v683_v21  ;;  %vm704_vm1 = vweird.f32 %v683_v21  ;;  %v708_v32 = vand.u32 2147483647, %v683_v21 }
 0x6fb   :  { %v711_v35 = vor.u32 1.1754944e-38, %v710_v30  ;;  %vm709_vm3 = vcmp.eq.f32.partialorder %v708_v32, 8.507059e+37  ;;  %v1056_v30 = vld [vmem:[%s3432_s9 + $0x10] sm:$0xff]  ;;  %v1054_v32 = vld [vmem:[%s3432_s9] sm:$0xff] }
 0x6ff   :  { %v2555_v22 = vpop.eup %2554 }
 0x700   :  { %v700_v23 = vmul.f32 %v2555_v22, %v683_v21  ;;  %v871_v24 = vpop.xlane.xlu0 %870  ;;  %vm705_vm15 = vweird.f32 %v2555_v22 }
 0x701   :  { %2556 = vrcp.f32 %v871_v24  ;;  %vm706_vm2 = vmor %vm704_vm1, %vm705_vm15  ;;  %v886_v38 = vand.u32 2147483648, %v871_v24  ;;  %vm880_vm5 = vweird.f32 %v871_v24  ;;  %v884_v40 = vand.u32 2147483647, %v871_v24 }
 0x702   :  { %v701_v25 = vsub.f32 1.0, %v700_v23 }
 0x703   :  { %v887_v46 = vor.u32 1.1754944e-38, %v886_v38  ;;  %vm885_vm7 = vcmp.eq.f32.partialorder %v884_v40, 8.507059e+37 }
 0x704   :  { %v702_v26 = vmul.f32 %v2555_v22, %v701_v25 }
 0x706   :  { %v703_v29 = vadd.f32 %v2555_v22, %v702_v26 }
 0x707   :  { %v2557_v27 = vpop.eup %2556 }
 0x708   :  { %v876_v28 = vmul.f32 %v2557_v27, %v871_v24  ;;  %v707_v33 = vsel %vm706_vm2, %v2555_v22, %v703_v29  ;;  %vm881_vm4 = vweird.f32 %v2557_v27  ;;  %v1057_v29 = vld [vmem:[%s3432_s9 + $0x18] sm:$0xff] }
 0x709   :  { %v712_v36 = vsel %vm709_vm3, %v711_v35, %v707_v33  ;;  %vm882_vm6 = vmor %vm880_vm5, %vm881_vm4 }
 0x70a   :  { %v877_v31 = vsub.f32 1.0, %v876_v28  ;;  %v713_v43 = vmul.f32 %v2549_v51, %v712_v36  ;;  %v603_v51 = vadd.f32 %v3022_v39, %v573_v1 }
 0x70c   :  { %v878_v34 = vmul.f32 %v2557_v27, %v877_v31  ;;  %v1055_v31 = vld [vmem:[%s3432_s9 + $0x8] sm:$0xff] }
 0x70e   :  { %v879_v37 = vadd.f32 %v2557_v27, %v878_v34 }
 0x710   :  { %v883_v45 = vsel %vm882_vm6, %v2557_v27, %v879_v37  ;;  %vm1183_vm6 = vcmask 523264  }
 0x711   :  { %v888_v47 = vsel %vm885_vm7, %v887_v46, %v883_v45 }
 0x712   :  { %v889_v48 = vmul.f32 %v2551_v6, %v888_v47  ;;  %v3064_v6 = vld [vmem:[%s3429_s6] ss:$0 sm:$0xff]  ;;  %v3092_v47 = vld [vmem:[#allocation10] ss:$0 sm:$0xff] }
 0x713   :  { %v741_v42 = vpop.permute.xlu0 %740 }
 0x714   :  { %761 = vmatpush.msrb.mxu1 %v741_v42 }
 0x715   :  { %2404 = vmatmul.msk.f32.vlgmr.msrb.gmra.mxu1 %vm235_vm8, %v713_v43 }
 0x716   :  { %926 = vmatpush.msra.mxu1 %v906_v44  ;;  %v3090_v44 = vld [vmem:[#allocation8] ss:$0 sm:$0xff] }
 0x718   :  { %1080 = vmatpush.msrb.mxu1 %v1057_v29 }
 0x71a   :  { %1081 = vmatpush.msrb.mxu1 %v1056_v30 }
 0x71c   :  { %1082 = vmatpush.msrb.mxu1 %v1055_v31 }
 0x71d   :  { %2412 = vmatmul.msk.f32.vlgmr.msra.gmra.mxu1 %vm235_vm8, %v889_v48 }
 0x71e   :  { %1083 = vmatpush.msrb.mxu1 %v1054_v32 }
 0x74c   :  { %v737_v50 = vpop.f32.mrf.mxu3 }
 0x74d   :  { %2406 = vmatmul.msk.f32.vlgmr.msrb.gmra.mxu2 %vm235_vm8, %v737_v50 }
 0x754   :  { %v852_v52 = vpop.f32.mrf.mxu3 }
 0x755   :  { %v856_v53 = vmul.f32 0.35355338, %v852_v52  ;;  %v606_v52 = vadd.f32 %v3025_v41, %v3058_v2  ;;  %v1177_v2 = vld [vmem:[%s3434_s11 + $0x30] sm:$0xff] }
 0x757   :  { %v860_v54 = vsel %vm235_vm8, %v856_v53, -inf }
 0x758   :  { %861 = vmax.xlane.f32.xlu2 %v860_v54 }
 0x770   :  { %931 = vrot.lane.b32.xlu2 %v2955_v58, %s2798_s7 }
 0x792   :  { %v763_v56 = vpop.f32.mrf.mxu1 }
 0x793   :  { %2407 = vmatmul.msk.f32.gmra.mxu2 %vm235_vm8, %v763_v56 }
 0x79a   :  { %v928_v57 = vpop.f32.mrf.mxu1 }
 0x79b   :  { %2415 = vmatmul.msk.f32.vlgmr.msrb.gmra.mxu3 %vm235_vm8, %v928_v57 }
 0x7cb   :  { %v862_v59 = vpop.xlane.xlu2 %861 }
 0x7cc   :  { %v864_v60 = vsub.f32 %v856_v53, %v862_v59 }
 0x7ce   :  { %v867_v61 = vmul.f32 1.442695, %v864_v60  ;;  %v3108_v60 = vld [vmem:[%s3433_s10] ss:$0 sm:$0xff] }
 0x7d0   :  { %2558 = vpow2.f32 %v867_v61  ;;  %v791_v4 = vpop.f32.mrf.mxu2 }
 0x7d1   :  { %v797_v5 = vadd.f32 %v791_v4, %v603_v51  ;;  %v1176_v4 = vld [vmem:[%s3434_s11 + $0x28] sm:$0xff]  ;;  %v1175_v51 = vld [vmem:[%s3434_s11 + $0x20] sm:$0xff] }
 0x7d3   :  { %v932_v62 = vpop.permute.xlu2 %931 }
 0x7d4   :  { %952 = vmatpush.msrb.mxu0 %v932_v62 }
 0x7d6   :  { %v2559_v63 = vpop.eup %2558 }
 0x7d7   :  { %v872_v58 = vsel %vm235_vm8, %v2559_v63, 0.0 }
 0x7d8   :  { %873 = vadd.xlane.f32.xlu0 %v872_v58 }
 0x816   :  { %v794_v50 = vpop.f32.mrf.mxu2 }
 0x817   :  { %v798_v53 = vadd.f32 %v794_v50, %v606_v52 }
 0x81e   :  { %v982_v7 = vpop.f32.mrf.mxu3 }
 0x81f   :  { %v988_v8 = vadd.f32 %v982_v7, %v797_v5 }
 0x821   :  { %v994_v9 = vadd.f32 %v3064_v6, %v988_v8  ;;  %v1173_v8 = vld [vmem:[%s3434_s11 + $0x10] sm:$0xff] }
 0x823   :  { %v3068_v11 = vadd.f32 %v994_v9, %v2911_v0 }
 0x825   :  { %v1000_v12 = vsel %vm133_vm0, %v3068_v11, 0.0 }
 0x826   :  { %1001 = vadd.xlane.f32.xlu1 %v1000_v12 }
 0x84b   :  { %v874_v13 = vpop.xlane.xlu0 %873 }
 0x84c   :  { %2560 = vrcp.f32 %v874_v13  ;;  %v901_v16 = vand.u32 2147483648, %v874_v13  ;;  %v899_v18 = vand.u32 2147483647, %v874_v13  ;;  %vm895_vm10 = vweird.f32 %v874_v13 }
 0x84e   :  { %v902_v20 = vor.u32 1.1754944e-38, %v901_v16  ;;  %vm900_vm12 = vcmp.eq.f32.partialorder %v899_v18, 8.507059e+37 }
 0x852   :  { %v2561_v39 = vpop.eup %2560 }
 0x853   :  { %v891_v14 = vmul.f32 %v2561_v39, %v874_v13  ;;  %vm896_vm9 = vweird.f32 %v2561_v39  ;;  %v1172_v13 = vld [vmem:[%s3434_s11 + $0x8] sm:$0xff] }
 0x854   :  { %vm897_vm11 = vmor %vm895_vm10, %vm896_vm9 }
 0x855   :  { %v892_v15 = vsub.f32 1.0, %v891_v14 }
 0x857   :  { %v893_v17 = vmul.f32 %v2561_v39, %v892_v15  ;;  %v1171_v15 = vld [vmem:[%s3434_s11] sm:$0xff] }
 0x859   :  { %v894_v19 = vadd.f32 %v2561_v39, %v893_v17 }
 0x85b   :  { %v898_v21 = vsel %vm897_vm11, %v2561_v39, %v894_v19 }
 0x85c   :  { %v903_v0 = vsel %vm900_vm12, %v902_v20, %v898_v21 }
 0x85d   :  { %v904_v22 = vmul.f32 %v2559_v63, %v903_v0 }
 0x85f   :  { %2413 = vmatmul.msk.f32.vlgmr.msrb.gmra.mxu0 %vm235_vm8, %v904_v22 }
 0x899   :  { %v1002_v23 = vpop.xlane.xlu1 %1001 }
 0x89a   :  { %v1006_v24 = vmul.f32 %v1002_v23, %v2919_v10 }
 0x89c   :  { %v1008_v25 = vsub.f32 %v3068_v11, %v1006_v24 }
 0x89e   :  { %v1010_v26 = vmul.f32 %v1008_v25, %v1008_v25 }
 0x8a0   :  { %v1012_v27 = vsel %vm133_vm0, %v1010_v26, 0.0 }
 0x8a1   :  { %1013 = vadd.xlane.f32.xlu2 %v1012_v27 }
 0x8dc   :  { %v954_v28 = vpop.f32.mrf.mxu0 }
 0x8dd   :  { %2416 = vmatmul.msk.f32.gmra.mxu3 %vm235_vm8, %v954_v28 }
 0x914   :  { %v1014_v33 = vpop.xlane.xlu2 %1013 }
 0x915   :  { %v1018_v34 = vmul.f32 %v1014_v33, %v2919_v10 }
 0x917   :  { %v1020_v35 = vadd.f32 1e-06, %v1018_v34 }
 0x919   :  { %2562 = vrsqrt.f32 %v1020_v35  ;;  %vm1028_vm14 = vweird.f32 %v1020_v35 }
 0x91f   :  { %v2563_v36 = vpop.eup %2562 }
 0x920   :  { %v1023_v37 = vmul.f32 %v2563_v36, %v1020_v35  ;;  %vm1029_vm13 = vweird.f32 %v2563_v36 }
 0x921   :  { %vm1030_vm15 = vmor %vm1028_vm14, %vm1029_vm13 }
 0x922   :  { %v1024_v38 = vmul.f32 %v2563_v36, %v1023_v37  ;;  %v2799_v37 = vmov -1.0  }
 0x924   :  { %v1025_v40 = vmul.f32 0.5, %v1024_v38 }
 0x926   :  { %v1026_v42 = vsub.f32 1.5, %v1025_v40 }
 0x928   :  { %v1027_v43 = vmul.f32 %v2563_v36, %v1026_v42 }
 0x92a   :  { %v1031_v45 = vsel %vm1030_vm15, %v2563_v36, %v1027_v43 }
 0x92b   :  { %v1042_v46 = vmul.f32 %v1031_v45, %v1008_v25 }
 0x92d   :  { %v1047_v48 = vmul.f32 %v3090_v44, %v1042_v46 }
 0x92f   :  { %v1052_v49 = vadd.f32 %v3092_v47, %v1047_v48 }
 0x931   :  { %2417 = vmatmul.msk.f32.vlgmr.msrb.gmra.mxu1 %vm133_vm0, %v1052_v49 }
 0x960   :  { %v985_v54 = vpop.f32.mrf.mxu3 }
 0x961   :  { %v989_v55 = vadd.f32 %v985_v54, %v798_v53 }
 0x963   :  { %v995_v56 = vadd.f32 %v3064_v6, %v989_v55  ;;  %v1174_v6 = vld [vmem:[%s3434_s11 + $0x18] sm:$0xff] }
 0x965   :  { %v3101_v57 = vadd.f32 %v995_v56, %v2915_v3  ;;  %v1178_v3 = vld [vmem:[%s3434_s11 + $0x38] sm:$0xff] }
 0x966   :  { %1198 = vmatpush.msra.mxu2 %v1178_v3 }
 0x967   :  { %v1003_v59 = vsel %vm133_vm0, %v3101_v57, 0.0 }
 0x968   :  { %1004 = vadd.xlane.f32.xlu0 %v1003_v59  ;;  %1199 = vmatpush.msra.mxu2 %v1177_v2  ;;  %v3144_v59 = vld [vmem:[%s3435_s12] ss:$0 sm:$0xff] }
 0x96a   :  { %1200 = vmatpush.msra.mxu2 %v1176_v4 }
 0x96c   :  { %1201 = vmatpush.msra.mxu2 %v1175_v51 }
 0x96e   :  { %1202 = vmatpush.msra.mxu2 %v1174_v6 }
 0x970   :  { %1203 = vmatpush.msra.mxu2 %v1173_v8 }
 0x972   :  { %1204 = vmatpush.msra.mxu2 %v1172_v13 }
 0x974   :  { %1205 = vmatpush.msra.mxu2 %v1171_v15 }
 0x9ae   :  { %v1085_v61 = vpop.f32.mrf.mxu1 }
 0x9af   :  { %v1086_v41 = vadd.f32 %v3108_v60, %v1085_v61 }
 0x9b1   :  { %v1093_v62 = vmul.f32 0.70710677, %v1086_v41  ;;  %v1091_v43 = vmul.f32 0.5, %v1086_v41 }
 0x9b3   :  { %v1099_v63 = vand.u32 2147483647, %v1093_v62  ;;  %vm1095_vm5 = vcmp.ge.f32.partialorder %v1093_v62, 0.0 }
 0x9b4   :  { %v1097_v38 = vsel %vm1095_vm5, 1.0, %v2799_v37 }
 0x9b5   :  { %v1101_v58 = vmul.f32 0.3275911, %v1099_v63  ;;  %v1153_v20 = vsub.f32 0.0, %v1099_v63 }
 0x9b7   :  { %v1103_v1 = vadd.f32 1.0, %v1101_v58  ;;  %v1155_v22 = vmul.f32 %v1153_v20, %v1099_v63 }
 0x9b9   :  { %2564 = vrcp.f32 %v1103_v1  ;;  %v1116_v12 = vand.u32 2147483648, %v1103_v1  ;;  %v1114_v14 = vand.u32 2147483647, %v1103_v1  ;;  %vm1110_vm2 = vweird.f32 %v1103_v1 }
 0x9ba   :  { %v1157_v25 = vmul.f32 1.442695, %v1155_v22 }
 0x9bb   :  { %v1117_v17 = vor.u32 1.1754944e-38, %v1116_v12  ;;  %vm1115_vm4 = vcmp.eq.f32.partialorder %v1114_v14, 8.507059e+37 }
 0x9bc   :  { %2566 = vpow2.f32 %v1157_v25 }
 0x9bf   :  { %v2565_v5 = vpop.eup %2564 }
 0x9c0   :  { %v1106_v7 = vmul.f32 %v2565_v5, %v1103_v1  ;;  %vm1111_vm1 = vweird.f32 %v2565_v5 }
 0x9c1   :  { %vm1112_vm3 = vmor %vm1110_vm2, %vm1111_vm1 }
 0x9c2   :  { %v1107_v9 = vsub.f32 1.0, %v1106_v7  ;;  %v2567_v31 = vpop.eup %2566 }
 0x9c4   :  { %v1108_v39 = vmul.f32 %v2565_v5, %v1107_v9 }
 0x9c6   :  { %v1109_v16 = vadd.f32 %v2565_v5, %v1108_v39 }
 0x9c8   :  { %v1113_v18 = vsel %vm1112_vm3, %v2565_v5, %v1109_v16 }
 0x9c9   :  { %v1118_v19 = vsel %vm1115_vm4, %v1117_v17, %v1113_v18 }
 0x9ca   :  { %v1135_v21 = vmul.f32 1.0614054, %v1118_v19 }
 0x9cc   :  { %v1137_v0 = vadd.f32 -1.4531521, %v1135_v21 }
 0x9ce   :  { %v1139_v23 = vmul.f32 %v1137_v0, %v1118_v19 }
 0x9d0   :  { %v1141_v24 = vadd.f32 1.4214138, %v1139_v23 }
 0x9d2   :  { %v1143_v26 = vmul.f32 %v1141_v24, %v1118_v19 }
 0x9d4   :  { %v1145_v27 = vadd.f32 -0.28449672, %v1143_v26 }
 0x9d6   :  { %v1147_v28 = vmul.f32 %v1145_v27, %v1118_v19 }
 0x9d8   :  { %v1149_v29 = vadd.f32 0.2548296, %v1147_v28 }
 0x9da   :  { %v1151_v30 = vmul.f32 %v1149_v29, %v1118_v19 }
 0x9db   :  { %v1005_v32 = vpop.xlane.xlu0 %1004 }
 0x9dc   :  { %v1161_v33 = vmul.f32 %v2567_v31, %v1151_v30  ;;  %v1007_v34 = vmul.f32 %v1005_v32, %v2919_v10 }
 0x9de   :  { %v1163_v35 = vsub.f32 1.0, %v1161_v33  ;;  %v1009_v36 = vsub.f32 %v3101_v57, %v1007_v34 }
 0x9e0   :  { %v1165_v40 = vmul.f32 %v1163_v35, %v1097_v38  ;;  %v1011_v42 = vmul.f32 %v1009_v36, %v1009_v36 }
 0x9e2   :  { %v1167_v45 = vadd.f32 1.0, %v1165_v40  ;;  %v1015_v46 = vsel %vm133_vm0, %v1011_v42, 0.0 }
 0x9e3   :  { %1016 = vadd.xlane.f32.xlu0 %v1015_v46  ;;  %v2424_v46 = vld [vmem:[%s3426_s3 + $0x38] sm:$0xff] }
 0x9e4   :  { %v1169_v48 = vmul.f32 %v1167_v45, %v1091_v43  ;;  %1301 = vmatpush.msra.mxu0 %v2424_v46 }
 0x9e6   :  { %2419 = vmatmul.msk.f32.vlgmr.msra.gmra.mxu2 %vm1183_vm6, %v1169_v48  ;;  %v2423_v48 = vld [vmem:[%s3426_s3 + $0x30] sm:$0xff] }
 0x9e7   :  { %1302 = vmatpush.msra.mxu0 %v2423_v48 }
 0xa56   :  { %v1017_v49 = vpop.xlane.xlu0 %1016 }
 0xa57   :  { %v1019_v50 = vmul.f32 %v1017_v49, %v2919_v10  ;;  %v2422_v49 = vld [vmem:[%s3426_s3 + $0x28] sm:$0xff] }
 0xa58   :  { %1303 = vmatpush.msra.mxu0 %v2422_v49 }
 0xa59   :  { %v1021_v52 = vadd.f32 1e-06, %v1019_v50  ;;  %v2421_v50 = vld [vmem:[%s3426_s3 + $0x20] sm:$0xff] }
 0xa5a   :  { %1304 = vmatpush.msra.mxu0 %v2421_v50 }
 0xa5b   :  { %2568 = vrsqrt.f32 %v1021_v52  ;;  %vm1038_vm9 = vweird.f32 %v1021_v52 }
 0xa61   :  { %v2569_v53 = vpop.eup %2568 }
 0xa62   :  { %v1033_v54 = vmul.f32 %v2569_v53, %v1021_v52  ;;  %vm1039_vm7 = vweird.f32 %v2569_v53 }
 0xa63   :  { %vm1040_vm10 = vmor %vm1038_vm9, %vm1039_vm7 }
 0xa64   :  { %v1034_v55 = vmul.f32 %v2569_v53, %v1033_v54 }
 0xa66   :  { %v1035_v56 = vmul.f32 0.5, %v1034_v55 }
 0xa68   :  { %v1036_v61 = vsub.f32 1.5, %v1035_v56 }
 0xa69   :  { %v1207_v41 = vpop.f32.mrf.mxu2 }
 0xa6a   :  { %v1037_v62 = vmul.f32 %v2569_v53, %v1036_v61  ;;  %v1208_v63 = vadd.f32 %v3144_v59, %v1207_v41 }
 0xa6c   :  { %v1041_v58 = vsel %vm1040_vm10, %v2569_v53, %v1037_v62  ;;  %v3148_v1 = vadd.f32 %v1208_v63, %v3068_v11 }
 0xa6d   :  { %v1043_v3 = vmul.f32 %v1041_v58, %v1009_v36  ;;  %v2514_v58 = vld [vmem:[#allocation5 + $0x1] ss:$0 sm:$0xff] }
 0xa6e   :  { %v1219_v2 = vsel %vm133_vm0, %v3148_v1, 0.0 }
 0xa6f   :  { %1220 = vadd.xlane.f32.xlu0 %v1219_v2  ;;  %v1048_v4 = vmul.f32 %v3090_v44, %v1043_v3 }
 0xa71   :  { %v1053_v51 = vadd.f32 %v3092_v47, %v1048_v4  ;;  %v2515_v4 = vld [vmem:[#allocation7 + $0x1] ss:$0 sm:$0xff] }
 0xa73   :  { %2418 = vmatmul.msk.f32.gmra.mxu1 %vm133_vm0, %v1053_v51 }
 0xae2   :  { %v1221_v5 = vpop.xlane.xlu0 %1220 }
 0xae3   :  { %v1225_v6 = vmul.f32 %v1221_v5, %v2919_v10 }
 0xae5   :  { %v3157_v7 = vsub.f32 %v3148_v1, %v1225_v6 }
 0xae7   :  { %v1229_v11 = vmul.f32 %v3157_v7, %v3157_v7 }
 0xae9   :  { %v1231_v8 = vsel %vm133_vm0, %v1229_v11, 0.0 }
 0xaea   :  { %1232 = vadd.xlane.f32.xlu1 %v1231_v8 }
 0xaf0   :  { %v1088_v9 = vpop.f32.mrf.mxu1 }
 0xaf1   :  { %v1089_v12 = vadd.f32 %v3108_v60, %v1088_v9 }
 0xaf3   :  { %v1094_v44 = vmul.f32 0.70710677, %v1089_v12  ;;  %v1092_v42 = vmul.f32 0.5, %v1089_v12  ;;  %v2516_v12 = vld [vmem:[%s3427_s4 + $0x1] ss:$0 sm:$0xff] }
 0xaf5   :  { %v1100_v13 = vand.u32 2147483647, %v1094_v44  ;;  %vm1096_vm15 = vcmp.ge.f32.partialorder %v1094_v44, 0.0 }
 0xaf6   :  { %v1098_v38 = vsel %vm1096_vm15, 1.0, %v2799_v37 }
 0xaf7   :  { %v1102_v47 = vmul.f32 0.3275911, %v1100_v13  ;;  %v1154_v22 = vsub.f32 0.0, %v1100_v13 }
 0xaf9   :  { %v1104_v39 = vadd.f32 1.0, %v1102_v47  ;;  %v1156_v25 = vmul.f32 %v1154_v22, %v1100_v13 }
 0xafb   :  { %2570 = vrcp.f32 %v1104_v39  ;;  %v1131_v17 = vand.u32 2147483648, %v1104_v39  ;;  %v1129_v19 = vand.u32 2147483647, %v1104_v39  ;;  %vm1125_vm12 = vweird.f32 %v1104_v39 }
 0xafc   :  { %v1159_v28 = vmul.f32 1.442695, %v1156_v25 }
 0xafd   :  { %v1132_v21 = vor.u32 1.1754944e-38, %v1131_v17  ;;  %vm1130_vm14 = vcmp.eq.f32.partialorder %v1129_v19, 8.507059e+37 }
 0xafe   :  { %2572 = vpow2.f32 %v1159_v28 }
 0xb01   :  { %v2571_v14 = vpop.eup %2570 }
 0xb02   :  { %v1121_v15 = vmul.f32 %v2571_v14, %v1104_v39  ;;  %vm1126_vm11 = vweird.f32 %v2571_v14 }
 0xb03   :  { %vm1127_vm13 = vmor %vm1125_vm12, %vm1126_vm11 }
 0xb04   :  { %v1122_v16 = vsub.f32 1.0, %v1121_v15  ;;  %v2573_v34 = vpop.eup %2572 }
 0xb06   :  { %v1123_v18 = vmul.f32 %v2571_v14, %v1122_v16 }
 0xb08   :  { %v1124_v20 = vadd.f32 %v2571_v14, %v1123_v18 }
 0xb0a   :  { %v1128_v0 = vsel %vm1127_vm13, %v2571_v14, %v1124_v20 }
 0xb0b   :  { %v1133_v60 = vsel %vm1130_vm14, %v1132_v21, %v1128_v0 }
 0xb0c   :  { %v1136_v23 = vmul.f32 1.0614054, %v1133_v60 }
 0xb0e   :  { %v1138_v24 = vadd.f32 -1.4531521, %v1136_v23 }
 0xb10   :  { %v1140_v26 = vmul.f32 %v1138_v24, %v1133_v60 }
 0xb12   :  { %v1142_v27 = vadd.f32 1.4214138, %v1140_v26 }
 0xb14   :  { %v1144_v29 = vmul.f32 %v1142_v27, %v1133_v60 }
 0xb16   :  { %v1146_v30 = vadd.f32 -0.28449672, %v1144_v29 }
 0xb18   :  { %v1148_v31 = vmul.f32 %v1146_v30, %v1133_v60 }
 0xb1a   :  { %v1150_v32 = vadd.f32 0.2548296, %v1148_v31 }
 0xb1c   :  { %v1152_v33 = vmul.f32 %v1150_v32, %v1133_v60 }
 0xb1e   :  { %v1162_v35 = vmul.f32 %v2573_v34, %v1152_v33 }
 0xb20   :  { %v1164_v36 = vsub.f32 1.0, %v1162_v35 }
 0xb22   :  { %v1166_v40 = vmul.f32 %v1164_v36, %v1098_v38 }
 0xb24   :  { %v1168_v43 = vadd.f32 1.0, %v1166_v40 }
 0xb26   :  { %v1170_v45 = vmul.f32 %v1168_v43, %v1092_v42 }
 0xb28   :  { %2420 = vmatmul.msk.f32.gmra.mxu2 %vm1183_vm6, %v1170_v45 }
 0xb5d   :  { %v1233_v52 = vpop.xlane.xlu1 %1232 }
 0xb5e   :  { %v1237_v53 = vmul.f32 %v1233_v52, %v2919_v10 }
 0xb60   :  { %v1239_v54 = vadd.f32 1e-06, %v1237_v53 }
 0xb62   :  { %2574 = vrsqrt.f32 %v1239_v54  ;;  %vm1247_vm2 = vweird.f32 %v1239_v54 }
 0xb68   :  { %v2575_v55 = vpop.eup %2574 }
 0xb69   :  { %v1242_v56 = vmul.f32 %v2575_v55, %v1239_v54  ;;  %vm1248_vm1 = vweird.f32 %v2575_v55 }
 0xb6a   :  { %vm1249_vm3 = vmor %vm1247_vm2, %vm1248_vm1 }
 0xb6b   :  { %v1243_v61 = vmul.f32 %v2575_v55, %v1242_v56 }
 0xb6d   :  { %v1244_v41 = vmul.f32 0.5, %v1243_v61 }
 0xb6f   :  { %v1245_v62 = vsub.f32 1.5, %v1244_v41 }
 0xb71   :  { %v1246_v63 = vmul.f32 %v2575_v55, %v1245_v62 }
 0xb73   :  { %v1250_v3 = vsel %vm1249_vm3, %v2575_v55, %v1246_v63 }
 0xb74   :  { %v1261_v2 = vmul.f32 %v1250_v3, %v3157_v7 }
 0xb76   :  { %v1266_v51 = vmul.f32 %v2514_v58, %v1261_v2 }
 0xb78   :  { %v1271_v5 = vadd.f32 %v2515_v4, %v1266_v51 }
 0xb7a   :  { %2426 = vmatmul.msk.f32.vlgmr.msra.gmra.mxu0 %vm133_vm0, %v1271_v5 }
 0xbab   :  { %v1210_v6 = vpop.f32.mrf.mxu2 }
 0xbac   :  { %v1211_v11 = vadd.f32 %v3144_v59, %v1210_v6 }
 0xbae   :  { %v3182_v8 = vadd.f32 %v1211_v11, %v3101_v57 }
 0xbb0   :  { %v1222_v9 = vsel %vm133_vm0, %v3182_v8, 0.0 }
 0xbb1   :  { %1223 = vadd.xlane.f32.xlu0 %v1222_v9 }
 0xbf7   :  { %v1306_v7 = vpop.f32.mrf.mxu0 }
 0xbf8   :  { %v3189_v44 = vadd.f32 %v2516_v12, %v1306_v7 }
 0xbfa   :  { %1472 = vrot.lane.b32.xlu0 %v3189_v44, %s2789_s0  ;;  %1313 = vrot.lane.b32.xlu2 %v3189_v44, %s2788_s20 }
 0xc24   :  { %v1224_v59 = vpop.xlane.xlu0 %1223 }
 0xc25   :  { %v1226_v57 = vmul.f32 %v1224_v59, %v2919_v10 }
 0xc27   :  { %v1228_v13 = vsub.f32 %v3182_v8, %v1226_v57 }
 0xc29   :  { %v1230_v47 = vmul.f32 %v1228_v13, %v1228_v13 }
 0xc2b   :  { %v1234_v39 = vsel %vm133_vm0, %v1230_v47, 0.0 }
 0xc2c   :  { %1235 = vadd.xlane.f32.xlu1 %v1234_v39 }
 0xc45   :  { %1470 = vrot.lane.b32.xlu1 %v3189_v44, %s2790_s23 }
 0xc54   :  { %v1314_v14 = vpop.permute.xlu2 %1313 }
 0xc55   :  { %2428 = vmatpush.xpose.msk.msra.mxu3 %vm235_vm8, %v1314_v14 }
 0xc58   :  { %2429 = vmatmul.msk.f32.vlgmr.msra.gmra.mxu3 %vm235_vm8, %v3189_v44 }
 0xc6c   :  { %v1473_v15 = vpop.permute.xlu0 %1472 }
 0xc6d   :  { %2435 = vmatpush.xpose.msk.msrb.mxu3 %vm235_vm8, %v1473_v15 }
 0xc9f   :  { %v1236_v16 = vpop.xlane.xlu1 %1235 }
 0xca0   :  { %v1238_v17 = vmul.f32 %v1236_v16, %v2919_v10 }
 0xca2   :  { %v1240_v18 = vadd.f32 1e-06, %v1238_v17 }
 0xca4   :  { %2576 = vrsqrt.f32 %v1240_v18  ;;  %vm1257_vm5 = vweird.f32 %v1240_v18 }
 0xcaa   :  { %v2577_v19 = vpop.eup %2576 }
 0xcab   :  { %v1252_v20 = vmul.f32 %v2577_v19, %v1240_v18  ;;  %vm1258_vm4 = vweird.f32 %v2577_v19 }
 0xcac   :  { %vm1259_vm7 = vmor %vm1257_vm5, %vm1258_vm4 }
 0xcad   :  { %v1253_v21 = vmul.f32 %v2577_v19, %v1252_v20 }
 0xcaf   :  { %v1254_v0 = vmul.f32 0.5, %v1253_v21 }
 0xcb1   :  { %v1255_v22 = vsub.f32 1.5, %v1254_v0  ;;  %v2434_v0 = vld [vmem:[%s3428_s5 + $0x20] sm:$0xff] }
 0xcb3   :  { %v1256_v60 = vmul.f32 %v2577_v19, %v1255_v22 }
 0xcb5   :  { %v1260_v23 = vsel %vm1259_vm7, %v2577_v19, %v1256_v60 }
 0xcb6   :  { %v1262_v24 = vmul.f32 %v1260_v23, %v1228_v13 }
 0xcb7   :  { %v1471_v25 = vpop.permute.xlu1 %1470 }
 0xcb8   :  { %2436 = vmatmul.msk.f32.vlgmr.msrb.gmra.mxu3 %vm235_vm8, %v1471_v25  ;;  %v1267_v26 = vmul.f32 %v2514_v58, %v1262_v24 }
 0xcba   :  { %v1272_v27 = vadd.f32 %v2515_v4, %v1267_v26 }
 0xcbc   :  { %2427 = vmatmul.msk.f32.gmra.mxu0 %vm133_vm0, %v1272_v27 }
 0xcdb   :  { %v1336_v28 = vpop.f32.mrf.mxu3 }
 0xcdc   :  { %v1366_v29 = vmul.f32 0.35355338, %v1336_v28 }
 0xcde   :  { %v1368_v30 = vsel %vm235_vm8, %v1366_v29, -inf }
 0xcdf   :  { %1369 = vmax.xlane.f32.xlu0 %v1368_v30 }
 0xd39   :  { %v1309_v31 = vpop.f32.mrf.mxu0 }
 0xd3a   :  { %v3208_v32 = vadd.f32 %v2516_v12, %v1309_v31 }
 0xd3b   :  { %v1495_v38 = vpop.f32.mrf.mxu3 }
 0xd3c   :  { %1340 = vrot.lane.b32.xlu2 %v3208_v32, %s2788_s20  ;;  %v1526_v42 = vmul.f32 0.35355338, %v1495_v38 }
 0xd3e   :  { %v1528_v43 = vsel %vm235_vm8, %v1526_v42, -inf }
 0xd52   :  { %v1370_v33 = vpop.xlane.xlu0 %1369 }
 0xd53   :  { %v1374_v34 = vsub.f32 %v1366_v29, %v1370_v33  ;;  %v2441_v29 = vld [vmem:[%s3428_s5 + $0x28] sm:$0xff] }
 0xd54   :  { %1651 = vmatpush.msra.mxu3 %v2441_v29 }
 0xd55   :  { %v1376_v35 = vmul.f32 1.442695, %v1374_v34 }
 0xd57   :  { %2578 = vpow2.f32 %v1376_v35 }
 0xd5d   :  { %v2579_v36 = vpop.eup %2578 }
 0xd5e   :  { %v1380_v40 = vsel %vm235_vm8, %v2579_v36, 0.0 }
 0xd5f   :  { %1381 = vadd.xlane.f32.xlu1 %v1380_v40 }
 0xd65   :  { %1529 = vmax.xlane.f32.xlu2 %v1528_v43 }
 0xd78   :  { %1576 = vrot.lane.b32.xlu1 %v3189_v44, %s2792_s2 }
 0xd7d   :  { %1416 = vrot.lane.b32.xlu2 %v3189_v44, %s2791_s24 }
 0xd80   :  { %1688 = vrot.lane.b32.xlu1 %v3189_v44, %s2793_s29 }
 0xd85   :  { %1690 = vrot.lane.b32.xlu2 %v3189_v44, %s2794_s8 }
 0xd88   :  { %1442 = vrot.lane.b32.xlu1 %v3208_v32, %s2791_s24 }
 0xd96   :  { %v1341_v45 = vpop.permute.xlu2 %1340 }
 0xd97   :  { %2430 = vmatpush.xpose.msk.msra.mxu1 %vm235_vm8, %v1341_v45 }
 0xd9a   :  { %2431 = vmatmul.msk.f32.vlgmr.msra.gmra.mxu1 %vm235_vm8, %v3208_v32 }
 0xdd2   :  { %v1382_v46 = vpop.xlane.xlu1 %1381 }
 0xdd3   :  { %2580 = vrcp.f32 %v1382_v46  ;;  %v1397_v55 = vand.u32 2147483648, %v1382_v46  ;;  %v1395_v61 = vand.u32 2147483647, %v1382_v46  ;;  %vm1391_vm10 = vweird.f32 %v1382_v46 }
 0xdd5   :  { %v1398_v63 = vor.u32 1.1754944e-38, %v1397_v55  ;;  %vm1396_vm12 = vcmp.eq.f32.partialorder %v1395_v61, 8.507059e+37 }
 0xdd8   :  { %v1530_v48 = vpop.xlane.xlu2 %1529 }
 0xdd9   :  { %v2581_v49 = vpop.eup %2580  ;;  %v1534_v50 = vsub.f32 %v1526_v42, %v1530_v48 }
 0xdda   :  { %v1387_v52 = vmul.f32 %v2581_v49, %v1382_v46  ;;  %vm1392_vm9 = vweird.f32 %v2581_v49 }
 0xddb   :  { %v1536_v53 = vmul.f32 1.442695, %v1534_v50  ;;  %vm1393_vm11 = vmor %vm1391_vm10, %vm1392_vm9 }
 0xddc   :  { %v1388_v54 = vsub.f32 1.0, %v1387_v52 }
 0xddd   :  { %2582 = vpow2.f32 %v1536_v53 }
 0xdde   :  { %v1389_v56 = vmul.f32 %v2581_v49, %v1388_v54 }
 0xde0   :  { %v1390_v41 = vadd.f32 %v2581_v49, %v1389_v56  ;;  %v1417_v62 = vpop.permute.xlu2 %1416 }
 0xde1   :  { %1437 = vmatpush.msrb.mxu2 %v1417_v62 }
 0xde2   :  { %v1394_v58 = vsel %vm1393_vm11, %v2581_v49, %v1390_v41 }
 0xde3   :  { %v2583_v3 = vpop.eup %2582  ;;  %v1399_v2 = vsel %vm1396_vm12, %v1398_v63, %v1394_v58 }
 0xde4   :  { %v1540_v4 = vsel %vm235_vm8, %v2583_v3, 0.0  ;;  %v1400_v51 = vmul.f32 %v2579_v36, %v1399_v2 }
 0xde5   :  { %1541 = vadd.xlane.f32.xlu0 %v1540_v4 }
 0xde6   :  { %2432 = vmatmul.msk.f32.vlgmr.msrb.gmra.mxu2 %vm235_vm8, %v1400_v51 }
 0xde8   :  { %v1691_v6 = vpop.permute.xlu2 %1690 }
 0xdea   :  { %v1577_v5 = vpop.permute.xlu1 %1576 }
 0xdeb   :  { %1597 = vmatpush.msra.mxu2 %v1577_v5 }
 0xded   :  { %2446 = vmatpush.xpose.msk.msrb.mxu2 %vm235_vm8, %v1691_v6 }
 0xdf2   :  { %v1689_v11 = vpop.permute.xlu1 %1688 }
 0xdf9   :  { %1500 = vrot.lane.b32.xlu0 %v3208_v32, %s2789_s0 }
 0xdfa   :  { %v1443_v9 = vpop.permute.xlu1 %1442 }
 0xdfb   :  { %1463 = vmatpush.msrb.mxu0 %v1443_v9 }
 0xe01   :  { %1498 = vrot.lane.b32.xlu0 %v3208_v32, %s2790_s23 }
 0xe17   :  { %v1363_v12 = vpop.f32.mrf.mxu1 }
 0xe18   :  { %v1367_v7 = vmul.f32 0.35355338, %v1363_v12 }
 0xe1a   :  { %v1371_v59 = vsel %vm235_vm8, %v1367_v7, -inf }
 0xe2b   :  { %1372 = vmax.xlane.f32.xlu0 %v1371_v59 }
 0xe58   :  { %v1542_v57 = vpop.xlane.xlu0 %1541 }
 0xe59   :  { %2584 = vrcp.f32 %v1542_v57  ;;  %v1557_v14 = vand.u32 2147483648, %v1542_v57  ;;  %v1555_v16 = vand.u32 2147483647, %v1542_v57  ;;  %vm1551_vm14 = vweird.f32 %v1542_v57 }
 0xe5b   :  { %v1558_v18 = vor.u32 1.1754944e-38, %v1557_v14  ;;  %vm1556_vm1 = vcmp.eq.f32.partialorder %v1555_v16, 8.507059e+37 }
 0xe5f   :  { %v2585_v13 = vpop.eup %2584 }
 0xe60   :  { %v1547_v47 = vmul.f32 %v2585_v13, %v1542_v57  ;;  %vm1552_vm13 = vweird.f32 %v2585_v13 }
 0xe61   :  { %vm1553_vm15 = vmor %vm1551_vm14, %vm1552_vm13 }
 0xe62   :  { %v1548_v39 = vsub.f32 1.0, %v1547_v47 }
 0xe64   :  { %v1549_v15 = vmul.f32 %v2585_v13, %v1548_v39 }
 0xe66   :  { %v1550_v17 = vadd.f32 %v2585_v13, %v1549_v15 }
 0xe68   :  { %v1554_v19 = vsel %vm1553_vm15, %v2585_v13, %v1550_v17 }
 0xe69   :  { %v1559_v20 = vsel %vm1556_vm1, %v1558_v18, %v1554_v19  ;;  %v1439_v23 = vpop.f32.mrf.mxu2 }
 0xe6a   :  { %v1560_v21 = vmul.f32 %v2583_v3, %v1559_v20 }
 0xe6b   :  { %v1501_v22 = vpop.permute.xlu0 %1500 }
 0xe6c   :  { %2437 = vmatpush.xpose.msk.msrb.mxu1 %vm235_vm8, %v1501_v22  ;;  %2439 = vmatmul.msk.f32.vlgmr.msra.gmra.mxu2 %vm235_vm8, %v1560_v21 }
 0xe70   :  { %1680 = vmatpush.msra.mxu1 %v2434_v0 }
 0xe73   :  { %v1499_v60 = vpop.permute.xlu0 %1498 }
 0xe74   :  { %2438 = vmatmul.msk.f32.vlgmr.msrb.gmra.mxu1 %vm235_vm8, %v1499_v60  ;;  %2447 = vmatmul.msk.f32.vlgmr.msrb.gmra.mxu2 %vm235_vm8, %v1689_v11 }
 0xe7c   :  { %2444 = vmatmul.msk.f32.vlgmr.msra.gmra.mxu1 %vm235_vm8, %v1439_v23 }
 0xe9e   :  { %v1373_v24 = vpop.xlane.xlu0 %1372 }
 0xe9f   :  { %v1375_v25 = vsub.f32 %v1367_v7, %v1373_v24 }
 0xea1   :  { %v1378_v26 = vmul.f32 1.442695, %v1375_v25 }
 0xea3   :  { %2586 = vpow2.f32 %v1378_v26 }
 0xea9   :  { %v2587_v27 = vpop.eup %2586 }
 0xeaa   :  { %v1383_v28 = vsel %vm235_vm8, %v2587_v27, 0.0 }
 0xeab   :  { %1384 = vadd.xlane.f32.xlu2 %v1383_v28 }
 0xec3   :  { %1602 = vrot.lane.b32.xlu2 %v3208_v32, %s2792_s2 }
 0xecb   :  { %1794 = vrot.lane.b32.xlu2 %v3189_v44, %s2797_s30 }
 0xeef   :  { %v1599_v30 = vpop.f32.mrf.mxu2 }
 0xef0   :  { %2442 = vmatmul.msk.f32.vlgmr.msra.gmra.mxu3 %vm235_vm8, %v1599_v30 }
 0xef1   :  { %v1523_v31 = vpop.f32.mrf.mxu1 }
 0xef2   :  { %v1527_v33 = vmul.f32 0.35355338, %v1523_v31 }
 0xef4   :  { %v1531_v34 = vsel %vm235_vm8, %v1527_v33, -inf }
 0xef5   :  { %1532 = vmax.xlane.f32.xlu1 %v1531_v34 }
 0xef7   :  { %v1713_v35 = vpop.f32.mrf.mxu2 }
 0xef8   :  { %v1744_v36 = vmul.f32 0.35355338, %v1713_v35 }
 0xef9   :  { %v3278_v35 = vpop.f32.mrf.mxu1 }
 0xefa   :  { %v1746_v38 = vsel %vm235_vm8, %v1744_v36, -inf }
 0xefb   :  { %1747 = vmax.xlane.f32.xlu0 %v1746_v38 }
 0xf0e   :  { %1718 = vrot.lane.b32.xlu1 %v3208_v32, %s2794_s8 }
 0xf0f   :  { %1716 = vrot.lane.b32.xlu0 %v3208_v32, %s2793_s29 }
 0xf16   :  { %1909 = vrot.lane.b32.xlu1 %v3208_v32, %s2795_s26 }
 0xf17   :  { %1881 = vrot.lane.b32.xlu0 %v3189_v44, %s2795_s26 }
 0xf1e   :  { %v1385_v40 = vpop.xlane.xlu2 %1384 }
 0xf1f   :  { %2588 = vrcp.f32 %v1385_v40  ;;  %v1412_v48 = vand.u32 2147483648, %v1385_v40  ;;  %v1410_v50 = vand.u32 2147483647, %v1385_v40  ;;  %vm1406_vm3 = vweird.f32 %v1385_v40 }
 0xf21   :  { %v1413_v53 = vor.u32 1.1754944e-38, %v1412_v48  ;;  %vm1411_vm5 = vcmp.eq.f32.partialorder %v1410_v50, 8.507059e+37 }
 0xf25   :  { %v2589_v42 = vpop.eup %2588 }
 0xf26   :  { %v1402_v43 = vmul.f32 %v2589_v42, %v1385_v40  ;;  %v1603_v45 = vpop.permute.xlu2 %1602  ;;  %vm1407_vm2 = vweird.f32 %v2589_v42 }
 0xf27   :  { %1623 = vmatpush.msra.mxu0 %v1603_v45  ;;  %vm1408_vm4 = vmor %vm1406_vm3, %vm1407_vm2 }
 0xf28   :  { %v1403_v46 = vsub.f32 1.0, %v1402_v43 }
 0xf2a   :  { %v1404_v49 = vmul.f32 %v2589_v42, %v1403_v46 }
 0xf2c   :  { %v1405_v52 = vadd.f32 %v2589_v42, %v1404_v49 }
 0xf2e   :  { %v1409_v54 = vsel %vm1408_vm4, %v2589_v42, %v1405_v52  ;;  %v1795_v55 = vpop.permute.xlu2 %1794 }
 0xf2f   :  { %v1414_v56 = vsel %vm1411_vm5, %v1413_v53, %v1409_v54  ;;  %1815 = vmatpush.msra.mxu2 %v1795_v55 }
 0xf30   :  { %v1415_v61 = vmul.f32 %v2587_v27, %v1414_v56 }
 0xf32   :  { %2433 = vmatmul.msk.f32.vlgmr.msrb.gmra.mxu0 %vm235_vm8, %v1415_v61 }
 0xf68   :  { %v1533_v41 = vpop.xlane.xlu1 %1532 }
 0xf69   :  { %v1535_v62 = vsub.f32 %v1527_v33, %v1533_v41 }
 0xf6b   :  { %v1538_v63 = vmul.f32 1.442695, %v1535_v62 }
 0xf6d   :  { %2590 = vpow2.f32 %v1538_v63 }
 0xf6e   :  { %v1748_v58 = vpop.xlane.xlu0 %1747 }
 0xf6f   :  { %v1752_v3 = vsub.f32 %v1744_v36, %v1748_v58  ;;  %v2452_v36 = vld [vmem:[%s3428_s5 + $0x30] sm:$0xff] }
 0xf70   :  { %1869 = vmatpush.msrb.mxu3 %v2452_v36 }
 0xf71   :  { %v1754_v2 = vmul.f32 1.442695, %v1752_v3 }
 0xf73   :  { %v2591_v4 = vpop.eup %2590  ;;  %2592 = vpow2.f32 %v1754_v2 }
 0xf74   :  { %v1543_v51 = vsel %vm235_vm8, %v2591_v4, 0.0 }
 0xf75   :  { %1544 = vadd.xlane.f32.xlu2 %v1543_v51 }
 0xf79   :  { %v2593_v5 = vpop.eup %2592 }
 0xf7a   :  { %v1758_v6 = vsel %vm235_vm8, %v2593_v5, 0.0 }
 0xf7b   :  { %1759 = vadd.xlane.f32.xlu0 %v1758_v6 }
 0xf80   :  { %v1719_v11 = vpop.permute.xlu1 %1718 }
 0xf81   :  { %2448 = vmatpush.xpose.msk.msrb.mxu0 %vm235_vm8, %v1719_v11  ;;  %v1717_v9 = vpop.permute.xlu0 %1716 }
 0xf88   :  { %v1910_v12 = vpop.permute.xlu1 %1909 }
 0xf89   :  { %2457 = vmatpush.xpose.msk.msrb.mxu2 %vm235_vm8, %v1910_v12  ;;  %v1882_v7 = vpop.permute.xlu0 %1881 }
 0xf8a   :  { %2455 = vmatpush.xpose.msk.msrb.mxu1 %vm235_vm8, %v1882_v7 }
 0xf8d   :  { %1879 = vrot.lane.b32.xlu2 %v3189_v44, %s2796_s27 }
 0xf8f   :  { %1907 = vrot.lane.b32.xlu0 %v3208_v32, %s2796_s27 }
 0xfaf   :  { %v1465_v59 = vpop.f32.mrf.mxu0 }
 0xfb0   :  { %2445 = vmatmul.msk.f32.gmra.mxu1 %vm235_vm8, %v1465_v59 }
 0xfe8   :  { %v1545_v57 = vpop.xlane.xlu2 %1544 }
 0xfe9   :  { %2594 = vrcp.f32 %v1545_v57  ;;  %v1572_v16 = vand.u32 2147483648, %v1545_v57  ;;  %v1570_v18 = vand.u32 2147483647, %v1545_v57  ;;  %vm1566_vm9 = vweird.f32 %v1545_v57 }
 0xfeb   :  { %v1573_v0 = vor.u32 1.1754944e-38, %v1572_v16  ;;  %vm1571_vm11 = vcmp.eq.f32.partialorder %v1570_v18, 8.507059e+37 }
 0xfee   :  { %v1760_v13 = vpop.xlane.xlu0 %1759 }
 0xfef   :  { %v2595_v47 = vpop.eup %2594  ;;  %2596 = vrcp.f32 %v1760_v13  ;;  %v1775_v24 = vand.u32 2147483648, %v1760_v13  ;;  %v1773_v26 = vand.u32 2147483647, %v1760_v13  ;;  %vm1769_vm13 = vweird.f32 %v1760_v13 }
 0xff0   :  { %v1562_v39 = vmul.f32 %v2595_v47, %v1545_v57  ;;  %v1880_v14 = vpop.permute.xlu2 %1879  ;;  %vm1567_vm7 = vweird.f32 %v2595_v47 }
 0xff1   :  { %2456 = vmatmul.msk.f32.vlgmr.msrb.gmra.mxu1 %vm235_vm8, %v1880_v14  ;;  %vm1568_vm10 = vmor %vm1566_vm9, %vm1567_vm7  ;;  %v1776_v29 = vor.u32 1.1754944e-38, %v1775_v24  ;;  %vm1774_vm15 = vcmp.eq.f32.partialorder %v1773_v26, 8.507059e+37 }
 0xff2   :  { %v1563_v15 = vsub.f32 1.0, %v1562_v39 }
 0xff4   :  { %v1564_v17 = vmul.f32 %v2595_v47, %v1563_v15 }
 0xff5   :  { %v2597_v19 = vpop.eup %2596 }
 0xff6   :  { %v1565_v20 = vadd.f32 %v2595_v47, %v1564_v17  ;;  %v1765_v21 = vmul.f32 %v2597_v19, %v1760_v13  ;;  %vm1770_vm12 = vweird.f32 %v2597_v19 }
 0xff7   :  { %vm1771_vm14 = vmor %vm1769_vm13, %vm1770_vm12 }
 0xff8   :  { %v1569_v22 = vsel %vm1568_vm10, %v2595_v47, %v1565_v20  ;;  %v1766_v60 = vsub.f32 1.0, %v1765_v21 }
 0xff9   :  { %v1574_v23 = vsel %vm1571_vm11, %v1573_v0, %v1569_v22 }
 0xffa   :  { %v1767_v25 = vmul.f32 %v2597_v19, %v1766_v60  ;;  %v1575_v27 = vmul.f32 %v2591_v4, %v1574_v23 }
 0xffc   :  { %v1768_v28 = vadd.f32 %v2597_v19, %v1767_v25  ;;  %2440 = vmatmul.msk.f32.vlgmr.msra.gmra.mxu0 %vm235_vm8, %v1575_v27 }
 0xffe   :  { %v1772_v30 = vsel %vm1771_vm14, %v2597_v19, %v1768_v28 }
 0xfff   :  { %v1777_v31 = vsel %vm1774_vm15, %v1776_v29, %v1772_v30 }
0x1000   :  { %v1778_v33 = vmul.f32 %v2593_v5, %v1777_v31 }
0x1001   :  { %v1908_v34 = vpop.permute.xlu0 %1907 }
0x1002   :  { %2450 = vmatmul.msk.f32.vlgmr.msra.gmra.mxu2 %vm235_vm8, %v1778_v33 }
0x1004   :  { %2449 = vmatmul.msk.f32.vlgmr.msrb.gmra.mxu0 %vm235_vm8, %v1717_v9 }
0x100a   :  { %2458 = vmatmul.msk.f32.vlgmr.msrb.gmra.mxu2 %vm235_vm8, %v1908_v34 }
0x102d   :  { %v3283_v38 = vpop.f32.mrf.mxu1 }
0x106e   :  { %v1904_v40 = vpop.f32.mrf.mxu1 }
0x106f   :  { %v1935_v42 = vmul.f32 0.35355338, %v1904_v40 }
0x1071   :  { %v1937_v43 = vsel %vm235_vm8, %v1935_v42, -inf }
0x1072   :  { %1938 = vmax.xlane.f32.xlu2 %v1937_v43 }
0x1079   :  { %v1625_v45 = vpop.f32.mrf.mxu0 }
0x107a   :  { %2443 = vmatmul.msk.f32.gmra.mxu3 %vm235_vm8, %v1625_v45 }
0x1081   :  { %v1741_v46 = vpop.f32.mrf.mxu0 }
0x1082   :  { %v1745_v48 = vmul.f32 0.35355338, %v1741_v46 }
0x1084   :  { %v1749_v49 = vsel %vm235_vm8, %v1745_v48, -inf }
0x1085   :  { %1750 = vmax.xlane.f32.xlu1 %v1749_v49  ;;  %v1817_v50 = vpop.f32.mrf.mxu2 }
0x1086   :  { %2453 = vmatmul.msk.f32.vlgmr.msrb.gmra.mxu3 %vm235_vm8, %v1817_v50  ;;  %v2461_v50 = vld [vmem:[%s3428_s5 + $0x38] sm:$0xff] }
0x1087   :  { %2060 = vmatpush.msra.mxu2 %v2461_v50 }
0x108d   :  { %v1932_v52 = vpop.f32.mrf.mxu2 }
0x108e   :  { %v1936_v53 = vmul.f32 0.35355338, %v1932_v52 }
0x1090   :  { %v1940_v54 = vsel %vm235_vm8, %v1936_v53, -inf }
0x1091   :  { %1941 = vmax.xlane.f32.xlu0 %v1940_v54 }
0x10e5   :  { %v1939_v55 = vpop.xlane.xlu2 %1938 }
0x10e6   :  { %v1943_v56 = vsub.f32 %v1935_v42, %v1939_v55  ;;  %v1653_v55 = vpop.f32.mrf.mxu3 }
0x10e8   :  { %v1945_v61 = vmul.f32 1.442695, %v1943_v56 }
0x10ea   :  { %2598 = vpow2.f32 %v1945_v61 }
0x10f0   :  { %v3290_v41 = vpop.eup %2598 }
0x10f1   :  { %v1949_v62 = vsel %vm235_vm8, %v3290_v41, 0.0 }
0x10f2   :  { %1950 = vadd.xlane.f32.xlu2 %v1949_v62 }
0x10f8   :  { %v1751_v63 = vpop.xlane.xlu1 %1750 }
0x10f9   :  { %v1753_v58 = vsub.f32 %v1745_v48, %v1751_v63  ;;  %v2517_v63 = vld [vmem:[%s3429_s6 + $0x1] ss:$0 sm:$0xff] }
0x10fb   :  { %v1756_v3 = vmul.f32 1.442695, %v1753_v58 }
0x10fd   :  { %2600 = vpow2.f32 %v1756_v3  ;;  %v1656_v56 = vpop.f32.mrf.mxu3 }
0x1103   :  { %v2601_v2 = vpop.eup %2600 }
0x1104   :  { %v1942_v4 = vpop.xlane.xlu0 %1941  ;;  %v1761_v51 = vsel %vm235_vm8, %v2601_v2, 0.0 }
0x1105   :  { %v1944_v5 = vsub.f32 %v1936_v53, %v1942_v4  ;;  %1762 = vadd.xlane.f32.xlu1 %v1761_v51  ;;  %v1686_v51 = vadd.f32 %v3283_v38, %v1656_v56 }
0x1107   :  { %v1947_v6 = vmul.f32 1.442695, %v1944_v5 }
0x1109   :  { %2602 = vpow2.f32 %v1947_v6  ;;  %v1871_v61 = vpop.f32.mrf.mxu3 }
0x110a   :  { %1985 = vrot.lane.b32.xlu2 %v3189_v44, %s2798_s7 }
0x110f   :  { %v2603_v11 = vpop.eup %2602 }
0x1110   :  { %v1952_v9 = vsel %vm235_vm8, %v2603_v11, 0.0 }
0x1111   :  { %1953 = vadd.xlane.f32.xlu0 %v1952_v9 }
0x111e   :  { %1820 = vrot.lane.b32.xlu1 %v3208_v32, %s2797_s30 }
0x1125   :  { %2011 = vrot.lane.b32.xlu0 %v3208_v32, %s2798_s7 }
0x1165   :  { %v1951_v12 = vpop.xlane.xlu2 %1950 }
0x1166   :  { %2604 = vrcp.f32 %v1951_v12  ;;  %vm1960_vm7 = vweird.f32 %v1951_v12  ;;  %v1964_v24 = vand.u32 2147483647, %v1951_v12  ;;  %v1966_v25 = vand.u32 2147483648, %v1951_v12 }
0x1168   :  { %v1967_v36 = vor.u32 1.1754944e-38, %v1966_v25  ;;  %vm1965_vm13 = vcmp.eq.f32.partialorder %v1964_v24, 8.507059e+37 }
0x116c   :  { %v2605_v59 = vpop.eup %2604 }
0x116d   :  { %v1956_v47 = vmul.f32 %v2605_v59, %v1951_v12  ;;  %vm1961_vm5 = vweird.f32 %v2605_v59  ;;  %v1986_v33 = vpop.permute.xlu2 %1985 }
0x116e   :  { %vm1962_vm10 = vmor %vm1960_vm7, %vm1961_vm5 }
0x116f   :  { %v1957_v15 = vsub.f32 1.0, %v1956_v47 }
0x1171   :  { %v1958_v32 = vmul.f32 %v2605_v59, %v1957_v15 }
0x1173   :  { %v1959_v60 = vadd.f32 %v2605_v59, %v1958_v32  ;;  %v2465_v32 = vld [vmem:[%s3432_s9 + $0x20] sm:$0xff] }
0x1175   :  { %v1963_v31 = vsel %vm1962_vm10, %v2605_v59, %v1959_v60 }
0x1176   :  { %v1968_v43 = vsel %vm1965_vm13, %v1967_v36, %v1963_v31  ;;  %v2518_v31 = vld [vmem:[#allocation8 + $0x1] ss:$0 sm:$0xff] }
0x1177   :  { %v1969_v49 = vmul.f32 %v3290_v41, %v1968_v43  ;;  %v1683_v41 = vadd.f32 %v3278_v35, %v1653_v55 }
0x1178   :  { %v1763_v7 = vpop.xlane.xlu1 %1762 }
0x1179   :  { %2606 = vrcp.f32 %v1763_v7  ;;  %v1790_v17 = vand.u32 2147483648, %v1763_v7  ;;  %vm1784_vm2 = vweird.f32 %v1763_v7  ;;  %v1788_v18 = vand.u32 2147483647, %v1763_v7 }
0x117a   :  { %v1877_v62 = vadd.f32 %v1871_v61, %v1683_v41 }
0x117b   :  { %v1791_v21 = vor.u32 1.1754944e-38, %v1790_v17  ;;  %vm1789_vm4 = vcmp.eq.f32.partialorder %v1788_v18, 8.507059e+37  ;;  %v2467_v17 = vld [vmem:[%s3432_s9 + $0x30] sm:$0xff]  ;;  %v2466_v18 = vld [vmem:[%s3432_s9 + $0x28] sm:$0xff] }
0x117f   :  { %v2607_v57 = vpop.eup %2606 }
0x1180   :  { %v1780_v13 = vmul.f32 %v2607_v57, %v1763_v7  ;;  %vm1785_vm1 = vweird.f32 %v2607_v57 }
0x1181   :  { %vm1786_vm3 = vmor %vm1784_vm2, %vm1785_vm1 }
0x1182   :  { %v1781_v39 = vsub.f32 1.0, %v1780_v13 }
0x1184   :  { %v1782_v44 = vmul.f32 %v2607_v57, %v1781_v39  ;;  %v1954_v14 = vpop.xlane.xlu0 %1953 }
0x1185   :  { %2608 = vrcp.f32 %v1954_v14  ;;  %v1981_v26 = vand.u32 2147483648, %v1954_v14  ;;  %v1979_v28 = vand.u32 2147483647, %v1954_v14  ;;  %vm1975_vm11 = vweird.f32 %v1954_v14 }
0x1186   :  { %v1783_v16 = vadd.f32 %v2607_v57, %v1782_v44 }
0x1187   :  { %v1982_v40 = vor.u32 1.1754944e-38, %v1981_v26  ;;  %vm1980_vm14 = vcmp.eq.f32.partialorder %v1979_v28, 8.507059e+37 }
0x1188   :  { %v1787_v19 = vsel %vm1786_vm3, %v2607_v57, %v1783_v16  ;;  %v2468_v16 = vld [vmem:[%s3432_s9 + $0x38] sm:$0xff]  ;;  %s2365_s9 = sshll.u32 %s3438_s15, 4  ;;  %s2366_s9 = int_to_ptr.hbm [resolvable:$true] %s2365_s9 }
0x1189   :  { %v1792_v22 = vsel %vm1789_vm4, %v1791_v21, %v1787_v19 }
0x118a   :  { %v1793_v30 = vmul.f32 %v2601_v2, %v1792_v22 }
0x118b   :  { %v2609_v20 = vpop.eup %2608 }
0x118c   :  { %v1971_v0 = vmul.f32 %v2609_v20, %v1954_v14  ;;  %vm1976_vm9 = vweird.f32 %v2609_v20 }
0x118d   :  { %vm1977_vm12 = vmor %vm1975_vm11, %vm1976_vm9 }
0x118e   :  { %v1972_v23 = vsub.f32 1.0, %v1971_v0 }
0x1190   :  { %v1973_v27 = vmul.f32 %v2609_v20, %v1972_v23  ;;  %v1821_v29 = vpop.permute.xlu1 %1820 }
0x1191   :  { %1841 = vmatpush.msra.mxu0 %v1821_v29 }
0x1192   :  { %v1974_v34 = vadd.f32 %v2609_v20, %v1973_v27  ;;  %2451 = vmatmul.msk.f32.vlgmr.msra.gmra.mxu0 %vm235_vm8, %v1793_v30 }
0x1193   :  { %2006 = vmatpush.msrb.mxu0 %v1986_v33 }
0x1194   :  { %v1978_v42 = vsel %vm1977_vm12, %v2609_v20, %v1974_v34 }
0x1195   :  { %v1983_v45 = vsel %vm1980_vm14, %v1982_v40, %v1978_v42  ;;  %2165 = vmatpush.msra.mxu0 %v2468_v16  ;;  %v2519_v40 = vld [vmem:[#allocation10 + $0x1] ss:$0 sm:$0xff] }
0x1196   :  { %v1984_v46 = vmul.f32 %v2603_v11, %v1983_v45 }
0x1197   :  { %v2012_v48 = vpop.permute.xlu0 %2011  ;;  %2166 = vmatpush.msra.mxu0 %v2467_v17 }
0x1198   :  { %2032 = vmatpush.msra.mxu1 %v2012_v48 }
0x1199   :  { %2460 = vmatmul.msk.f32.vlgmr.msra.gmra.mxu1 %vm235_vm8, %v1984_v46  ;;  %2167 = vmatpush.msra.mxu0 %v2466_v18 }
0x119a   :  { %2459 = vmatmul.msk.f32.vlgmr.msrb.gmra.mxu0 %vm235_vm8, %v1969_v49 }
0x119b   :  { %2168 = vmatpush.msra.mxu0 %v2465_v32 }
0x120f   :  { %v1843_v52 = vpop.f32.mrf.mxu0 }
0x1210   :  { %2454 = vmatmul.msk.f32.gmra.mxu3 %vm235_vm8, %v1843_v52 }
0x1216   :  { %v2034_v54 = vpop.f32.mrf.mxu1 }
0x1217   :  { %v2008_v53 = vpop.f32.mrf.mxu0 }
0x1218   :  { %2462 = vmatmul.msk.f32.vlgmr.msra.gmra.mxu2 %vm235_vm8, %v2008_v53 }
0x1220   :  { %2463 = vmatmul.msk.f32.gmra.mxu2 %vm235_vm8, %v2034_v54  ;;  %v2520_v54 = vld [vmem:[%s3433_s10 + $0x1] ss:$0 sm:$0xff] }
0x1293   :  { %v1874_v4 = vpop.f32.mrf.mxu3 }
0x1294   :  { %v1878_v6 = vadd.f32 %v1874_v4, %v1686_v51  ;;  %v2478_v51 = vld [vmem:[%s3434_s11 + $0x70] sm:$0xff] }
0x129b   :  { %v2062_v58 = vpop.f32.mrf.mxu2 }
0x129c   :  { %v2068_v3 = vadd.f32 %v2062_v58, %v1877_v62 }
0x129e   :  { %v2075_v2 = vadd.f32 %v2517_v63, %v2068_v3 }
0x12a0   :  { %v3318_v5 = vadd.f32 %v2075_v2, %v3148_v1  ;;  %v2479_v2 = vld [vmem:[%s3434_s11 + $0x78] sm:$0xff] }
0x12a1   :  { %2284 = vmatpush.msra.mxu3 %v2479_v2 }
0x12a2   :  { %v2083_v11 = vsel %vm133_vm0, %v3318_v5, 0.0 }
0x12a3   :  { %2084 = vadd.xlane.f32.xlu1 %v2083_v11  ;;  %v2065_v35 = vpop.f32.mrf.mxu2  ;;  %2285 = vmatpush.msra.mxu3 %v2478_v51  ;;  %v2477_v11 = vld [vmem:[%s3434_s11 + $0x68] sm:$0xff] }
0x12a4   :  { %v2069_v9 = vadd.f32 %v2065_v35, %v1878_v6 }
0x12a5   :  { %2286 = vmatpush.msra.mxu3 %v2477_v11 }
0x12a6   :  { %v2076_v12 = vadd.f32 %v2517_v63, %v2069_v9  ;;  %v2476_v9 = vld [vmem:[%s3434_s11 + $0x60] sm:$0xff] }
0x12a7   :  { %2287 = vmatpush.msra.mxu3 %v2476_v9 }
0x12a8   :  { %v3323_v7 = vadd.f32 %v2076_v12, %v3182_v8 }
0x12aa   :  { %v2086_v59 = vsel %vm133_vm0, %v3323_v7, 0.0 }
0x12ab   :  { %2087 = vadd.xlane.f32.xlu2 %v2086_v59 }
0x1316   :  { %v2085_v57 = vpop.xlane.xlu1 %2084 }
0x1317   :  { %v2089_v38 = vmul.f32 %v2085_v57, %v2919_v10 }
0x1319   :  { %v2091_v1 = vsub.f32 %v3318_v5, %v2089_v38  ;;  %v2475_v38 = vld [vmem:[%s3434_s11 + $0x58] sm:$0xff] }
0x131a   :  { %2288 = vmatpush.msra.mxu3 %v2475_v38 }
0x131b   :  { %v2093_v13 = vmul.f32 %v2091_v1, %v2091_v1 }
0x131d   :  { %v2095_v47 = vsel %vm133_vm0, %v2093_v13, 0.0  ;;  %v2474_v13 = vld [vmem:[%s3434_s11 + $0x50] sm:$0xff] }
0x131e   :  { %2096 = vadd.xlane.f32.xlu0 %v2095_v47  ;;  %v2088_v39 = vpop.xlane.xlu2 %2087  ;;  %2289 = vmatpush.msra.mxu3 %v2474_v13 }
0x131f   :  { %v2090_v44 = vmul.f32 %v2088_v39, %v2919_v10 }
0x1321   :  { %v2092_v14 = vsub.f32 %v3323_v7, %v2090_v44 }
0x1323   :  { %v2094_v8 = vmul.f32 %v2092_v14, %v2092_v14 }
0x1325   :  { %v2098_v15 = vsel %vm133_vm0, %v2094_v8, 0.0  ;;  %v2472_v8 = vld [vmem:[%s3434_s11 + $0x40] sm:$0xff] }
0x1326   :  { %2099 = vadd.xlane.f32.xlu1 %v2098_v15 }
0x1391   :  { %v2097_v19 = vpop.xlane.xlu0 %2096 }
0x1392   :  { %v2101_v20 = vmul.f32 %v2097_v19, %v2919_v10 }
0x1394   :  { %v2103_v21 = vadd.f32 1e-06, %v2101_v20 }
0x1396   :  { %2610 = vrsqrt.f32 %v2103_v21  ;;  %vm2111_vm15 = vweird.f32 %v2103_v21 }
0x1399   :  { %v2100_v0 = vpop.xlane.xlu1 %2099 }
0x139a   :  { %v2102_v22 = vmul.f32 %v2100_v0, %v2919_v10 }
0x139c   :  { %v2611_v60 = vpop.eup %2610  ;;  %v2104_v23 = vadd.f32 1e-06, %v2102_v22 }
0x139d   :  { %v2106_v24 = vmul.f32 %v2611_v60, %v2103_v21  ;;  %vm2112_vm8 = vweird.f32 %v2611_v60 }
0x139e   :  { %2612 = vrsqrt.f32 %v2104_v23  ;;  %vm2113_vm1 = vmor %vm2111_vm15, %vm2112_vm8  ;;  %vm2121_vm3 = vweird.f32 %v2104_v23 }
0x139f   :  { %v2107_v25 = vmul.f32 %v2611_v60, %v2106_v24 }
0x13a1   :  { %v2108_v26 = vmul.f32 0.5, %v2107_v25 }
0x13a3   :  { %v2109_v27 = vsub.f32 1.5, %v2108_v26 }
0x13a4   :  { %v2613_v28 = vpop.eup %2612 }
0x13a5   :  { %v2110_v29 = vmul.f32 %v2611_v60, %v2109_v27  ;;  %v2116_v30 = vmul.f32 %v2613_v28, %v2104_v23  ;;  %vm2122_vm2 = vweird.f32 %v2613_v28 }
0x13a6   :  { %vm2123_vm4 = vmor %vm2121_vm3, %vm2122_vm2 }
0x13a7   :  { %v2114_v33 = vsel %vm2113_vm1, %v2611_v60, %v2110_v29  ;;  %v2117_v34 = vmul.f32 %v2613_v28, %v2116_v30 }
0x13a8   :  { %v2125_v36 = vmul.f32 %v2114_v33, %v2091_v1 }
0x13a9   :  { %v2118_v42 = vmul.f32 0.5, %v2117_v34 }
0x13aa   :  { %v2130_v43 = vmul.f32 %v2518_v31, %v2125_v36 }
0x13ab   :  { %v2119_v45 = vsub.f32 1.5, %v2118_v42 }
0x13ac   :  { %v2135_v46 = vadd.f32 %v2519_v40, %v2130_v43 }
0x13ad   :  { %v2120_v48 = vmul.f32 %v2613_v28, %v2119_v45 }
0x13ae   :  { %2470 = vmatmul.msk.f32.vlgmr.msra.gmra.mxu0 %vm133_vm0, %v2135_v46 }
0x13af   :  { %v2124_v49 = vsel %vm2123_vm4, %v2613_v28, %v2120_v48 }
0x13b0   :  { %v2126_v50 = vmul.f32 %v2124_v49, %v2092_v14  ;;  %v2473_v14 = vld [vmem:[%s3434_s11 + $0x48] sm:$0xff] }
0x13b1   :  { %2290 = vmatpush.msra.mxu3 %v2473_v14 }
0x13b2   :  { %v2131_v52 = vmul.f32 %v2518_v31, %v2126_v50 }
0x13b3   :  { %2291 = vmatpush.msra.mxu3 %v2472_v8 }
0x13b4   :  { %v2136_v53 = vadd.f32 %v2519_v40, %v2131_v52 }
0x13b6   :  { %2471 = vmatmul.msk.f32.gmra.mxu0 %vm133_vm0, %v2136_v53 }
0x142b   :  { %v2170_v55 = vpop.f32.mrf.mxu0 }
0x142c   :  { %v3352_v56 = vadd.f32 %v2520_v54, %v2170_v55 }
0x142e   :  { %v3355_v61 = vmul.f32 0.70710677, %v3352_v56 }
0x1430   :  { %v2184_v41 = vand.u32 2147483647, %v3355_v61  ;;  %vm2180_vm8 = vcmp.ge.f32.partialorder %v3355_v61, 0.0 }
0x1432   :  { %v2186_v62 = vmul.f32 0.3275911, %v2184_v41  ;;  %v2238_v19 = vsub.f32 0.0, %v2184_v41 }
0x1433   :  { %v2173_v63 = vpop.f32.mrf.mxu0 }
0x1434   :  { %v2188_v58 = vadd.f32 1.0, %v2186_v62  ;;  %v3358_v3 = vadd.f32 %v2520_v54, %v2173_v63  ;;  %v2240_v23 = vmul.f32 %v2238_v19, %v2184_v41 }
0x1436   :  { %2614 = vrcp.f32 %v2188_v58  ;;  %v3364_v4 = vmul.f32 0.70710677, %v3358_v3  ;;  %v2201_v47 = vand.u32 2147483648, %v2188_v58  ;;  %v2199_v44 = vand.u32 2147483647, %v2188_v58 }
0x1437   :  { %vm2195_vm7 = vweird.f32 %v2188_v58  ;;  %v2242_v30 = vmul.f32 1.442695, %v2240_v23  ;;  %v2177_v13 = vmul.f32 0.5, %v3358_v3 }
0x1438   :  { %v2185_v6 = vand.u32 2147483647, %v3364_v4  ;;  %v2202_v16 = vor.u32 1.1754944e-38, %v2201_v47  ;;  %vm2200_vm10 = vcmp.eq.f32.partialorder %v2199_v44, 8.507059e+37  ;;  %vm2181_vm15 = vcmp.ge.f32.partialorder %v3364_v4, 0.0 }
0x1439   :  { %v2183_v38 = vsel %vm2181_vm15, 1.0, %v2799_v37 }
0x143a   :  { %v2187_v35 = vmul.f32 0.3275911, %v2185_v6  ;;  %v2239_v34 = vsub.f32 0.0, %v2185_v6 }
0x143c   :  { %v2615_v12 = vpop.eup %2614  ;;  %v2189_v57 = vadd.f32 1.0, %v2187_v35  ;;  %v2241_v46 = vmul.f32 %v2239_v34, %v2185_v6  ;;  %v2176_v6 = vmul.f32 0.5, %v3352_v56  ;;  %v2521_v56 = vld [vmem:[%s3435_s12 + $0x1] ss:$0 sm:$0xff] }
0x143d   :  { %v2191_v59 = vmul.f32 %v2615_v12, %v2188_v58  ;;  %vm2196_vm5 = vweird.f32 %v2615_v12  ;;  %v2182_v58 = vsel %vm2180_vm8, 1.0, %v2799_v37 }
0x143e   :  { %2616 = vrcp.f32 %v2189_v57  ;;  %vm2197_vm9 = vmor %vm2195_vm7, %vm2196_vm5  ;;  %v2216_v60 = vand.u32 2147483648, %v2189_v57  ;;  %v2214_v25 = vand.u32 2147483647, %v2189_v57  ;;  %vm2210_vm12 = vweird.f32 %v2189_v57 }
0x143f   :  { %v2192_v1 = vsub.f32 1.0, %v2191_v59  ;;  %2618 = vpow2.f32 %v2242_v30  ;;  %v2244_v53 = vmul.f32 1.442695, %v2241_v46  ;;  %v2523_v46 = vld [vmem:[%s3437_s14] ss:$0 sm:$0xff]  ;;  %s3440_s14 = smov 128  }
0x1440   :  { %v2217_v29 = vor.u32 1.1754944e-38, %v2216_v60  ;;  %vm2215_vm14 = vcmp.eq.f32.partialorder %v2214_v25, 8.507059e+37 }
0x1441   :  { %v2193_v39 = vmul.f32 %v2615_v12, %v2192_v1  ;;  %2620 = vpow2.f32 %v2244_v53 }
0x1443   :  { %v2194_v15 = vadd.f32 %v2615_v12, %v2193_v39 }
0x1444   :  { %v2617_v17 = vpop.eup %2616 }
0x1445   :  { %v2198_v18 = vsel %vm2197_vm9, %v2615_v12, %v2194_v15  ;;  %v2206_v20 = vmul.f32 %v2617_v17, %v2189_v57  ;;  %vm2211_vm11 = vweird.f32 %v2617_v17  ;;  %v2619_v54 = vpop.eup %2618 }
0x1446   :  { %v2203_v32 = vsel %vm2200_vm10, %v2202_v16, %v2198_v18  ;;  %vm2212_vm13 = vmor %vm2210_vm12, %vm2211_vm11 }
0x1447   :  { %v2220_v21 = vmul.f32 1.0614054, %v2203_v32  ;;  %v2207_v0 = vsub.f32 1.0, %v2206_v20  ;;  %v2621_v12 = vpop.eup %2620 }
0x1449   :  { %v2222_v22 = vadd.f32 -1.4531521, %v2220_v21  ;;  %v2208_v24 = vmul.f32 %v2617_v17, %v2207_v0 }
0x144b   :  { %v2224_v26 = vmul.f32 %v2222_v22, %v2203_v32  ;;  %v2209_v27 = vadd.f32 %v2617_v17, %v2208_v24 }
0x144d   :  { %v2226_v28 = vadd.f32 1.4214138, %v2224_v26  ;;  %v2213_v31 = vsel %vm2212_vm13, %v2617_v17, %v2209_v27 }
0x144e   :  { %v2218_v36 = vsel %vm2215_vm14, %v2217_v29, %v2213_v31 }
0x144f   :  { %v2228_v33 = vmul.f32 %v2226_v28, %v2203_v32  ;;  %v2221_v40 = vmul.f32 1.0614054, %v2218_v36 }
0x1451   :  { %v2230_v42 = vadd.f32 -0.28449672, %v2228_v33  ;;  %v2223_v43 = vadd.f32 -1.4531521, %v2221_v40  ;;  %v2522_v40 = vld [vmem:[%s3436_s13] ss:$0 sm:$0xff] }
0x1452   :  { %s2800_s13 = smov [#allocation11]  }
0x1453   :  { %v2232_v45 = vmul.f32 %v2230_v42, %v2203_v32  ;;  %v2225_v48 = vmul.f32 %v2223_v43, %v2218_v36  ;;  %s2363_s25 = sshll.u32 %s2800_s13, 4  ;;  %s2364_s25 = int_to_ptr.vmem [resolvable:$true] %s2363_s25 }
0x1455   :  { %v2234_v49 = vadd.f32 0.2548296, %v2232_v45  ;;  %v2227_v50 = vadd.f32 1.4214138, %v2225_v48 }
0x1457   :  { %v2236_v52 = vmul.f32 %v2234_v49, %v2203_v32  ;;  %v2229_v55 = vmul.f32 %v2227_v50, %v2218_v36 }
0x1459   :  { %v2246_v41 = vmul.f32 %v2619_v54, %v2236_v52  ;;  %v2231_v62 = vadd.f32 -0.28449672, %v2229_v55 }
0x145b   :  { %v2248_v63 = vsub.f32 1.0, %v2246_v41  ;;  %v2233_v2 = vmul.f32 %v2231_v62, %v2218_v36 }
0x145d   :  { %v2250_v51 = vmul.f32 %v2248_v63, %v2182_v58  ;;  %v2235_v11 = vadd.f32 0.2548296, %v2233_v2 }
0x145f   :  { %v2252_v35 = vadd.f32 1.0, %v2250_v51  ;;  %v2237_v9 = vmul.f32 %v2235_v11, %v2218_v36 }
0x1461   :  { %v2254_v59 = vmul.f32 %v2252_v35, %v2176_v6  ;;  %v2247_v57 = vmul.f32 %v2621_v12, %v2237_v9 }
0x1463   :  { %2481 = vmatmul.msk.f32.vlgmr.msra.gmra.mxu3 %vm1183_vm6, %v2254_v59  ;;  %v2249_v61 = vsub.f32 1.0, %v2247_v57 }
0x1465   :  { %v2251_v1 = vmul.f32 %v2249_v61, %v2183_v38 }
0x1467   :  { %v2253_v47 = vadd.f32 1.0, %v2251_v1 }
0x1469   :  { %v2255_v39 = vmul.f32 %v2253_v47, %v2177_v13 }
0x146b   :  { %2482 = vmatmul.msk.f32.gmra.mxu3 %vm1183_vm6, %v2255_v39 }
0x14e6   :  { %v2293_v44 = vpop.f32.mrf.mxu3 }
0x14e7   :  { %v2294_v14 = vadd.f32 %v2521_v56, %v2293_v44 }
0x14e9   :  { %v2299_v4 = vadd.f32 %v2294_v14, %v3318_v5 }
0x14eb   :  { %v2303_v8 = vsel %vm133_vm0, %v2299_v4, 0.0 }
0x14ec   :  { %2304 = vadd.xlane.f32.xlu2 %v2303_v8 }
0x14ee   :  { %v2296_v15 = vpop.f32.mrf.mxu3 }
0x14ef   :  { %v2297_v37 = vadd.f32 %v2521_v56, %v2296_v15 }
0x14f1   :  { %v2300_v16 = vadd.f32 %v2297_v37, %v3323_v7 }
0x14f3   :  { %v2306_v3 = vsel %vm133_vm0, %v2300_v16, 0.0 }
0x14f4   :  { %2307 = vadd.xlane.f32.xlu0 %v2306_v3 }
0x155f   :  { %v2305_v17 = vpop.xlane.xlu2 %2304 }
0x1560   :  { %v2309_v18 = vmul.f32 %v2305_v17, %v2919_v10 }
0x1562   :  { %v2311_v32 = vsub.f32 %v2299_v4, %v2309_v18 }
0x1564   :  { %v2313_v19 = vmul.f32 %v2311_v32, %v2311_v32 }
0x1566   :  { %v2315_v20 = vsel %vm133_vm0, %v2313_v19, 0.0 }
0x1567   :  { %2316 = vadd.xlane.f32.xlu1 %v2315_v20  ;;  %v2308_v21 = vpop.xlane.xlu0 %2307 }
0x1568   :  { %v2310_v5 = vmul.f32 %v2308_v21, %v2919_v10 }
0x156a   :  { %v2312_v0 = vsub.f32 %v2300_v16, %v2310_v5 }
0x156c   :  { %v2314_v22 = vmul.f32 %v2312_v0, %v2312_v0 }
0x156e   :  { %v2318_v60 = vsel %vm133_vm0, %v2314_v22, 0.0 }
0x156f   :  { %2319 = vadd.xlane.f32.xlu2 %v2318_v60 }
0x15da   :  { %v2317_v7 = vpop.xlane.xlu1 %2316 }
0x15db   :  { %v2321_v23 = vmul.f32 %v2317_v7, %v2919_v10 }
0x15dd   :  { %v2323_v24 = vadd.f32 1e-06, %v2321_v23 }
0x15df   :  { %2622 = vrsqrt.f32 %v2323_v24  ;;  %vm2331_vm1 = vweird.f32 %v2323_v24 }
0x15e2   :  { %v2320_v25 = vpop.xlane.xlu2 %2319 }
0x15e3   :  { %v2322_v26 = vmul.f32 %v2320_v25, %v2919_v10 }
0x15e5   :  { %v2623_v27 = vpop.eup %2622  ;;  %v2324_v29 = vadd.f32 1e-06, %v2322_v26 }
0x15e6   :  { %v2326_v28 = vmul.f32 %v2623_v27, %v2323_v24  ;;  %vm2332_vm6 = vweird.f32 %v2623_v27 }
0x15e7   :  { %2624 = vrsqrt.f32 %v2324_v29  ;;  %vm2333_vm2 = vmor %vm2331_vm1, %vm2332_vm6  ;;  %vm2341_vm4 = vweird.f32 %v2324_v29 }
0x15e8   :  { %v2327_v30 = vmul.f32 %v2623_v27, %v2326_v28 }
0x15ea   :  { %v2328_v31 = vmul.f32 0.5, %v2327_v30 }
0x15ec   :  { %v2329_v33 = vsub.f32 1.5, %v2328_v31 }
0x15ed   :  { %v2625_v34 = vpop.eup %2624 }
0x15ee   :  { %v2330_v36 = vmul.f32 %v2623_v27, %v2329_v33  ;;  %v2336_v42 = vmul.f32 %v2625_v34, %v2324_v29  ;;  %vm2342_vm3 = vweird.f32 %v2625_v34 }
0x15ef   :  { %vm2343_vm5 = vmor %vm2341_vm4, %vm2342_vm3 }
0x15f0   :  { %v2334_v43 = vsel %vm2333_vm2, %v2623_v27, %v2330_v36  ;;  %v2337_v10 = vmul.f32 %v2625_v34, %v2336_v42 }
0x15f1   :  { %v2345_v45 = vmul.f32 %v2334_v43, %v2311_v32 }
0x15f2   :  { %v2338_v49 = vmul.f32 0.5, %v2337_v10 }
0x15f3   :  { %v2350_v48 = vmul.f32 %v2522_v40, %v2345_v45 }
0x15f4   :  { %v2339_v50 = vsub.f32 1.5, %v2338_v49 }
0x15f5   :  { %v2355_v52 = vadd.f32 %v2523_v46, %v2350_v48 }
0x15f6   :  { %v2340_v53 = vmul.f32 %v2625_v34, %v2339_v50 }
0x15f7   :  { %2357 = vst.msk [vmem:[#allocation11] sm:$0xff] %vm133_vm0, %v2355_v52 }
0x15f8   :  { %v2344_v54 = vsel %vm2343_vm5, %v2625_v34, %v2340_v53 }
0x15f9   :  { %v2346_v55 = vmul.f32 %v2344_v54, %v2312_v0 }
0x15fb   :  { %v2351_v41 = vmul.f32 %v2522_v40, %v2346_v55 }
0x15fd   :  { %v2356_v62 = vadd.f32 %v2523_v46, %v2351_v41 }
0x15ff   :  { %2358 = vst.msk [vmem:[#allocation11 + $0x8] sm:$0xff] %vm133_vm0, %v2356_v62 }
0x1600   :  { %2371 = dma.vmem_to_hbm [thread:$0]  %s2364_s25, 256, %s2366_s9, [#allocation4], %s3440_s14, %s3440_s14, %s2784_s22  }
0x1601   :  { %2776 = dma.done.wait [#allocation4], 256  }
0x1602   :  { %2777 = vsyncadd [#allocation4], 4294967040 }
0x1603   :  { %2376 = vsyncpa [#allocation3], 1 }
0x1604   :  { %2377 = vsyncpa [#allocation6], 1 }
0x1605   :  { %2378 = vsyncpa [#allocation9], 1 }
0x1606   :  { %2379 = vsyncpa [#allocation4], 1 }

</bundles_post_ra>
